<compile_context>
chip_gen: v5e
topology: v5e:2x2
jax: 0.10.0
libtpu: 0.0.40
codegen_flags: <defaults>
</compile_context>

<pallas_src>
import numpy as np
import jax
import jax.numpy as jnp
from jax import lax
from jax.experimental import pallas as pl
from jax.experimental.pallas import tpu as pltpu

VOCAB, EMB, HID, LAT = 256, 64, 128, 64


def vae_kernel(emb_ref, noise_ref,
               wih_e_ref, whh_e_ref, benc_x_ref, benc_hn_ref,
               wmlv_ref, bmlv_ref,
               wih_de_ref, wih_dz_ref, whh_d_ref, bdec_x_ref, bdec_hn_ref,
               wout_ref, bout_ref,
               logits_ref, mlv_ref,
               g_enc_ref, g_dec_ref, hs_ref):
    TB, _E = emb_ref.shape              # T*B rows, time-major (row = t*B + b)
    B, L = noise_ref.shape              # padded batch (multiple of 8), latent dim
    T = TB // B
    H = whh_e_ref.shape[0]

    def gru_step(xg, h, whh, bhn):
        # xg already contains x @ W_ih + b_ih + [b_hh_r, b_hh_z, 0]
        gh = jnp.dot(h, whh, preferred_element_type=jnp.float32)
        r = jax.nn.sigmoid(xg[:, :H] + gh[:, :H])
        u = jax.nn.sigmoid(xg[:, H:2 * H] + gh[:, H:2 * H])
        n = jnp.tanh(xg[:, 2 * H:] + r * (gh[:, 2 * H:] + bhn))
        return (1.0 - u) * n + u * h

    # ---- encoder: hoisted input-gate matmul for all timesteps (one big matmul) ----
    g_enc_ref[...] = (jnp.dot(emb_ref[...], wih_e_ref[...],
                              preferred_element_type=jnp.float32)
                      + benc_x_ref[...])

    whh_e = whh_e_ref[...]                                   # recurrent weight only
    benc_hn = jnp.broadcast_to(benc_hn_ref[...], (B, H))     # pre-broadcast bias

    def enc_body(t, h):
        row = pl.multiple_of(t * B, 8)
        return gru_step(g_enc_ref[pl.ds(row, B), :], h, whh_e, benc_hn)

    h_enc = lax.fori_loop(0, T, enc_body, jnp.zeros((B, H), jnp.float32),
                          unroll=True)

    # ---- fused mu/logvar projection (lane-dense 2*LAT = 128) + reparameterize ----
    mlv = (jnp.dot(h_enc, wmlv_ref[...], preferred_element_type=jnp.float32)
           + bmlv_ref[...])
    mlv_ref[...] = mlv
    m = mlv[:, :L]
    lv = mlv[:, L:]
    zlat = m + jnp.exp(0.5 * lv) * noise_ref[...]

    # decoder input is concat([emb_t, z]); split the matmul instead of concatenating.
    # z-part of the gates (constant over time) + all biases:
    z_gates = (jnp.dot(zlat, wih_dz_ref[...], preferred_element_type=jnp.float32)
               + bdec_x_ref[...])
    # emb-part of the decoder gates for all timesteps (one big matmul):
    g_dec_ref[...] = jnp.dot(emb_ref[...], wih_de_ref[...],
                             preferred_element_type=jnp.float32)

    whh_d = whh_d_ref[...]
    bdec_hn = jnp.broadcast_to(bdec_hn_ref[...], (B, H))

    def dec_body(t, h):
        row = pl.multiple_of(t * B, 8)
        xg = g_dec_ref[pl.ds(row, B), :] + z_gates
        h_new = gru_step(xg, h, whh_d, bdec_hn)
        hs_ref[pl.ds(row, B), :] = h_new
        return h_new

    lax.fori_loop(0, T, dec_body, jnp.zeros((B, H), jnp.float32), unroll=True)

    # ---- batched output projection: one (T*B, H) @ (H, V) matmul, lane-dense store ----
    logits_ref[...] = (jnp.dot(hs_ref[...], wout_ref[...],
                               preferred_element_type=jnp.float32)
                       + bout_ref[...])


def init_params(key):
    ks = jax.random.split(key, 16)
    s = 1.0 / np.sqrt(HID)

    def u(k, shape, scale):
        return jax.random.uniform(k, shape, jnp.float32, -scale, scale)

    return {
        "E":        u(ks[0], (VOCAB, EMB), 0.1),
        "enc_wih":  u(ks[1], (EMB, 3 * HID), s),
        "enc_whh":  u(ks[2], (HID, 3 * HID), s),
        "enc_bih":  u(ks[3], (1, 3 * HID), s),
        "enc_bhh":  u(ks[4], (1, 3 * HID), s),
        "mu_w":     u(ks[5], (HID, LAT), s),
        "mu_b":     u(ks[6], (1, LAT), s),
        "lv_w":     u(ks[7], (HID, LAT), s),
        "lv_b":     u(ks[8], (1, LAT), s),
        "dec_wih":  u(ks[9], (EMB + LAT, 3 * HID), s),
        "dec_whh":  u(ks[10], (HID, 3 * HID), s),
        "dec_bih":  u(ks[11], (1, 3 * HID), s),
        "dec_bhh":  u(ks[12], (1, 3 * HID), s),
        "out_w":    u(ks[13], (HID, VOCAB), s),
        "out_b":    u(ks[14], (1, VOCAB), s),
    }


def _fold_biases(bih, bhh, H):
    """b_x = b_ih + [b_hh_r, b_hh_z, 0];  b_hn kept separate (multiplied by r)."""
    bx = bih + jnp.concatenate(
        [bhh[:, :2 * H], jnp.zeros_like(bhh[:, 2 * H:])], axis=1)
    return bx, bhh[:, 2 * H:]


def vae_forward(params, x, noise):
    """x: int32 (B, T) token ids; noise: f32 (B, LAT) ~ N(0,1). Returns (logits, m, lv)."""
    B, T = x.shape
    Bp = max(8, -(-B // 8) * 8)          # pad batch to a multiple of 8 sublanes

    # Embedding row-gather is left to XLA (glue around the kernel).
    emb = params["E"][x]                           # (B, T, E)
    emb_t = jnp.transpose(emb, (1, 0, 2))          # (T, B, E) time-major (small tensor)
    if Bp != B:
        emb_t = jnp.pad(emb_t, ((0, 0), (0, Bp - B), (0, 0)))
        noise_p = jnp.pad(noise, ((0, Bp - B), (0, 0)))
    else:
        noise_p = noise
    emb_flat = emb_t.reshape(T * Bp, EMB)          # (T*B, E), row = t*B + b

    dec_wih = params["dec_wih"]
    wih_de, wih_dz = dec_wih[:EMB], dec_wih[EMB:]
    benc_x, benc_hn = _fold_biases(params["enc_bih"], params["enc_bhh"], HID)
    bdec_x, bdec_hn = _fold_biases(params["dec_bih"], params["dec_bhh"], HID)
    wmlv = jnp.concatenate([params["mu_w"], params["lv_w"]], axis=1)   # (H, 2*LAT)
    bmlv = jnp.concatenate([params["mu_b"], params["lv_b"]], axis=1)   # (1, 2*LAT)

    args = (emb_flat, noise_p,
            params["enc_wih"], params["enc_whh"], benc_x, benc_hn,
            wmlv, bmlv,
            wih_de, wih_dz, params["dec_whh"], bdec_x, bdec_hn,
            params["out_w"], params["out_b"])

    out_shapes = (
        jax.ShapeDtypeStruct((T * Bp, VOCAB), jnp.float32),
        jax.ShapeDtypeStruct((Bp, 2 * LAT), jnp.float32),
    )

    # Advisory cost estimate for the XLA scheduler.
    flops = int(2 * T * Bp * (2 * EMB * 3 * HID + 2 * HID * 3 * HID + HID * VOCAB)
                + 2 * Bp * (HID * 2 * LAT + LAT * 3 * HID))
    transc = int(2 * T * Bp * 3 * HID + Bp * LAT)
    bytes_accessed = int(sum(int(np.prod(a.shape)) * 4 for a in args)
                         + sum(int(np.prod(s.shape)) * 4 for s in out_shapes))

    vmem_spec = pl.BlockSpec(memory_space=pltpu.MemorySpace.VMEM)

    logits2d, mlv = pl.pallas_call(
        vae_kernel,
        out_shape=out_shapes,
        in_specs=[vmem_spec] * len(args),
        out_specs=(vmem_spec, vmem_spec),
        scratch_shapes=[
            pltpu.VMEM((T * Bp, 3 * HID), jnp.float32),   # encoder input gates
            pltpu.VMEM((T * Bp, 3 * HID), jnp.float32),   # decoder input gates (emb part)
            pltpu.VMEM((T * Bp, HID), jnp.float32),       # decoder hidden states
        ],
        compiler_params=pltpu.CompilerParams(
            vmem_limit_bytes=32 * 1024 * 1024),
        cost_estimate=pl.CostEstimate(
            flops=flops, transcendentals=transc, bytes_accessed=bytes_accessed),
    )(*args)

    logits = jnp.transpose(logits2d.reshape(T, Bp, VOCAB)[:, :B], (1, 0, 2))
    m = mlv[:B, :LAT]
    lv = mlv[:B, LAT:]
    return logits, m, lv               # batch-first (B, T, V)


# ---------------- pure-JAX reference (for correctness check) ----------------
def _gru_ref(x_seq, wih, whh, bih, bhh):
    H = whh.shape[0]

    def step(h, x):
        gi = x @ wih + bih
        gh = h @ whh + bhh
        r = jax.nn.sigmoid(gi[:, :H] + gh[:, :H])
        z = jax.nn.sigmoid(gi[:, H:2 * H] + gh[:, H:2 * H])
        n = jnp.tanh(gi[:, 2 * H:] + r * gh[:, 2 * H:])
        h_new = (1.0 - z) * n + z * h
        return h_new, h_new

    h0 = jnp.zeros((x_seq.shape[1], H), jnp.float32)
    h_last, hs = lax.scan(step, h0, x_seq)
    return hs, h_last


def vae_forward_ref(params, x, noise):
    emb = params["E"][x]
    emb_t = jnp.transpose(emb, (1, 0, 2))
    _, h = _gru_ref(emb_t, params["enc_wih"], params["enc_whh"],
                    params["enc_bih"], params["enc_bhh"])
    m = h @ params["mu_w"] + params["mu_b"]
    lv = h @ params["lv_w"] + params["lv_b"]
    z = m + jnp.exp(0.5 * lv) * noise
    zc = jnp.broadcast_to(z[None], (emb_t.shape[0],) + z.shape)
    dec_in = jnp.concatenate([emb_t, zc], -1)
    hs, _ = _gru_ref(dec_in, params["dec_wih"], params["dec_whh"],
                     params["dec_bih"], params["dec_bhh"])
    logits = hs @ params["out_w"] + params["out_b"]
    return jnp.transpose(logits, (1, 0, 2)), m, lv


if __name__ == "__main__":
    B, T = 2, 8
    key = jax.random.PRNGKey(0)
    k_x, k_noise, k_param = jax.random.split(key, 3)

    x = jax.random.randint(k_x, (B, T), 0, VOCAB, dtype=jnp.int32)
    noise = jax.random.normal(k_noise, (B, LAT), dtype=jnp.float32)
    params = init_params(k_param)

    logits, m, lv = jax.block_until_ready(
        jax.jit(vae_forward)(params, x, noise))

    logits_r, m_r, lv_r = vae_forward_ref(params, x, noise)
    np.testing.assert_allclose(np.asarray(logits), np.asarray(logits_r), rtol=2e-3, atol=2e-3)
    np.testing.assert_allclose(np.asarray(m), np.asarray(m_r), rtol=2e-3, atol=2e-3)
    np.testing.assert_allclose(np.asarray(lv), np.asarray(lv_r), rtol=2e-3, atol=2e-3)

    assert logits.shape == (B, T, VOCAB) and m.shape == (B, LAT) and lv.shape == (B, LAT)
    print("KERNEL_OK")
</pallas_src>

<mosaic_0001>
module attributes {stable_mosaic.version = 11 : i64} {
  func.func @vae_kernel(%arg0: memref<64x64xf32, #tpu.memory_space<vmem>>, %arg1: memref<8x64xf32, #tpu.memory_space<vmem>>, %arg2: memref<64x384xf32, #tpu.memory_space<vmem>>, %arg3: memref<128x384xf32, #tpu.memory_space<vmem>>, %arg4: memref<1x384xf32, #tpu.memory_space<vmem>>, %arg5: memref<1x128xf32, #tpu.memory_space<vmem>>, %arg6: memref<128x128xf32, #tpu.memory_space<vmem>>, %arg7: memref<1x128xf32, #tpu.memory_space<vmem>>, %arg8: memref<64x384xf32, #tpu.memory_space<vmem>>, %arg9: memref<64x384xf32, #tpu.memory_space<vmem>>, %arg10: memref<128x384xf32, #tpu.memory_space<vmem>>, %arg11: memref<1x384xf32, #tpu.memory_space<vmem>>, %arg12: memref<1x128xf32, #tpu.memory_space<vmem>>, %arg13: memref<128x256xf32, #tpu.memory_space<vmem>>, %arg14: memref<1x256xf32, #tpu.memory_space<vmem>>, %arg15: memref<64x256xf32, #tpu.memory_space<vmem>>, %arg16: memref<8x128xf32, #tpu.memory_space<vmem>>, %arg17: memref<64x384xf32, #tpu.memory_space<vmem>>, %arg18: memref<64x384xf32, #tpu.memory_space<vmem>>, %arg19: memref<64x128xf32, #tpu.memory_space<vmem>>) attributes {dimension_semantics = [], scalar_prefetch = 0 : i64, scratch_operands = 3 : i64, tpu.core_type = #tpu.core_type<tc>} {
    %c0 = arith.constant 0 : index
    %c0_0 = arith.constant 0 : index
    %0 = vector.load %arg0[%c0, %c0_0] : memref<64x64xf32, #tpu.memory_space<vmem>>, vector<64x64xf32>
    %c0_1 = arith.constant 0 : index
    %c0_2 = arith.constant 0 : index
    %1 = vector.load %arg2[%c0_1, %c0_2] : memref<64x384xf32, #tpu.memory_space<vmem>>, vector<64x384xf32>
    %cst = arith.constant dense<0.000000e+00> : vector<64x384xf32>
    %2 = tpu.matmul %0, %1, %cst {dimension_numbers = #tpu.dot_dimension_numbers<[1], [0], [0], [1], [0, 0, 1, 1], [], []>} : vector<64x64xf32>, vector<64x384xf32>, vector<64x384xf32> -> vector<64x384xf32>
    %c0_3 = arith.constant 0 : index
    %c0_4 = arith.constant 0 : index
    %3 = vector.load %arg4[%c0_3, %c0_4] : memref<1x384xf32, #tpu.memory_space<vmem>>, vector<1x384xf32>
    %4 = vector.broadcast %3 : vector<1x384xf32> to vector<64x384xf32>
    %5 = arith.addf %2, %4 : vector<64x384xf32>
    %c0_5 = arith.constant 0 : index
    %c0_6 = arith.constant 0 : index
    %6 = vector.load %arg17[%c0_5, %c0_6] : memref<64x384xf32, #tpu.memory_space<vmem>>, vector<64x384xf32>
    tpu.vector_store %arg17[%c0_5, %c0_6], %5 {strides = array<i32>} : memref<64x384xf32, #tpu.memory_space<vmem>>, vector<64x384xf32>,
    %c0_7 = arith.constant 0 : index
    %c0_8 = arith.constant 0 : index
    %7 = vector.load %arg3[%c0_7, %c0_8] : memref<128x384xf32, #tpu.memory_space<vmem>>, vector<128x384xf32>
    %c0_9 = arith.constant 0 : index
    %c0_10 = arith.constant 0 : index
    %8 = vector.load %arg5[%c0_9, %c0_10] : memref<1x128xf32, #tpu.memory_space<vmem>>, vector<1x128xf32>
    %9 = vector.shape_cast %8 : vector<1x128xf32> to vector<1x128xf32>
    %10 = vector.broadcast %9 : vector<1x128xf32> to vector<8x128xf32>
    %cst_11 = arith.constant 0.000000e+00 : f32
    %11 = vector.broadcast %cst_11 : f32 to vector<8x128xf32>
    %c0_i32 = arith.constant 0 : i32
    %c8_i32 = arith.constant 8 : i32
    %12 = arith.muli %c0_i32, %c8_i32 : i32
    %13 = tpu.assume_multiple %12, 8 : i32
    %14 = arith.index_cast %13 : i32 to index
    %c0_12 = arith.constant 0 : index
    %15 = vector.load %arg17[%14, %c0_12] : memref<64x384xf32, #tpu.memory_space<vmem>>, vector<8x384xf32>
    %cst_13 = arith.constant dense<0.000000e+00> : vector<8x384xf32>
    %16 = tpu.matmul %11, %7, %cst_13 {dimension_numbers = #tpu.dot_dimension_numbers<[1], [0], [0], [1], [0, 0, 1, 1], [], []>} : vector<8x128xf32>, vector<128x384xf32>, vector<8x384xf32> -> vector<8x384xf32>
    %17 = vector.extract_strided_slice %15 {offsets = [0, 0], sizes = [8, 128], strides = [1, 1]} : vector<8x384xf32> to vector<8x128xf32>
    %18 = vector.extract_strided_slice %16 {offsets = [0, 0], sizes = [8, 128], strides = [1, 1]} : vector<8x384xf32> to vector<8x128xf32>
    %19 = arith.addf %17, %18 : vector<8x128xf32>
    %20 = arith.negf %19 : vector<8x128xf32>
    %21 = math.exp %20 : vector<8x128xf32>
    %cst_14 = arith.constant 1.000000e+00 : f32
    %22 = vector.broadcast %cst_14 : f32 to vector<8x128xf32>
    %23 = arith.addf %22, %21 : vector<8x128xf32>
    %24 = arith.divf %22, %23 : vector<8x128xf32>
    %25 = vector.extract_strided_slice %15 {offsets = [0, 128], sizes = [8, 128], strides = [1, 1]} : vector<8x384xf32> to vector<8x128xf32>
    %26 = vector.extract_strided_slice %16 {offsets = [0, 128], sizes = [8, 128], strides = [1, 1]} : vector<8x384xf32> to vector<8x128xf32>
    %27 = arith.addf %25, %26 : vector<8x128xf32>
    %28 = arith.negf %27 : vector<8x128xf32>
    %29 = math.exp %28 : vector<8x128xf32>
    %cst_15 = arith.constant 1.000000e+00 : f32
    %30 = vector.broadcast %cst_15 : f32 to vector<8x128xf32>
    %31 = arith.addf %30, %29 : vector<8x128xf32>
    %32 = arith.divf %30, %31 : vector<8x128xf32>
    %33 = vector.extract_strided_slice %15 {offsets = [0, 256], sizes = [8, 128], strides = [1, 1]} : vector<8x384xf32> to vector<8x128xf32>
    %34 = vector.extract_strided_slice %16 {offsets = [0, 256], sizes = [8, 128], strides = [1, 1]} : vector<8x384xf32> to vector<8x128xf32>
    %35 = arith.addf %34, %10 : vector<8x128xf32>
    %36 = arith.mulf %24, %35 : vector<8x128xf32>
    %37 = arith.addf %33, %36 : vector<8x128xf32>
    %38 = math.tanh %37 : vector<8x128xf32>
    %cst_16 = arith.constant 1.000000e+00 : f32
    %39 = vector.broadcast %cst_16 : f32 to vector<8x128xf32>
    %40 = arith.subf %39, %32 : vector<8x128xf32>
    %41 = arith.mulf %40, %38 : vector<8x128xf32>
    %42 = arith.mulf %32, %11 : vector<8x128xf32>
    %43 = arith.addf %41, %42 : vector<8x128xf32>
    %c1_i32 = arith.constant 1 : i32
    %c8_i32_17 = arith.constant 8 : i32
    %44 = arith.muli %c1_i32, %c8_i32_17 : i32
    %45 = tpu.assume_multiple %44, 8 : i32
    %46 = arith.index_cast %45 : i32 to index
    %c0_18 = arith.constant 0 : index
    %47 = vector.load %arg17[%46, %c0_18] : memref<64x384xf32, #tpu.memory_space<vmem>>, vector<8x384xf32>
    %cst_19 = arith.constant dense<0.000000e+00> : vector<8x384xf32>
    %48 = tpu.matmul %43, %7, %cst_19 {dimension_numbers = #tpu.dot_dimension_numbers<[1], [0], [0], [1], [0, 0, 1, 1], [], []>} : vector<8x128xf32>, vector<128x384xf32>, vector<8x384xf32> -> vector<8x384xf32>
    %49 = vector.extract_strided_slice %47 {offsets = [0, 0], sizes = [8, 128], strides = [1, 1]} : vector<8x384xf32> to vector<8x128xf32>
    %50 = vector.extract_strided_slice %48 {offsets = [0, 0], sizes = [8, 128], strides = [1, 1]} : vector<8x384xf32> to vector<8x128xf32>
    %51 = arith.addf %49, %50 : vector<8x128xf32>
    %52 = arith.negf %51 : vector<8x128xf32>
    %53 = math.exp %52 : vector<8x128xf32>
    %cst_20 = arith.constant 1.000000e+00 : f32
    %54 = vector.broadcast %cst_20 : f32 to vector<8x128xf32>
    %55 = arith.addf %54, %53 : vector<8x128xf32>
    %56 = arith.divf %54, %55 : vector<8x128xf32>
    %57 = vector.extract_strided_slice %47 {offsets = [0, 128], sizes = [8, 128], strides = [1, 1]} : vector<8x384xf32> to vector<8x128xf32>
    %58 = vector.extract_strided_slice %48 {offsets = [0, 128], sizes = [8, 128], strides = [1, 1]} : vector<8x384xf32> to vector<8x128xf32>
    %59 = arith.addf %57, %58 : vector<8x128xf32>
    %60 = arith.negf %59 : vector<8x128xf32>
    %61 = math.exp %60 : vector<8x128xf32>
    %cst_21 = arith.constant 1.000000e+00 : f32
    %62 = vector.broadcast %cst_21 : f32 to vector<8x128xf32>
    %63 = arith.addf %62, %61 : vector<8x128xf32>
    %64 = arith.divf %62, %63 : vector<8x128xf32>
    %65 = vector.extract_strided_slice %47 {offsets = [0, 256], sizes = [8, 128], strides = [1, 1]} : vector<8x384xf32> to vector<8x128xf32>
    %66 = vector.extract_strided_slice %48 {offsets = [0, 256], sizes = [8, 128], strides = [1, 1]} : vector<8x384xf32> to vector<8x128xf32>
    %67 = arith.addf %66, %10 : vector<8x128xf32>
    %68 = arith.mulf %56, %67 : vector<8x128xf32>
    %69 = arith.addf %65, %68 : vector<8x128xf32>
    %70 = math.tanh %69 : vector<8x128xf32>
    %cst_22 = arith.constant 1.000000e+00 : f32
    %71 = vector.broadcast %cst_22 : f32 to vector<8x128xf32>
    %72 = arith.subf %71, %64 : vector<8x128xf32>
    %73 = arith.mulf %72, %70 : vector<8x128xf32>
    %74 = arith.mulf %64, %43 : vector<8x128xf32>
    %75 = arith.addf %73, %74 : vector<8x128xf32>
    %c2_i32 = arith.constant 2 : i32
    %c8_i32_23 = arith.constant 8 : i32
    %76 = arith.muli %c2_i32, %c8_i32_23 : i32
    %77 = tpu.assume_multiple %76, 8 : i32
    %78 = arith.index_cast %77 : i32 to index
    %c0_24 = arith.constant 0 : index
    %79 = vector.load %arg17[%78, %c0_24] : memref<64x384xf32, #tpu.memory_space<vmem>>, vector<8x384xf32>
    %cst_25 = arith.constant dense<0.000000e+00> : vector<8x384xf32>
    %80 = tpu.matmul %75, %7, %cst_25 {dimension_numbers = #tpu.dot_dimension_numbers<[1], [0], [0], [1], [0, 0, 1, 1], [], []>} : vector<8x128xf32>, vector<128x384xf32>, vector<8x384xf32> -> vector<8x384xf32>
    %81 = vector.extract_strided_slice %79 {offsets = [0, 0], sizes = [8, 128], strides = [1, 1]} : vector<8x384xf32> to vector<8x128xf32>
    %82 = vector.extract_strided_slice %80 {offsets = [0, 0], sizes = [8, 128], strides = [1, 1]} : vector<8x384xf32> to vector<8x128xf32>
    %83 = arith.addf %81, %82 : vector<8x128xf32>
    %84 = arith.negf %83 : vector<8x128xf32>
    %85 = math.exp %84 : vector<8x128xf32>
    %cst_26 = arith.constant 1.000000e+00 : f32
    %86 = vector.broadcast %cst_26 : f32 to vector<8x128xf32>
    %87 = arith.addf %86, %85 : vector<8x128xf32>
    %88 = arith.divf %86, %87 : vector<8x128xf32>
    %89 = vector.extract_strided_slice %79 {offsets = [0, 128], sizes = [8, 128], strides = [1, 1]} : vector<8x384xf32> to vector<8x128xf32>
    %90 = vector.extract_strided_slice %80 {offsets = [0, 128], sizes = [8, 128], strides = [1, 1]} : vector<8x384xf32> to vector<8x128xf32>
    %91 = arith.addf %89, %90 : vector<8x128xf32>
    %92 = arith.negf %91 : vector<8x128xf32>
    %93 = math.exp %92 : vector<8x128xf32>
    %cst_27 = arith.constant 1.000000e+00 : f32
    %94 = vector.broadcast %cst_27 : f32 to vector<8x128xf32>
    %95 = arith.addf %94, %93 : vector<8x128xf32>
    %96 = arith.divf %94, %95 : vector<8x128xf32>
    %97 = vector.extract_strided_slice %79 {offsets = [0, 256], sizes = [8, 128], strides = [1, 1]} : vector<8x384xf32> to vector<8x128xf32>
    %98 = vector.extract_strided_slice %80 {offsets = [0, 256], sizes = [8, 128], strides = [1, 1]} : vector<8x384xf32> to vector<8x128xf32>
    %99 = arith.addf %98, %10 : vector<8x128xf32>
    %100 = arith.mulf %88, %99 : vector<8x128xf32>
    %101 = arith.addf %97, %100 : vector<8x128xf32>
    %102 = math.tanh %101 : vector<8x128xf32>
    %cst_28 = arith.constant 1.000000e+00 : f32
    %103 = vector.broadcast %cst_28 : f32 to vector<8x128xf32>
    %104 = arith.subf %103, %96 : vector<8x128xf32>
    %105 = arith.mulf %104, %102 : vector<8x128xf32>
    %106 = arith.mulf %96, %75 : vector<8x128xf32>
    %107 = arith.addf %105, %106 : vector<8x128xf32>
    %c3_i32 = arith.constant 3 : i32
    %c8_i32_29 = arith.constant 8 : i32
    %108 = arith.muli %c3_i32, %c8_i32_29 : i32
    %109 = tpu.assume_multiple %108, 8 : i32
    %110 = arith.index_cast %109 : i32 to index
    %c0_30 = arith.constant 0 : index
    %111 = vector.load %arg17[%110, %c0_30] : memref<64x384xf32, #tpu.memory_space<vmem>>, vector<8x384xf32>
    %cst_31 = arith.constant dense<0.000000e+00> : vector<8x384xf32>
    %112 = tpu.matmul %107, %7, %cst_31 {dimension_numbers = #tpu.dot_dimension_numbers<[1], [0], [0], [1], [0, 0, 1, 1], [], []>} : vector<8x128xf32>, vector<128x384xf32>, vector<8x384xf32> -> vector<8x384xf32>
    %113 = vector.extract_strided_slice %111 {offsets = [0, 0], sizes = [8, 128], strides = [1, 1]} : vector<8x384xf32> to vector<8x128xf32>
    %114 = vector.extract_strided_slice %112 {offsets = [0, 0], sizes = [8, 128], strides = [1, 1]} : vector<8x384xf32> to vector<8x128xf32>
    %115 = arith.addf %113, %114 : vector<8x128xf32>
    %116 = arith.negf %115 : vector<8x128xf32>
    %117 = math.exp %116 : vector<8x128xf32>
    %cst_32 = arith.constant 1.000000e+00 : f32
    %118 = vector.broadcast %cst_32 : f32 to vector<8x128xf32>
    %119 = arith.addf %118, %117 : vector<8x128xf32>
    %120 = arith.divf %118, %119 : vector<8x128xf32>
    %121 = vector.extract_strided_slice %111 {offsets = [0, 128], sizes = [8, 128], strides = [1, 1]} : vector<8x384xf32> to vector<8x128xf32>
    %122 = vector.extract_strided_slice %112 {offsets = [0, 128], sizes = [8, 128], strides = [1, 1]} : vector<8x384xf32> to vector<8x128xf32>
    %123 = arith.addf %121, %122 : vector<8x128xf32>
    %124 = arith.negf %123 : vector<8x128xf32>
    %125 = math.exp %124 : vector<8x128xf32>
    %cst_33 = arith.constant 1.000000e+00 : f32
    %126 = vector.broadcast %cst_33 : f32 to vector<8x128xf32>
    %127 = arith.addf %126, %125 : vector<8x128xf32>
    %128 = arith.divf %126, %127 : vector<8x128xf32>
    %129 = vector.extract_strided_slice %111 {offsets = [0, 256], sizes = [8, 128], strides = [1, 1]} : vector<8x384xf32> to vector<8x128xf32>
    %130 = vector.extract_strided_slice %112 {offsets = [0, 256], sizes = [8, 128], strides = [1, 1]} : vector<8x384xf32> to vector<8x128xf32>
    %131 = arith.addf %130, %10 : vector<8x128xf32>
    %132 = arith.mulf %120, %131 : vector<8x128xf32>
    %133 = arith.addf %129, %132 : vector<8x128xf32>
    %134 = math.tanh %133 : vector<8x128xf32>
    %cst_34 = arith.constant 1.000000e+00 : f32
    %135 = vector.broadcast %cst_34 : f32 to vector<8x128xf32>
    %136 = arith.subf %135, %128 : vector<8x128xf32>
    %137 = arith.mulf %136, %134 : vector<8x128xf32>
    %138 = arith.mulf %128, %107 : vector<8x128xf32>
    %139 = arith.addf %137, %138 : vector<8x128xf32>
    %c4_i32 = arith.constant 4 : i32
    %c8_i32_35 = arith.constant 8 : i32
    %140 = arith.muli %c4_i32, %c8_i32_35 : i32
    %141 = tpu.assume_multiple %140, 8 : i32
    %142 = arith.index_cast %141 : i32 to index
    %c0_36 = arith.constant 0 : index
    %143 = vector.load %arg17[%142, %c0_36] : memref<64x384xf32, #tpu.memory_space<vmem>>, vector<8x384xf32>
    %cst_37 = arith.constant dense<0.000000e+00> : vector<8x384xf32>
    %144 = tpu.matmul %139, %7, %cst_37 {dimension_numbers = #tpu.dot_dimension_numbers<[1], [0], [0], [1], [0, 0, 1, 1], [], []>} : vector<8x128xf32>, vector<128x384xf32>, vector<8x384xf32> -> vector<8x384xf32>
    %145 = vector.extract_strided_slice %143 {offsets = [0, 0], sizes = [8, 128], strides = [1, 1]} : vector<8x384xf32> to vector<8x128xf32>
    %146 = vector.extract_strided_slice %144 {offsets = [0, 0], sizes = [8, 128], strides = [1, 1]} : vector<8x384xf32> to vector<8x128xf32>
    %147 = arith.addf %145, %146 : vector<8x128xf32>
    %148 = arith.negf %147 : vector<8x128xf32>
    %149 = math.exp %148 : vector<8x128xf32>
    %cst_38 = arith.constant 1.000000e+00 : f32
    %150 = vector.broadcast %cst_38 : f32 to vector<8x128xf32>
    %151 = arith.addf %150, %149 : vector<8x128xf32>
    %152 = arith.divf %150, %151 : vector<8x128xf32>
    %153 = vector.extract_strided_slice %143 {offsets = [0, 128], sizes = [8, 128], strides = [1, 1]} : vector<8x384xf32> to vector<8x128xf32>
    %154 = vector.extract_strided_slice %144 {offsets = [0, 128], sizes = [8, 128], strides = [1, 1]} : vector<8x384xf32> to vector<8x128xf32>
    %155 = arith.addf %153, %154 : vector<8x128xf32>
    %156 = arith.negf %155 : vector<8x128xf32>
    %157 = math.exp %156 : vector<8x128xf32>
    %cst_39 = arith.constant 1.000000e+00 : f32
    %158 = vector.broadcast %cst_39 : f32 to vector<8x128xf32>
    %159 = arith.addf %158, %157 : vector<8x128xf32>
    %160 = arith.divf %158, %159 : vector<8x128xf32>
    %161 = vector.extract_strided_slice %143 {offsets = [0, 256], sizes = [8, 128], strides = [1, 1]} : vector<8x384xf32> to vector<8x128xf32>
    %162 = vector.extract_strided_slice %144 {offsets = [0, 256], sizes = [8, 128], strides = [1, 1]} : vector<8x384xf32> to vector<8x128xf32>
    %163 = arith.addf %162, %10 : vector<8x128xf32>
    %164 = arith.mulf %152, %163 : vector<8x128xf32>
    %165 = arith.addf %161, %164 : vector<8x128xf32>
    %166 = math.tanh %165 : vector<8x128xf32>
    %cst_40 = arith.constant 1.000000e+00 : f32
    %167 = vector.broadcast %cst_40 : f32 to vector<8x128xf32>
    %168 = arith.subf %167, %160 : vector<8x128xf32>
    %169 = arith.mulf %168, %166 : vector<8x128xf32>
    %170 = arith.mulf %160, %139 : vector<8x128xf32>
    %171 = arith.addf %169, %170 : vector<8x128xf32>
    %c5_i32 = arith.constant 5 : i32
    %c8_i32_41 = arith.constant 8 : i32
    %172 = arith.muli %c5_i32, %c8_i32_41 : i32
    %173 = tpu.assume_multiple %172, 8 : i32
    %174 = arith.index_cast %173 : i32 to index
    %c0_42 = arith.constant 0 : index
    %175 = vector.load %arg17[%174, %c0_42] : memref<64x384xf32, #tpu.memory_space<vmem>>, vector<8x384xf32>
    %cst_43 = arith.constant dense<0.000000e+00> : vector<8x384xf32>
    %176 = tpu.matmul %171, %7, %cst_43 {dimension_numbers = #tpu.dot_dimension_numbers<[1], [0], [0], [1], [0, 0, 1, 1], [], []>} : vector<8x128xf32>, vector<128x384xf32>, vector<8x384xf32> -> vector<8x384xf32>
    %177 = vector.extract_strided_slice %175 {offsets = [0, 0], sizes = [8, 128], strides = [1, 1]} : vector<8x384xf32> to vector<8x128xf32>
    %178 = vector.extract_strided_slice %176 {offsets = [0, 0], sizes = [8, 128], strides = [1, 1]} : vector<8x384xf32> to vector<8x128xf32>
    %179 = arith.addf %177, %178 : vector<8x128xf32>
    %180 = arith.negf %179 : vector<8x128xf32>
    %181 = math.exp %180 : vector<8x128xf32>
    %cst_44 = arith.constant 1.000000e+00 : f32
    %182 = vector.broadcast %cst_44 : f32 to vector<8x128xf32>
    %183 = arith.addf %182, %181 : vector<8x128xf32>
    %184 = arith.divf %182, %183 : vector<8x128xf32>
    %185 = vector.extract_strided_slice %175 {offsets = [0, 128], sizes = [8, 128], strides = [1, 1]} : vector<8x384xf32> to vector<8x128xf32>
    %186 = vector.extract_strided_slice %176 {offsets = [0, 128], sizes = [8, 128], strides = [1, 1]} : vector<8x384xf32> to vector<8x128xf32>
    %187 = arith.addf %185, %186 : vector<8x128xf32>
    %188 = arith.negf %187 : vector<8x128xf32>
    %189 = math.exp %188 : vector<8x128xf32>
    %cst_45 = arith.constant 1.000000e+00 : f32
    %190 = vector.broadcast %cst_45 : f32 to vector<8x128xf32>
    %191 = arith.addf %190, %189 : vector<8x128xf32>
    %192 = arith.divf %190, %191 : vector<8x128xf32>
    %193 = vector.extract_strided_slice %175 {offsets = [0, 256], sizes = [8, 128], strides = [1, 1]} : vector<8x384xf32> to vector<8x128xf32>
    %194 = vector.extract_strided_slice %176 {offsets = [0, 256], sizes = [8, 128], strides = [1, 1]} : vector<8x384xf32> to vector<8x128xf32>
    %195 = arith.addf %194, %10 : vector<8x128xf32>
    %196 = arith.mulf %184, %195 : vector<8x128xf32>
    %197 = arith.addf %193, %196 : vector<8x128xf32>
    %198 = math.tanh %197 : vector<8x128xf32>
    %cst_46 = arith.constant 1.000000e+00 : f32
    %199 = vector.broadcast %cst_46 : f32 to vector<8x128xf32>
    %200 = arith.subf %199, %192 : vector<8x128xf32>
    %201 = arith.mulf %200, %198 : vector<8x128xf32>
    %202 = arith.mulf %192, %171 : vector<8x128xf32>
    %203 = arith.addf %201, %202 : vector<8x128xf32>
    %c6_i32 = arith.constant 6 : i32
    %c8_i32_47 = arith.constant 8 : i32
    %204 = arith.muli %c6_i32, %c8_i32_47 : i32
    %205 = tpu.assume_multiple %204, 8 : i32
    %206 = arith.index_cast %205 : i32 to index
    %c0_48 = arith.constant 0 : index
    %207 = vector.load %arg17[%206, %c0_48] : memref<64x384xf32, #tpu.memory_space<vmem>>, vector<8x384xf32>
    %cst_49 = arith.constant dense<0.000000e+00> : vector<8x384xf32>
    %208 = tpu.matmul %203, %7, %cst_49 {dimension_numbers = #tpu.dot_dimension_numbers<[1], [0], [0], [1], [0, 0, 1, 1], [], []>} : vector<8x128xf32>, vector<128x384xf32>, vector<8x384xf32> -> vector<8x384xf32>
    %209 = vector.extract_strided_slice %207 {offsets = [0, 0], sizes = [8, 128], strides = [1, 1]} : vector<8x384xf32> to vector<8x128xf32>
    %210 = vector.extract_strided_slice %208 {offsets = [0, 0], sizes = [8, 128], strides = [1, 1]} : vector<8x384xf32> to vector<8x128xf32>
    %211 = arith.addf %209, %210 : vector<8x128xf32>
    %212 = arith.negf %211 : vector<8x128xf32>
    %213 = math.exp %212 : vector<8x128xf32>
    %cst_50 = arith.constant 1.000000e+00 : f32
    %214 = vector.broadcast %cst_50 : f32 to vector<8x128xf32>
    %215 = arith.addf %214, %213 : vector<8x128xf32>
    %216 = arith.divf %214, %215 : vector<8x128xf32>
    %217 = vector.extract_strided_slice %207 {offsets = [0, 128], sizes = [8, 128], strides = [1, 1]} : vector<8x384xf32> to vector<8x128xf32>
    %218 = vector.extract_strided_slice %208 {offsets = [0, 128], sizes = [8, 128], strides = [1, 1]} : vector<8x384xf32> to vector<8x128xf32>
    %219 = arith.addf %217, %218 : vector<8x128xf32>
    %220 = arith.negf %219 : vector<8x128xf32>
    %221 = math.exp %220 : vector<8x128xf32>
    %cst_51 = arith.constant 1.000000e+00 : f32
    %222 = vector.broadcast %cst_51 : f32 to vector<8x128xf32>
    %223 = arith.addf %222, %221 : vector<8x128xf32>
    %224 = arith.divf %222, %223 : vector<8x128xf32>
    %225 = vector.extract_strided_slice %207 {offsets = [0, 256], sizes = [8, 128], strides = [1, 1]} : vector<8x384xf32> to vector<8x128xf32>
    %226 = vector.extract_strided_slice %208 {offsets = [0, 256], sizes = [8, 128], strides = [1, 1]} : vector<8x384xf32> to vector<8x128xf32>
    %227 = arith.addf %226, %10 : vector<8x128xf32>
    %228 = arith.mulf %216, %227 : vector<8x128xf32>
    %229 = arith.addf %225, %228 : vector<8x128xf32>
    %230 = math.tanh %229 : vector<8x128xf32>
    %cst_52 = arith.constant 1.000000e+00 : f32
    %231 = vector.broadcast %cst_52 : f32 to vector<8x128xf32>
    %232 = arith.subf %231, %224 : vector<8x128xf32>
    %233 = arith.mulf %232, %230 : vector<8x128xf32>
    %234 = arith.mulf %224, %203 : vector<8x128xf32>
    %235 = arith.addf %233, %234 : vector<8x128xf32>
    %c7_i32 = arith.constant 7 : i32
    %c8_i32_53 = arith.constant 8 : i32
    %236 = arith.muli %c7_i32, %c8_i32_53 : i32
    %237 = tpu.assume_multiple %236, 8 : i32
    %238 = arith.index_cast %237 : i32 to index
    %c0_54 = arith.constant 0 : index
    %239 = vector.load %arg17[%238, %c0_54] : memref<64x384xf32, #tpu.memory_space<vmem>>, vector<8x384xf32>
    %cst_55 = arith.constant dense<0.000000e+00> : vector<8x384xf32>
    %240 = tpu.matmul %235, %7, %cst_55 {dimension_numbers = #tpu.dot_dimension_numbers<[1], [0], [0], [1], [0, 0, 1, 1], [], []>} : vector<8x128xf32>, vector<128x384xf32>, vector<8x384xf32> -> vector<8x384xf32>
    %241 = vector.extract_strided_slice %239 {offsets = [0, 0], sizes = [8, 128], strides = [1, 1]} : vector<8x384xf32> to vector<8x128xf32>
    %242 = vector.extract_strided_slice %240 {offsets = [0, 0], sizes = [8, 128], strides = [1, 1]} : vector<8x384xf32> to vector<8x128xf32>
    %243 = arith.addf %241, %242 : vector<8x128xf32>
    %244 = arith.negf %243 : vector<8x128xf32>
    %245 = math.exp %244 : vector<8x128xf32>
    %cst_56 = arith.constant 1.000000e+00 : f32
    %246 = vector.broadcast %cst_56 : f32 to vector<8x128xf32>
    %247 = arith.addf %246, %245 : vector<8x128xf32>
    %248 = arith.divf %246, %247 : vector<8x128xf32>
    %249 = vector.extract_strided_slice %239 {offsets = [0, 128], sizes = [8, 128], strides = [1, 1]} : vector<8x384xf32> to vector<8x128xf32>
    %250 = vector.extract_strided_slice %240 {offsets = [0, 128], sizes = [8, 128], strides = [1, 1]} : vector<8x384xf32> to vector<8x128xf32>
    %251 = arith.addf %249, %250 : vector<8x128xf32>
    %252 = arith.negf %251 : vector<8x128xf32>
    %253 = math.exp %252 : vector<8x128xf32>
    %cst_57 = arith.constant 1.000000e+00 : f32
    %254 = vector.broadcast %cst_57 : f32 to vector<8x128xf32>
    %255 = arith.addf %254, %253 : vector<8x128xf32>
    %256 = arith.divf %254, %255 : vector<8x128xf32>
    %257 = vector.extract_strided_slice %239 {offsets = [0, 256], sizes = [8, 128], strides = [1, 1]} : vector<8x384xf32> to vector<8x128xf32>
    %258 = vector.extract_strided_slice %240 {offsets = [0, 256], sizes = [8, 128], strides = [1, 1]} : vector<8x384xf32> to vector<8x128xf32>
    %259 = arith.addf %258, %10 : vector<8x128xf32>
    %260 = arith.mulf %248, %259 : vector<8x128xf32>
    %261 = arith.addf %257, %260 : vector<8x128xf32>
    %262 = math.tanh %261 : vector<8x128xf32>
    %cst_58 = arith.constant 1.000000e+00 : f32
    %263 = vector.broadcast %cst_58 : f32 to vector<8x128xf32>
    %264 = arith.subf %263, %256 : vector<8x128xf32>
    %265 = arith.mulf %264, %262 : vector<8x128xf32>
    %266 = arith.mulf %256, %235 : vector<8x128xf32>
    %267 = arith.addf %265, %266 : vector<8x128xf32>
    %c8_i32_59 = arith.constant 8 : i32
    %c0_60 = arith.constant 0 : index
    %c0_61 = arith.constant 0 : index
    %268 = vector.load %arg6[%c0_60, %c0_61] : memref<128x128xf32, #tpu.memory_space<vmem>>, vector<128x128xf32>
    %cst_62 = arith.constant dense<0.000000e+00> : vector<8x128xf32>
    %269 = tpu.matmul %267, %268, %cst_62 {dimension_numbers = #tpu.dot_dimension_numbers<[1], [0], [0], [1], [0, 0, 1, 1], [], []>} : vector<8x128xf32>, vector<128x128xf32>, vector<8x128xf32> -> vector<8x128xf32>
    %c0_63 = arith.constant 0 : index
    %c0_64 = arith.constant 0 : index
    %270 = vector.load %arg7[%c0_63, %c0_64] : memref<1x128xf32, #tpu.memory_space<vmem>>, vector<1x128xf32>
    %271 = vector.broadcast %270 : vector<1x128xf32> to vector<8x128xf32>
    %272 = arith.addf %269, %271 : vector<8x128xf32>
    %c0_65 = arith.constant 0 : index
    %c0_66 = arith.constant 0 : index
    %273 = vector.load %arg16[%c0_65, %c0_66] : memref<8x128xf32, #tpu.memory_space<vmem>>, vector<8x128xf32>
    tpu.vector_store %arg16[%c0_65, %c0_66], %272 {strides = array<i32>} : memref<8x128xf32, #tpu.memory_space<vmem>>, vector<8x128xf32>,
    %274 = vector.extract_strided_slice %272 {offsets = [0, 0], sizes = [8, 64], strides = [1, 1]} : vector<8x128xf32> to vector<8x64xf32>
    %275 = vector.extract_strided_slice %272 {offsets = [0, 64], sizes = [8, 64], strides = [1, 1]} : vector<8x128xf32> to vector<8x64xf32>
    %cst_67 = arith.constant 5.000000e-01 : f32
    %276 = vector.broadcast %cst_67 : f32 to vector<8x64xf32>
    %277 = arith.mulf %276, %275 : vector<8x64xf32>
    %278 = math.exp %277 : vector<8x64xf32>
    %c0_68 = arith.constant 0 : index
    %c0_69 = arith.constant 0 : index
    %279 = vector.load %arg1[%c0_68, %c0_69] : memref<8x64xf32, #tpu.memory_space<vmem>>, vector<8x64xf32>
    %280 = arith.mulf %278, %279 : vector<8x64xf32>
    %281 = arith.addf %274, %280 : vector<8x64xf32>
    %c0_70 = arith.constant 0 : index
    %c0_71 = arith.constant 0 : index
    %282 = vector.load %arg9[%c0_70, %c0_71] : memref<64x384xf32, #tpu.memory_space<vmem>>, vector<64x384xf32>
    %cst_72 = arith.constant dense<0.000000e+00> : vector<8x384xf32>
    %283 = tpu.matmul %281, %282, %cst_72 {dimension_numbers = #tpu.dot_dimension_numbers<[1], [0], [0], [1], [0, 0, 1, 1], [], []>} : vector<8x64xf32>, vector<64x384xf32>, vector<8x384xf32> -> vector<8x384xf32>
    %c0_73 = arith.constant 0 : index
    %c0_74 = arith.constant 0 : index
    %284 = vector.load %arg11[%c0_73, %c0_74] : memref<1x384xf32, #tpu.memory_space<vmem>>, vector<1x384xf32>
    %285 = vector.broadcast %284 : vector<1x384xf32> to vector<8x384xf32>
    %286 = arith.addf %283, %285 : vector<8x384xf32>
    %c0_75 = arith.constant 0 : index
    %c0_76 = arith.constant 0 : index
    %287 = vector.load %arg0[%c0_75, %c0_76] : memref<64x64xf32, #tpu.memory_space<vmem>>, vector<64x64xf32>
    %c0_77 = arith.constant 0 : index
    %c0_78 = arith.constant 0 : index
    %288 = vector.load %arg8[%c0_77, %c0_78] : memref<64x384xf32, #tpu.memory_space<vmem>>, vector<64x384xf32>
    %cst_79 = arith.constant dense<0.000000e+00> : vector<64x384xf32>
    %289 = tpu.matmul %287, %288, %cst_79 {dimension_numbers = #tpu.dot_dimension_numbers<[1], [0], [0], [1], [0, 0, 1, 1], [], []>} : vector<64x64xf32>, vector<64x384xf32>, vector<64x384xf32> -> vector<64x384xf32>
    %c0_80 = arith.constant 0 : index
    %c0_81 = arith.constant 0 : index
    %290 = vector.load %arg18[%c0_80, %c0_81] : memref<64x384xf32, #tpu.memory_space<vmem>>, vector<64x384xf32>
    tpu.vector_store %arg18[%c0_80, %c0_81], %289 {strides = array<i32>} : memref<64x384xf32, #tpu.memory_space<vmem>>, vector<64x384xf32>,
    %c0_82 = arith.constant 0 : index
    %c0_83 = arith.constant 0 : index
    %291 = vector.load %arg10[%c0_82, %c0_83] : memref<128x384xf32, #tpu.memory_space<vmem>>, vector<128x384xf32>
    %c0_84 = arith.constant 0 : index
    %c0_85 = arith.constant 0 : index
    %292 = vector.load %arg12[%c0_84, %c0_85] : memref<1x128xf32, #tpu.memory_space<vmem>>, vector<1x128xf32>
    %293 = vector.shape_cast %292 : vector<1x128xf32> to vector<1x128xf32>
    %294 = vector.broadcast %293 : vector<1x128xf32> to vector<8x128xf32>
    %cst_86 = arith.constant 0.000000e+00 : f32
    %295 = vector.broadcast %cst_86 : f32 to vector<8x128xf32>
    %c0_i32_87 = arith.constant 0 : i32
    %c8_i32_88 = arith.constant 8 : i32
    %296 = arith.muli %c0_i32_87, %c8_i32_88 : i32
    %297 = tpu.assume_multiple %296, 8 : i32
    %298 = arith.index_cast %297 : i32 to index
    %c0_89 = arith.constant 0 : index
    %299 = vector.load %arg18[%298, %c0_89] : memref<64x384xf32, #tpu.memory_space<vmem>>, vector<8x384xf32>
    %300 = arith.addf %299, %286 : vector<8x384xf32>
    %cst_90 = arith.constant dense<0.000000e+00> : vector<8x384xf32>
    %301 = tpu.matmul %295, %291, %cst_90 {dimension_numbers = #tpu.dot_dimension_numbers<[1], [0], [0], [1], [0, 0, 1, 1], [], []>} : vector<8x128xf32>, vector<128x384xf32>, vector<8x384xf32> -> vector<8x384xf32>
    %302 = vector.extract_strided_slice %300 {offsets = [0, 0], sizes = [8, 128], strides = [1, 1]} : vector<8x384xf32> to vector<8x128xf32>
    %303 = vector.extract_strided_slice %301 {offsets = [0, 0], sizes = [8, 128], strides = [1, 1]} : vector<8x384xf32> to vector<8x128xf32>
    %304 = arith.addf %302, %303 : vector<8x128xf32>
    %305 = arith.negf %304 : vector<8x128xf32>
    %306 = math.exp %305 : vector<8x128xf32>
    %cst_91 = arith.constant 1.000000e+00 : f32
    %307 = vector.broadcast %cst_91 : f32 to vector<8x128xf32>
    %308 = arith.addf %307, %306 : vector<8x128xf32>
    %309 = arith.divf %307, %308 : vector<8x128xf32>
    %310 = vector.extract_strided_slice %300 {offsets = [0, 128], sizes = [8, 128], strides = [1, 1]} : vector<8x384xf32> to vector<8x128xf32>
    %311 = vector.extract_strided_slice %301 {offsets = [0, 128], sizes = [8, 128], strides = [1, 1]} : vector<8x384xf32> to vector<8x128xf32>
    %312 = arith.addf %310, %311 : vector<8x128xf32>
    %313 = arith.negf %312 : vector<8x128xf32>
    %314 = math.exp %313 : vector<8x128xf32>
    %cst_92 = arith.constant 1.000000e+00 : f32
    %315 = vector.broadcast %cst_92 : f32 to vector<8x128xf32>
    %316 = arith.addf %315, %314 : vector<8x128xf32>
    %317 = arith.divf %315, %316 : vector<8x128xf32>
    %318 = vector.extract_strided_slice %300 {offsets = [0, 256], sizes = [8, 128], strides = [1, 1]} : vector<8x384xf32> to vector<8x128xf32>
    %319 = vector.extract_strided_slice %301 {offsets = [0, 256], sizes = [8, 128], strides = [1, 1]} : vector<8x384xf32> to vector<8x128xf32>
    %320 = arith.addf %319, %294 : vector<8x128xf32>
    %321 = arith.mulf %309, %320 : vector<8x128xf32>
    %322 = arith.addf %318, %321 : vector<8x128xf32>
    %323 = math.tanh %322 : vector<8x128xf32>
    %cst_93 = arith.constant 1.000000e+00 : f32
    %324 = vector.broadcast %cst_93 : f32 to vector<8x128xf32>
    %325 = arith.subf %324, %317 : vector<8x128xf32>
    %326 = arith.mulf %325, %323 : vector<8x128xf32>
    %327 = arith.mulf %317, %295 : vector<8x128xf32>
    %328 = arith.addf %326, %327 : vector<8x128xf32>
    %329 = arith.index_cast %297 : i32 to index
    %c0_94 = arith.constant 0 : index
    %330 = vector.load %arg19[%329, %c0_94] : memref<64x128xf32, #tpu.memory_space<vmem>>, vector<8x128xf32>
    tpu.vector_store %arg19[%329, %c0_94], %328 {strides = array<i32>} : memref<64x128xf32, #tpu.memory_space<vmem>>, vector<8x128xf32>,
    %c1_i32_95 = arith.constant 1 : i32
    %c8_i32_96 = arith.constant 8 : i32
    %331 = arith.muli %c1_i32_95, %c8_i32_96 : i32
    %332 = tpu.assume_multiple %331, 8 : i32
    %333 = arith.index_cast %332 : i32 to index
    %c0_97 = arith.constant 0 : index
    %334 = vector.load %arg18[%333, %c0_97] : memref<64x384xf32, #tpu.memory_space<vmem>>, vector<8x384xf32>
    %335 = arith.addf %334, %286 : vector<8x384xf32>
    %cst_98 = arith.constant dense<0.000000e+00> : vector<8x384xf32>
    %336 = tpu.matmul %328, %291, %cst_98 {dimension_numbers = #tpu.dot_dimension_numbers<[1], [0], [0], [1], [0, 0, 1, 1], [], []>} : vector<8x128xf32>, vector<128x384xf32>, vector<8x384xf32> -> vector<8x384xf32>
    %337 = vector.extract_strided_slice %335 {offsets = [0, 0], sizes = [8, 128], strides = [1, 1]} : vector<8x384xf32> to vector<8x128xf32>
    %338 = vector.extract_strided_slice %336 {offsets = [0, 0], sizes = [8, 128], strides = [1, 1]} : vector<8x384xf32> to vector<8x128xf32>
    %339 = arith.addf %337, %338 : vector<8x128xf32>
    %340 = arith.negf %339 : vector<8x128xf32>
    %341 = math.exp %340 : vector<8x128xf32>
    %cst_99 = arith.constant 1.000000e+00 : f32
    %342 = vector.broadcast %cst_99 : f32 to vector<8x128xf32>
    %343 = arith.addf %342, %341 : vector<8x128xf32>
    %344 = arith.divf %342, %343 : vector<8x128xf32>
    %345 = vector.extract_strided_slice %335 {offsets = [0, 128], sizes = [8, 128], strides = [1, 1]} : vector<8x384xf32> to vector<8x128xf32>
    %346 = vector.extract_strided_slice %336 {offsets = [0, 128], sizes = [8, 128], strides = [1, 1]} : vector<8x384xf32> to vector<8x128xf32>
    %347 = arith.addf %345, %346 : vector<8x128xf32>
    %348 = arith.negf %347 : vector<8x128xf32>
    %349 = math.exp %348 : vector<8x128xf32>
    %cst_100 = arith.constant 1.000000e+00 : f32
    %350 = vector.broadcast %cst_100 : f32 to vector<8x128xf32>
    %351 = arith.addf %350, %349 : vector<8x128xf32>
    %352 = arith.divf %350, %351 : vector<8x128xf32>
    %353 = vector.extract_strided_slice %335 {offsets = [0, 256], sizes = [8, 128], strides = [1, 1]} : vector<8x384xf32> to vector<8x128xf32>
    %354 = vector.extract_strided_slice %336 {offsets = [0, 256], sizes = [8, 128], strides = [1, 1]} : vector<8x384xf32> to vector<8x128xf32>
    %355 = arith.addf %354, %294 : vector<8x128xf32>
    %356 = arith.mulf %344, %355 : vector<8x128xf32>
    %357 = arith.addf %353, %356 : vector<8x128xf32>
    %358 = math.tanh %357 : vector<8x128xf32>
    %cst_101 = arith.constant 1.000000e+00 : f32
    %359 = vector.broadcast %cst_101 : f32 to vector<8x128xf32>
    %360 = arith.subf %359, %352 : vector<8x128xf32>
    %361 = arith.mulf %360, %358 : vector<8x128xf32>
    %362 = arith.mulf %352, %328 : vector<8x128xf32>
    %363 = arith.addf %361, %362 : vector<8x128xf32>
    %364 = arith.index_cast %332 : i32 to index
    %c0_102 = arith.constant 0 : index
    %365 = vector.load %arg19[%364, %c0_102] : memref<64x128xf32, #tpu.memory_space<vmem>>, vector<8x128xf32>
    tpu.vector_store %arg19[%364, %c0_102], %363 {strides = array<i32>} : memref<64x128xf32, #tpu.memory_space<vmem>>, vector<8x128xf32>,
    %c2_i32_103 = arith.constant 2 : i32
    %c8_i32_104 = arith.constant 8 : i32
    %366 = arith.muli %c2_i32_103, %c8_i32_104 : i32
    %367 = tpu.assume_multiple %366, 8 : i32
    %368 = arith.index_cast %367 : i32 to index
    %c0_105 = arith.constant 0 : index
    %369 = vector.load %arg18[%368, %c0_105] : memref<64x384xf32, #tpu.memory_space<vmem>>, vector<8x384xf32>
    %370 = arith.addf %369, %286 : vector<8x384xf32>
    %cst_106 = arith.constant dense<0.000000e+00> : vector<8x384xf32>
    %371 = tpu.matmul %363, %291, %cst_106 {dimension_numbers = #tpu.dot_dimension_numbers<[1], [0], [0], [1], [0, 0, 1, 1], [], []>} : vector<8x128xf32>, vector<128x384xf32>, vector<8x384xf32> -> vector<8x384xf32>
    %372 = vector.extract_strided_slice %370 {offsets = [0, 0], sizes = [8, 128], strides = [1, 1]} : vector<8x384xf32> to vector<8x128xf32>
    %373 = vector.extract_strided_slice %371 {offsets = [0, 0], sizes = [8, 128], strides = [1, 1]} : vector<8x384xf32> to vector<8x128xf32>
    %374 = arith.addf %372, %373 : vector<8x128xf32>
    %375 = arith.negf %374 : vector<8x128xf32>
    %376 = math.exp %375 : vector<8x128xf32>
    %cst_107 = arith.constant 1.000000e+00 : f32
    %377 = vector.broadcast %cst_107 : f32 to vector<8x128xf32>
    %378 = arith.addf %377, %376 : vector<8x128xf32>
    %379 = arith.divf %377, %378 : vector<8x128xf32>
    %380 = vector.extract_strided_slice %370 {offsets = [0, 128], sizes = [8, 128], strides = [1, 1]} : vector<8x384xf32> to vector<8x128xf32>
    %381 = vector.extract_strided_slice %371 {offsets = [0, 128], sizes = [8, 128], strides = [1, 1]} : vector<8x384xf32> to vector<8x128xf32>
    %382 = arith.addf %380, %381 : vector<8x128xf32>
    %383 = arith.negf %382 : vector<8x128xf32>
    %384 = math.exp %383 : vector<8x128xf32>
    %cst_108 = arith.constant 1.000000e+00 : f32
    %385 = vector.broadcast %cst_108 : f32 to vector<8x128xf32>
    %386 = arith.addf %385, %384 : vector<8x128xf32>
    %387 = arith.divf %385, %386 : vector<8x128xf32>
    %388 = vector.extract_strided_slice %370 {offsets = [0, 256], sizes = [8, 128], strides = [1, 1]} : vector<8x384xf32> to vector<8x128xf32>
    %389 = vector.extract_strided_slice %371 {offsets = [0, 256], sizes = [8, 128], strides = [1, 1]} : vector<8x384xf32> to vector<8x128xf32>
    %390 = arith.addf %389, %294 : vector<8x128xf32>
    %391 = arith.mulf %379, %390 : vector<8x128xf32>
    %392 = arith.addf %388, %391 : vector<8x128xf32>
    %393 = math.tanh %392 : vector<8x128xf32>
    %cst_109 = arith.constant 1.000000e+00 : f32
    %394 = vector.broadcast %cst_109 : f32 to vector<8x128xf32>
    %395 = arith.subf %394, %387 : vector<8x128xf32>
    %396 = arith.mulf %395, %393 : vector<8x128xf32>
    %397 = arith.mulf %387, %363 : vector<8x128xf32>
    %398 = arith.addf %396, %397 : vector<8x128xf32>
    %399 = arith.index_cast %367 : i32 to index
    %c0_110 = arith.constant 0 : index
    %400 = vector.load %arg19[%399, %c0_110] : memref<64x128xf32, #tpu.memory_space<vmem>>, vector<8x128xf32>
    tpu.vector_store %arg19[%399, %c0_110], %398 {strides = array<i32>} : memref<64x128xf32, #tpu.memory_space<vmem>>, vector<8x128xf32>,
    %c3_i32_111 = arith.constant 3 : i32
    %c8_i32_112 = arith.constant 8 : i32
    %401 = arith.muli %c3_i32_111, %c8_i32_112 : i32
    %402 = tpu.assume_multiple %401, 8 : i32
    %403 = arith.index_cast %402 : i32 to index
    %c0_113 = arith.constant 0 : index
    %404 = vector.load %arg18[%403, %c0_113] : memref<64x384xf32, #tpu.memory_space<vmem>>, vector<8x384xf32>
    %405 = arith.addf %404, %286 : vector<8x384xf32>
    %cst_114 = arith.constant dense<0.000000e+00> : vector<8x384xf32>
    %406 = tpu.matmul %398, %291, %cst_114 {dimension_numbers = #tpu.dot_dimension_numbers<[1], [0], [0], [1], [0, 0, 1, 1], [], []>} : vector<8x128xf32>, vector<128x384xf32>, vector<8x384xf32> -> vector<8x384xf32>
    %407 = vector.extract_strided_slice %405 {offsets = [0, 0], sizes = [8, 128], strides = [1, 1]} : vector<8x384xf32> to vector<8x128xf32>
    %408 = vector.extract_strided_slice %406 {offsets = [0, 0], sizes = [8, 128], strides = [1, 1]} : vector<8x384xf32> to vector<8x128xf32>
    %409 = arith.addf %407, %408 : vector<8x128xf32>
    %410 = arith.negf %409 : vector<8x128xf32>
    %411 = math.exp %410 : vector<8x128xf32>
    %cst_115 = arith.constant 1.000000e+00 : f32
    %412 = vector.broadcast %cst_115 : f32 to vector<8x128xf32>
    %413 = arith.addf %412, %411 : vector<8x128xf32>
    %414 = arith.divf %412, %413 : vector<8x128xf32>
    %415 = vector.extract_strided_slice %405 {offsets = [0, 128], sizes = [8, 128], strides = [1, 1]} : vector<8x384xf32> to vector<8x128xf32>
    %416 = vector.extract_strided_slice %406 {offsets = [0, 128], sizes = [8, 128], strides = [1, 1]} : vector<8x384xf32> to vector<8x128xf32>
    %417 = arith.addf %415, %416 : vector<8x128xf32>
    %418 = arith.negf %417 : vector<8x128xf32>
    %419 = math.exp %418 : vector<8x128xf32>
    %cst_116 = arith.constant 1.000000e+00 : f32
    %420 = vector.broadcast %cst_116 : f32 to vector<8x128xf32>
    %421 = arith.addf %420, %419 : vector<8x128xf32>
    %422 = arith.divf %420, %421 : vector<8x128xf32>
    %423 = vector.extract_strided_slice %405 {offsets = [0, 256], sizes = [8, 128], strides = [1, 1]} : vector<8x384xf32> to vector<8x128xf32>
    %424 = vector.extract_strided_slice %406 {offsets = [0, 256], sizes = [8, 128], strides = [1, 1]} : vector<8x384xf32> to vector<8x128xf32>
    %425 = arith.addf %424, %294 : vector<8x128xf32>
    %426 = arith.mulf %414, %425 : vector<8x128xf32>
    %427 = arith.addf %423, %426 : vector<8x128xf32>
    %428 = math.tanh %427 : vector<8x128xf32>
    %cst_117 = arith.constant 1.000000e+00 : f32
    %429 = vector.broadcast %cst_117 : f32 to vector<8x128xf32>
    %430 = arith.subf %429, %422 : vector<8x128xf32>
    %431 = arith.mulf %430, %428 : vector<8x128xf32>
    %432 = arith.mulf %422, %398 : vector<8x128xf32>
    %433 = arith.addf %431, %432 : vector<8x128xf32>
    %434 = arith.index_cast %402 : i32 to index
    %c0_118 = arith.constant 0 : index
    %435 = vector.load %arg19[%434, %c0_118] : memref<64x128xf32, #tpu.memory_space<vmem>>, vector<8x128xf32>
    tpu.vector_store %arg19[%434, %c0_118], %433 {strides = array<i32>} : memref<64x128xf32, #tpu.memory_space<vmem>>, vector<8x128xf32>,
    %c4_i32_119 = arith.constant 4 : i32
    %c8_i32_120 = arith.constant 8 : i32
    %436 = arith.muli %c4_i32_119, %c8_i32_120 : i32
    %437 = tpu.assume_multiple %436, 8 : i32
    %438 = arith.index_cast %437 : i32 to index
    %c0_121 = arith.constant 0 : index
    %439 = vector.load %arg18[%438, %c0_121] : memref<64x384xf32, #tpu.memory_space<vmem>>, vector<8x384xf32>
    %440 = arith.addf %439, %286 : vector<8x384xf32>
    %cst_122 = arith.constant dense<0.000000e+00> : vector<8x384xf32>
    %441 = tpu.matmul %433, %291, %cst_122 {dimension_numbers = #tpu.dot_dimension_numbers<[1], [0], [0], [1], [0, 0, 1, 1], [], []>} : vector<8x128xf32>, vector<128x384xf32>, vector<8x384xf32> -> vector<8x384xf32>
    %442 = vector.extract_strided_slice %440 {offsets = [0, 0], sizes = [8, 128], strides = [1, 1]} : vector<8x384xf32> to vector<8x128xf32>
    %443 = vector.extract_strided_slice %441 {offsets = [0, 0], sizes = [8, 128], strides = [1, 1]} : vector<8x384xf32> to vector<8x128xf32>
    %444 = arith.addf %442, %443 : vector<8x128xf32>
    %445 = arith.negf %444 : vector<8x128xf32>
    %446 = math.exp %445 : vector<8x128xf32>
    %cst_123 = arith.constant 1.000000e+00 : f32
    %447 = vector.broadcast %cst_123 : f32 to vector<8x128xf32>
    %448 = arith.addf %447, %446 : vector<8x128xf32>
    %449 = arith.divf %447, %448 : vector<8x128xf32>
    %450 = vector.extract_strided_slice %440 {offsets = [0, 128], sizes = [8, 128], strides = [1, 1]} : vector<8x384xf32> to vector<8x128xf32>
    %451 = vector.extract_strided_slice %441 {offsets = [0, 128], sizes = [8, 128], strides = [1, 1]} : vector<8x384xf32> to vector<8x128xf32>
    %452 = arith.addf %450, %451 : vector<8x128xf32>
    %453 = arith.negf %452 : vector<8x128xf32>
    %454 = math.exp %453 : vector<8x128xf32>
    %cst_124 = arith.constant 1.000000e+00 : f32
    %455 = vector.broadcast %cst_124 : f32 to vector<8x128xf32>
    %456 = arith.addf %455, %454 : vector<8x128xf32>
    %457 = arith.divf %455, %456 : vector<8x128xf32>
    %458 = vector.extract_strided_slice %440 {offsets = [0, 256], sizes = [8, 128], strides = [1, 1]} : vector<8x384xf32> to vector<8x128xf32>
    %459 = vector.extract_strided_slice %441 {offsets = [0, 256], sizes = [8, 128], strides = [1, 1]} : vector<8x384xf32> to vector<8x128xf32>
    %460 = arith.addf %459, %294 : vector<8x128xf32>
    %461 = arith.mulf %449, %460 : vector<8x128xf32>
    %462 = arith.addf %458, %461 : vector<8x128xf32>
    %463 = math.tanh %462 : vector<8x128xf32>
    %cst_125 = arith.constant 1.000000e+00 : f32
    %464 = vector.broadcast %cst_125 : f32 to vector<8x128xf32>
    %465 = arith.subf %464, %457 : vector<8x128xf32>
    %466 = arith.mulf %465, %463 : vector<8x128xf32>
    %467 = arith.mulf %457, %433 : vector<8x128xf32>
    %468 = arith.addf %466, %467 : vector<8x128xf32>
    %469 = arith.index_cast %437 : i32 to index
    %c0_126 = arith.constant 0 : index
    %470 = vector.load %arg19[%469, %c0_126] : memref<64x128xf32, #tpu.memory_space<vmem>>, vector<8x128xf32>
    tpu.vector_store %arg19[%469, %c0_126], %468 {strides = array<i32>} : memref<64x128xf32, #tpu.memory_space<vmem>>, vector<8x128xf32>,
    %c5_i32_127 = arith.constant 5 : i32
    %c8_i32_128 = arith.constant 8 : i32
    %471 = arith.muli %c5_i32_127, %c8_i32_128 : i32
    %472 = tpu.assume_multiple %471, 8 : i32
    %473 = arith.index_cast %472 : i32 to index
    %c0_129 = arith.constant 0 : index
    %474 = vector.load %arg18[%473, %c0_129] : memref<64x384xf32, #tpu.memory_space<vmem>>, vector<8x384xf32>
    %475 = arith.addf %474, %286 : vector<8x384xf32>
    %cst_130 = arith.constant dense<0.000000e+00> : vector<8x384xf32>
    %476 = tpu.matmul %468, %291, %cst_130 {dimension_numbers = #tpu.dot_dimension_numbers<[1], [0], [0], [1], [0, 0, 1, 1], [], []>} : vector<8x128xf32>, vector<128x384xf32>, vector<8x384xf32> -> vector<8x384xf32>
    %477 = vector.extract_strided_slice %475 {offsets = [0, 0], sizes = [8, 128], strides = [1, 1]} : vector<8x384xf32> to vector<8x128xf32>
    %478 = vector.extract_strided_slice %476 {offsets = [0, 0], sizes = [8, 128], strides = [1, 1]} : vector<8x384xf32> to vector<8x128xf32>
    %479 = arith.addf %477, %478 : vector<8x128xf32>
    %480 = arith.negf %479 : vector<8x128xf32>
    %481 = math.exp %480 : vector<8x128xf32>
    %cst_131 = arith.constant 1.000000e+00 : f32
    %482 = vector.broadcast %cst_131 : f32 to vector<8x128xf32>
    %483 = arith.addf %482, %481 : vector<8x128xf32>
    %484 = arith.divf %482, %483 : vector<8x128xf32>
    %485 = vector.extract_strided_slice %475 {offsets = [0, 128], sizes = [8, 128], strides = [1, 1]} : vector<8x384xf32> to vector<8x128xf32>
    %486 = vector.extract_strided_slice %476 {offsets = [0, 128], sizes = [8, 128], strides = [1, 1]} : vector<8x384xf32> to vector<8x128xf32>
    %487 = arith.addf %485, %486 : vector<8x128xf32>
    %488 = arith.negf %487 : vector<8x128xf32>
    %489 = math.exp %488 : vector<8x128xf32>
    %cst_132 = arith.constant 1.000000e+00 : f32
    %490 = vector.broadcast %cst_132 : f32 to vector<8x128xf32>
    %491 = arith.addf %490, %489 : vector<8x128xf32>
    %492 = arith.divf %490, %491 : vector<8x128xf32>
    %493 = vector.extract_strided_slice %475 {offsets = [0, 256], sizes = [8, 128], strides = [1, 1]} : vector<8x384xf32> to vector<8x128xf32>
    %494 = vector.extract_strided_slice %476 {offsets = [0, 256], sizes = [8, 128], strides = [1, 1]} : vector<8x384xf32> to vector<8x128xf32>
    %495 = arith.addf %494, %294 : vector<8x128xf32>
    %496 = arith.mulf %484, %495 : vector<8x128xf32>
    %497 = arith.addf %493, %496 : vector<8x128xf32>
    %498 = math.tanh %497 : vector<8x128xf32>
    %cst_133 = arith.constant 1.000000e+00 : f32
    %499 = vector.broadcast %cst_133 : f32 to vector<8x128xf32>
    %500 = arith.subf %499, %492 : vector<8x128xf32>
    %501 = arith.mulf %500, %498 : vector<8x128xf32>
    %502 = arith.mulf %492, %468 : vector<8x128xf32>
    %503 = arith.addf %501, %502 : vector<8x128xf32>
    %504 = arith.index_cast %472 : i32 to index
    %c0_134 = arith.constant 0 : index
    %505 = vector.load %arg19[%504, %c0_134] : memref<64x128xf32, #tpu.memory_space<vmem>>, vector<8x128xf32>
    tpu.vector_store %arg19[%504, %c0_134], %503 {strides = array<i32>} : memref<64x128xf32, #tpu.memory_space<vmem>>, vector<8x128xf32>,
    %c6_i32_135 = arith.constant 6 : i32
    %c8_i32_136 = arith.constant 8 : i32
    %506 = arith.muli %c6_i32_135, %c8_i32_136 : i32
    %507 = tpu.assume_multiple %506, 8 : i32
    %508 = arith.index_cast %507 : i32 to index
    %c0_137 = arith.constant 0 : index
    %509 = vector.load %arg18[%508, %c0_137] : memref<64x384xf32, #tpu.memory_space<vmem>>, vector<8x384xf32>
    %510 = arith.addf %509, %286 : vector<8x384xf32>
    %cst_138 = arith.constant dense<0.000000e+00> : vector<8x384xf32>
    %511 = tpu.matmul %503, %291, %cst_138 {dimension_numbers = #tpu.dot_dimension_numbers<[1], [0], [0], [1], [0, 0, 1, 1], [], []>} : vector<8x128xf32>, vector<128x384xf32>, vector<8x384xf32> -> vector<8x384xf32>
    %512 = vector.extract_strided_slice %510 {offsets = [0, 0], sizes = [8, 128], strides = [1, 1]} : vector<8x384xf32> to vector<8x128xf32>
    %513 = vector.extract_strided_slice %511 {offsets = [0, 0], sizes = [8, 128], strides = [1, 1]} : vector<8x384xf32> to vector<8x128xf32>
    %514 = arith.addf %512, %513 : vector<8x128xf32>
    %515 = arith.negf %514 : vector<8x128xf32>
    %516 = math.exp %515 : vector<8x128xf32>
    %cst_139 = arith.constant 1.000000e+00 : f32
    %517 = vector.broadcast %cst_139 : f32 to vector<8x128xf32>
    %518 = arith.addf %517, %516 : vector<8x128xf32>
    %519 = arith.divf %517, %518 : vector<8x128xf32>
    %520 = vector.extract_strided_slice %510 {offsets = [0, 128], sizes = [8, 128], strides = [1, 1]} : vector<8x384xf32> to vector<8x128xf32>
    %521 = vector.extract_strided_slice %511 {offsets = [0, 128], sizes = [8, 128], strides = [1, 1]} : vector<8x384xf32> to vector<8x128xf32>
    %522 = arith.addf %520, %521 : vector<8x128xf32>
    %523 = arith.negf %522 : vector<8x128xf32>
    %524 = math.exp %523 : vector<8x128xf32>
    %cst_140 = arith.constant 1.000000e+00 : f32
    %525 = vector.broadcast %cst_140 : f32 to vector<8x128xf32>
    %526 = arith.addf %525, %524 : vector<8x128xf32>
    %527 = arith.divf %525, %526 : vector<8x128xf32>
    %528 = vector.extract_strided_slice %510 {offsets = [0, 256], sizes = [8, 128], strides = [1, 1]} : vector<8x384xf32> to vector<8x128xf32>
    %529 = vector.extract_strided_slice %511 {offsets = [0, 256], sizes = [8, 128], strides = [1, 1]} : vector<8x384xf32> to vector<8x128xf32>
    %530 = arith.addf %529, %294 : vector<8x128xf32>
    %531 = arith.mulf %519, %530 : vector<8x128xf32>
    %532 = arith.addf %528, %531 : vector<8x128xf32>
    %533 = math.tanh %532 : vector<8x128xf32>
    %cst_141 = arith.constant 1.000000e+00 : f32
    %534 = vector.broadcast %cst_141 : f32 to vector<8x128xf32>
    %535 = arith.subf %534, %527 : vector<8x128xf32>
    %536 = arith.mulf %535, %533 : vector<8x128xf32>
    %537 = arith.mulf %527, %503 : vector<8x128xf32>
    %538 = arith.addf %536, %537 : vector<8x128xf32>
    %539 = arith.index_cast %507 : i32 to index
    %c0_142 = arith.constant 0 : index
    %540 = vector.load %arg19[%539, %c0_142] : memref<64x128xf32, #tpu.memory_space<vmem>>, vector<8x128xf32>
    tpu.vector_store %arg19[%539, %c0_142], %538 {strides = array<i32>} : memref<64x128xf32, #tpu.memory_space<vmem>>, vector<8x128xf32>,
    %c7_i32_143 = arith.constant 7 : i32
    %c8_i32_144 = arith.constant 8 : i32
    %541 = arith.muli %c7_i32_143, %c8_i32_144 : i32
    %542 = tpu.assume_multiple %541, 8 : i32
    %543 = arith.index_cast %542 : i32 to index
    %c0_145 = arith.constant 0 : index
    %544 = vector.load %arg18[%543, %c0_145] : memref<64x384xf32, #tpu.memory_space<vmem>>, vector<8x384xf32>
    %545 = arith.addf %544, %286 : vector<8x384xf32>
    %cst_146 = arith.constant dense<0.000000e+00> : vector<8x384xf32>
    %546 = tpu.matmul %538, %291, %cst_146 {dimension_numbers = #tpu.dot_dimension_numbers<[1], [0], [0], [1], [0, 0, 1, 1], [], []>} : vector<8x128xf32>, vector<128x384xf32>, vector<8x384xf32> -> vector<8x384xf32>
    %547 = vector.extract_strided_slice %545 {offsets = [0, 0], sizes = [8, 128], strides = [1, 1]} : vector<8x384xf32> to vector<8x128xf32>
    %548 = vector.extract_strided_slice %546 {offsets = [0, 0], sizes = [8, 128], strides = [1, 1]} : vector<8x384xf32> to vector<8x128xf32>
    %549 = arith.addf %547, %548 : vector<8x128xf32>
    %550 = arith.negf %549 : vector<8x128xf32>
    %551 = math.exp %550 : vector<8x128xf32>
    %cst_147 = arith.constant 1.000000e+00 : f32
    %552 = vector.broadcast %cst_147 : f32 to vector<8x128xf32>
    %553 = arith.addf %552, %551 : vector<8x128xf32>
    %554 = arith.divf %552, %553 : vector<8x128xf32>
    %555 = vector.extract_strided_slice %545 {offsets = [0, 128], sizes = [8, 128], strides = [1, 1]} : vector<8x384xf32> to vector<8x128xf32>
    %556 = vector.extract_strided_slice %546 {offsets = [0, 128], sizes = [8, 128], strides = [1, 1]} : vector<8x384xf32> to vector<8x128xf32>
    %557 = arith.addf %555, %556 : vector<8x128xf32>
    %558 = arith.negf %557 : vector<8x128xf32>
    %559 = math.exp %558 : vector<8x128xf32>
    %cst_148 = arith.constant 1.000000e+00 : f32
    %560 = vector.broadcast %cst_148 : f32 to vector<8x128xf32>
    %561 = arith.addf %560, %559 : vector<8x128xf32>
    %562 = arith.divf %560, %561 : vector<8x128xf32>
    %563 = vector.extract_strided_slice %545 {offsets = [0, 256], sizes = [8, 128], strides = [1, 1]} : vector<8x384xf32> to vector<8x128xf32>
    %564 = vector.extract_strided_slice %546 {offsets = [0, 256], sizes = [8, 128], strides = [1, 1]} : vector<8x384xf32> to vector<8x128xf32>
    %565 = arith.addf %564, %294 : vector<8x128xf32>
    %566 = arith.mulf %554, %565 : vector<8x128xf32>
    %567 = arith.addf %563, %566 : vector<8x128xf32>
    %568 = math.tanh %567 : vector<8x128xf32>
    %cst_149 = arith.constant 1.000000e+00 : f32
    %569 = vector.broadcast %cst_149 : f32 to vector<8x128xf32>
    %570 = arith.subf %569, %562 : vector<8x128xf32>
    %571 = arith.mulf %570, %568 : vector<8x128xf32>
    %572 = arith.mulf %562, %538 : vector<8x128xf32>
    %573 = arith.addf %571, %572 : vector<8x128xf32>
    %574 = arith.index_cast %542 : i32 to index
    %c0_150 = arith.constant 0 : index
    %575 = vector.load %arg19[%574, %c0_150] : memref<64x128xf32, #tpu.memory_space<vmem>>, vector<8x128xf32>
    tpu.vector_store %arg19[%574, %c0_150], %573 {strides = array<i32>} : memref<64x128xf32, #tpu.memory_space<vmem>>, vector<8x128xf32>,
    %c8_i32_151 = arith.constant 8 : i32
    %c0_152 = arith.constant 0 : index
    %c0_153 = arith.constant 0 : index
    %576 = vector.load %arg19[%c0_152, %c0_153] : memref<64x128xf32, #tpu.memory_space<vmem>>, vector<64x128xf32>
    %c0_154 = arith.constant 0 : index
    %c0_155 = arith.constant 0 : index
    %577 = vector.load %arg13[%c0_154, %c0_155] : memref<128x256xf32, #tpu.memory_space<vmem>>, vector<128x256xf32>
    %cst_156 = arith.constant dense<0.000000e+00> : vector<64x256xf32>
    %578 = tpu.matmul %576, %577, %cst_156 {dimension_numbers = #tpu.dot_dimension_numbers<[1], [0], [0], [1], [0, 0, 1, 1], [], []>} : vector<64x128xf32>, vector<128x256xf32>, vector<64x256xf32> -> vector<64x256xf32>
    %c0_157 = arith.constant 0 : index
    %c0_158 = arith.constant 0 : index
    %579 = vector.load %arg14[%c0_157, %c0_158] : memref<1x256xf32, #tpu.memory_space<vmem>>, vector<1x256xf32>
    %580 = vector.broadcast %579 : vector<1x256xf32> to vector<64x256xf32>
    %581 = arith.addf %578, %580 : vector<64x256xf32>
    %c0_159 = arith.constant 0 : index
    %c0_160 = arith.constant 0 : index
    %582 = vector.load %arg15[%c0_159, %c0_160] : memref<64x256xf32, #tpu.memory_space<vmem>>, vector<64x256xf32>
    tpu.vector_store %arg15[%c0_159, %c0_160], %581 {strides = array<i32>} : memref<64x256xf32, #tpu.memory_space<vmem>>, vector<64x256xf32>,
    return
  }
}

</mosaic_0001>

<bundles_post_ra>
// kernel: vae_forward.1
= control target key start
LH: loop header
LB: loop body
LE: loop exit
PB: predicated region body
PF: predicated region fallthrough
CT: control target
= control target key end

     0   :  { %vm92_vm0 = vcmask 523264   ;;  %s5826_s2 = inlined_call_operand.vmem [shape: f32[64,384], index: 2, kind: input, shape index: {}]   ;;  %s5827_s3 = inlined_call_operand.vmem [shape: f32[128,384], index: 3, kind: input, shape index: {}]   ;;  %s5828_s0 = inlined_call_operand.vmem [shape: f32[64,64], index: 0, kind: input, shape index: {}]   ;;  %s5829_s5 = inlined_call_operand.vmem [shape: f32[1,128], index: 5, kind: input, shape index: {}]   ;;  %s5830_s4 = inlined_call_operand.vmem [shape: f32[1,384], index: 4, kind: input, shape index: {}]   ;;  %s5831_s7 = inlined_call_operand.vmem [shape: f32[1,128], index: 7, kind: input, shape index: {}]   ;;  %s5832_s6 = inlined_call_operand.vmem [shape: f32[128,128], index: 6, kind: input, shape index: {}]   ;;  %s5833_s1 = inlined_call_operand.vmem [shape: f32[8,64], index: 1, kind: input, shape index: {}]   ;;  %s5834_s8 = inlined_call_operand.vmem [shape: f32[64,384], index: 8, kind: input, shape index: {}]   ;;  %s5835_s10 = inlined_call_operand.vmem [shape: f32[128,384], index: 10, kind: input, shape index: {}]   ;;  %s5836_s9 = inlined_call_operand.vmem [shape: f32[64,384], index: 9, kind: input, shape index: {}]   ;;  %s5837_s16 = inlined_call_operand.vmem [shape: f32[8,128], index: 16, kind: output, shape index: {1}]   ;;  %s5838_s12 = inlined_call_operand.vmem [shape: f32[1,128], index: 12, kind: input, shape index: {}]   ;;  %s5839_s11 = inlined_call_operand.vmem [shape: f32[1,384], index: 11, kind: input, shape index: {}]   ;;  %s5840_s13 = inlined_call_operand.vmem [shape: f32[128,256], index: 13, kind: input, shape index: {}]   ;;  %s5841_s14 = inlined_call_operand.vmem [shape: f32[1,256], index: 14, kind: input, shape index: {}]   ;;  %s5842_s15 = inlined_call_operand.vmem [shape: f32[64,256], index: 15, kind: output, shape index: {0}]  }
   0x1   :  { %5900 = sst [smem:[#allocation36_spill]] %s5826_s2  ;;  %v3232_v12 = vld [vmem:[%s5827_s3 + $0x168] sm:$0xff]  ;;  %v3240_v14 = vld [vmem:[%s5828_s0 + $0x20] sm:$0xff]  ;;  %v3245_v15 = vld [vmem:[%s5827_s3 + $0x150] sm:$0xff] }
   0x2   :  { %s5901_s23 = sld [smem:[#allocation36_spill]]  ;;  %v3254_v17 = vld [vmem:[%s5827_s3 + $0x138] sm:$0xff]  ;;  %v3265_v19 = vld [vmem:[%s5827_s3 + $0x120] sm:$0xff]  ;;  %v3274_v21 = vld [vmem:[%s5827_s3 + $0x108] sm:$0xff] }
   0x3   :  { %v3280_v22 = vld [vmem:[%s5828_s0 + $0x28] sm:$0xff]  ;;  %v3285_v23 = vld [vmem:[%s5827_s3 + $0xf0] sm:$0xff]  ;;  %v3292_v24 = vld [vmem:[%s5828_s0] sm:$0xff] }
   0x4   :  { %v3300_v25 = vld [vmem:[%s5827_s3 + $0x178] sm:$0xff]  ;;  %v3314_v27 = vld [vmem:[%s5827_s3 + $0x160] sm:$0xff]  ;;  %v3329_v29 = vld [vmem:[%s5827_s3 + $0x148] sm:$0xff] }
   0x5   :  { %v3305_v26 = vld [vmem:[%s5827_s3 + $0xd8] sm:$0xff]  ;;  %v3321_v28 = vld [vmem:[%s5827_s3 + $0xc0] sm:$0xff]  ;;  %v3334_v30 = vld [vmem:[%s5827_s3 + $0xa8] sm:$0xff] }
   0x6   :  { %v3342_v31 = vld [vmem:[%s5828_s0 + $0x30] sm:$0xff]  ;;  %v3360_v34 = vld [vmem:[%s5828_s0 + $0x8] sm:$0xff]  ;;  %v3368_v35 = vld [vmem:[%s5827_s3 + $0x118] sm:$0xff] }
   0x7   :  { %v3347_v32 = vld [vmem:[%s5827_s3 + $0x130] sm:$0xff]  ;;  %v3373_v36 = vld [vmem:[%s5827_s3 + $0x78] sm:$0xff]  ;;  %v3385_v38 = vld [vmem:[%s5827_s3 + $0x100] sm:$0xff] }
   0x8   :  { %v81_v0 = vld [vmem:[%s5901_s23 + $0xa8] sm:$0xff]  ;;  %v78_v1 = vld [vmem:[%s5901_s23 + $0x90] sm:$0xff]  ;;  %v75_v2 = vld [vmem:[%s5901_s23 + $0x78] sm:$0xff] }
   0x9   :  { %2825 = vmatpush.msra.mxu3 %v81_v0  ;;  %125 = vmatpush.msra.mxu0 %v81_v0  ;;  %v72_v3 = vld [vmem:[%s5901_s23 + $0x60] sm:$0xff]  ;;  %v69_v4 = vld [vmem:[%s5901_s23 + $0x48] sm:$0xff]  ;;  %v82_v5 = vld [vmem:[%s5901_s23 + $0xb0] sm:$0xff] }
   0xa   :  { %v66_v6 = vld [vmem:[%s5901_s23 + $0x30] sm:$0xff]  ;;  %2833 = vmatpush.msra.mxu2 %v82_v5  ;;  %v79_v7 = vld [vmem:[%s5901_s23 + $0x98] sm:$0xff]  ;;  %166 = vmatpush.msra.mxu1 %v82_v5  ;;  %v76_v8 = vld [vmem:[%s5901_s23 + $0x80] sm:$0xff] }
   0xb   :  { %2826 = vmatpush.msra.mxu3 %v78_v1  ;;  %126 = vmatpush.msra.mxu0 %v78_v1  ;;  %v63_v9 = vld [vmem:[%s5901_s23 + $0x18] sm:$0xff]  ;;  %v73_v10 = vld [vmem:[%s5901_s23 + $0x68] sm:$0xff]  ;;  %v60_v11 = vld [vmem:[%s5901_s23] sm:$0xff]  ;;  %v5844_v1 = vmov 0.0  }
   0xc   :  { %2834 = vmatpush.msra.mxu2 %v79_v7  ;;  %167 = vmatpush.msra.mxu1 %v79_v7  ;;  %v70_v13 = vld [vmem:[%s5901_s23 + $0x50] sm:$0xff]  ;;  %v67_v16 = vld [vmem:[%s5901_s23 + $0x38] sm:$0xff]  ;;  %v64_v18 = vld [vmem:[%s5901_s23 + $0x20] sm:$0xff] }
   0xd   :  { %2827 = vmatpush.msra.mxu3 %v75_v2  ;;  %127 = vmatpush.msra.mxu0 %v75_v2  ;;  %v61_v20 = vld [vmem:[%s5901_s23 + $0x8] sm:$0xff]  ;;  %v3352_v33 = vld [vmem:[%s5827_s3 + $0x90] sm:$0xff]  ;;  %v83_v37 = vld [vmem:[%s5901_s23 + $0xb8] sm:$0xff] }
   0xe   :  { %2835 = vmatpush.msra.mxu2 %v76_v8  ;;  %168 = vmatpush.msra.mxu1 %v76_v8  ;;  %v3390_v39 = vld [vmem:[%s5827_s3 + $0x60] sm:$0xff]  ;;  %v3398_v40 = vld [vmem:[%s5827_s3 + $0xe8] sm:$0xff]  ;;  %v3416_v43 = vld [vmem:[%s5828_s0 + $0x38] sm:$0xff] }
   0xf   :  { %2828 = vmatpush.msra.mxu3 %v72_v3  ;;  %128 = vmatpush.msra.mxu0 %v72_v3  ;;  %v3405_v41 = vld [vmem:[%s5827_s3 + $0x48] sm:$0xff]  ;;  %v80_v42 = vld [vmem:[%s5901_s23 + $0xa0] sm:$0xff]  ;;  %v3421_v44 = vld [vmem:[%s5827_s3 + $0xd0] sm:$0xff] }
  0x10   :  { %2836 = vmatpush.msra.mxu2 %v73_v10  ;;  %169 = vmatpush.msra.mxu1 %v73_v10  ;;  %v3426_v45 = vld [vmem:[%s5827_s3 + $0x30] sm:$0xff]  ;;  %v77_v47 = vld [vmem:[%s5901_s23 + $0x88] sm:$0xff]  ;;  %v3445_v48 = vld [vmem:[%s5827_s3 + $0xb8] sm:$0xff] }
  0x11   :  { %2829 = vmatpush.msra.mxu3 %v69_v4  ;;  %129 = vmatpush.msra.mxu0 %v69_v4  ;;  %5902 = vst [vmem:[#allocation5_spill] sm:$0xff] %v3426_v45  ;;  %v3434_v46 = vld [vmem:[%s5828_s0 + $0x10] sm:$0xff]  ;;  %v3450_v49 = vld [vmem:[%s5827_s3 + $0x18] sm:$0xff]  ;;  %v3462_v51 = vld [vmem:[%s5827_s3 + $0xa0] sm:$0xff] }
  0x12   :  { %2837 = vmatpush.msra.mxu2 %v70_v13  ;;  %170 = vmatpush.msra.mxu1 %v70_v13  ;;  %5903 = vst [vmem:[#allocation6_spill] sm:$0xff] %v3450_v49  ;;  %v74_v50 = vld [vmem:[%s5901_s23 + $0x70] sm:$0xff]  ;;  %v3467_v52 = vld [vmem:[%s5827_s3] sm:$0xff]  ;;  %v71_v53 = vld [vmem:[%s5901_s23 + $0x58] sm:$0xff] }
  0x13   :  { %2830 = vmatpush.msra.mxu3 %v66_v6  ;;  %130 = vmatpush.msra.mxu0 %v66_v6  ;;  %5904 = vst [vmem:[#allocation7_spill] sm:$0xff] %v3467_v52  ;;  %v3477_v54 = vld [vmem:[%s5827_s3 + $0x170] sm:$0xff]  ;;  %v3483_v55 = vld [vmem:[%s5827_s3 + $0x88] sm:$0xff]  ;;  %v3488_v56 = vld [vmem:[%s5827_s3 + $0x158] sm:$0xff] }
  0x14   :  { %2838 = vmatpush.msra.mxu2 %v67_v16  ;;  %171 = vmatpush.msra.mxu1 %v67_v16  ;;  %v68_v57 = vld [vmem:[%s5901_s23 + $0x40] sm:$0xff]  ;;  %v3499_v58 = vld [vmem:[%s5827_s3 + $0x70] sm:$0xff]  ;;  %v3504_v59 = vld [vmem:[%s5828_s0 + $0x18] sm:$0xff] }
  0x15   :  { %2831 = vmatpush.msra.mxu3 %v63_v9  ;;  %131 = vmatpush.msra.mxu0 %v63_v9  ;;  %v65_v60 = vld [vmem:[%s5901_s23 + $0x28] sm:$0xff]  ;;  %v3515_v61 = vld [vmem:[%s5827_s3 + $0x140] sm:$0xff]  ;;  %v3521_v62 = vld [vmem:[%s5827_s3 + $0x58] sm:$0xff] }
  0x16   :  { %2839 = vmatpush.msra.mxu2 %v64_v18  ;;  %172 = vmatpush.msra.mxu1 %v64_v18  ;;  %v62_v63 = vld [vmem:[%s5901_s23 + $0x10] sm:$0xff]  ;;  %v3532_v0 = vld [vmem:[%s5827_s3 + $0x128] sm:$0xff]  ;;  %v3538_v2 = vld [vmem:[%s5827_s3 + $0x40] sm:$0xff] }
  0x17   :  { %2832 = vmatpush.msra.mxu3 %v60_v11  ;;  %132 = vmatpush.msra.mxu0 %v60_v11  ;;  %5905 = vst [vmem:[#allocation8_spill] sm:$0xff] %v3538_v2  ;;  %v3545_v3 = vld [vmem:[%s5827_s3 + $0x110] sm:$0xff]  ;;  %v3553_v4 = vld [vmem:[%s5827_s3 + $0x28] sm:$0xff]  ;;  %v3558_v5 = vld [vmem:[%s5827_s3 + $0xf8] sm:$0xff] }
  0x18   :  { %2746 = vmatmul.msk.f32.vlgmr.msra.gmra.mxu3 %vm92_vm0, %v3240_v14  ;;  %2840 = vmatpush.msra.mxu2 %v61_v20  ;;  %5906 = vst [vmem:[#allocation9_spill] sm:$0xff] %v3553_v4  ;;  %v3568_v6 = vld [vmem:[%s5827_s3 + $0x10] sm:$0xff]  ;;  %v3573_v7 = vld [vmem:[%s5827_s3 + $0xe0] sm:$0xff]  ;;  %v3583_v8 = vld [vmem:[%s5827_s3 + $0xc8] sm:$0xff] }
  0x19   :  { %322 = vmatpush.msrb.mxu3 %v3232_v12  ;;  %2754 = vmatmul.msk.f32.vlgmr.msra.gmra.mxu2 %vm92_vm0, %v3240_v14  ;;  %5907 = vst [vmem:[#allocation10_spill] sm:$0xff] %v3568_v6  ;;  %v3592_v9 = vld [vmem:[%s5827_s3 + $0xb0] sm:$0xff]  ;;  %v3601_v10 = vld [vmem:[%s5827_s3 + $0x98] sm:$0xff]  ;;  %v3611_v11 = vld [vmem:[%s5827_s3 + $0x80] sm:$0xff] }
  0x1a   :  { %173 = vmatpush.msra.mxu1 %v61_v20  ;;  %2742 = vmatmul.msk.f32.vlgmr.msra.gmra.mxu0 %vm92_vm0, %v3292_v24  ;;  %v3621_v13 = vld [vmem:[%s5827_s3 + $0x68] sm:$0xff]  ;;  %v3630_v16 = vld [vmem:[%s5827_s3 + $0x50] sm:$0xff]  ;;  %v3639_v18 = vld [vmem:[%s5827_s3 + $0x38] sm:$0xff] }
  0x1b   :  { %323 = vmatpush.msrb.mxu3 %v3245_v15  ;;  %362 = vmatpush.msrb.mxu0 %v3300_v25  ;;  %5908 = vst [vmem:[#allocation11_spill] sm:$0xff] %v3630_v16  ;;  %v3649_v20 = vld [vmem:[%s5827_s3 + $0x20] sm:$0xff] }
  0x1c   :  { %2750 = vmatmul.msk.f32.vlgmr.msra.gmra.mxu1 %vm92_vm0, %v3292_v24  ;;  %207 = vmatpush.msrb.mxu2 %v83_v37  ;;  %5909 = vst [vmem:[#allocation12_spill] sm:$0xff] %v3639_v18 }
  0x1d   :  { %324 = vmatpush.msrb.mxu3 %v3254_v17  ;;  %363 = vmatpush.msrb.mxu0 %v3314_v27  ;;  %5910 = vst [vmem:[#allocation13_spill] sm:$0xff] %v3649_v20 }
  0x1e   :  { %436 = vmatpush.msrb.mxu1 %v3232_v12  ;;  %208 = vmatpush.msrb.mxu2 %v80_v42 }
  0x1f   :  { %325 = vmatpush.msrb.mxu3 %v3265_v19  ;;  %364 = vmatpush.msrb.mxu0 %v3329_v29 }
  0x20   :  { %2747 = vmatmul.msk.f32.gmra.mxu3 %vm92_vm0, %v3280_v22  ;;  %437 = vmatpush.msrb.mxu1 %v3245_v15 }
  0x21   :  { %326 = vmatpush.msrb.mxu3 %v3274_v21  ;;  %2755 = vmatmul.msk.f32.gmra.mxu2 %vm92_vm0, %v3280_v22 }
  0x22   :  { %365 = vmatpush.msrb.mxu0 %v3347_v32  ;;  %438 = vmatpush.msrb.mxu1 %v3254_v17 }
  0x23   :  { %327 = vmatpush.msrb.mxu3 %v3285_v23  ;;  %2743 = vmatmul.msk.f32.gmra.mxu0 %vm92_vm0, %v3360_v34 }
  0x24   :  { %366 = vmatpush.msrb.mxu0 %v3368_v35  ;;  %2751 = vmatmul.msk.f32.gmra.mxu1 %vm92_vm0, %v3360_v34 }
  0x25   :  { %328 = vmatpush.msrb.mxu3 %v3305_v26  ;;  %439 = vmatpush.msrb.mxu1 %v3265_v19 }
  0x26   :  { %367 = vmatpush.msrb.mxu0 %v3385_v38  ;;  %209 = vmatpush.msrb.mxu2 %v77_v47 }
  0x27   :  { %329 = vmatpush.msrb.mxu3 %v3321_v28  ;;  %440 = vmatpush.msrb.mxu1 %v3274_v21 }
  0x28   :  { %2748 = vmatmul.msk.f32.gmra.mxu3 %vm92_vm0, %v3342_v31  ;;  %368 = vmatpush.msrb.mxu0 %v3398_v40 }
  0x29   :  { %330 = vmatpush.msrb.mxu3 %v3334_v30  ;;  %2756 = vmatmul.msk.f32.gmra.mxu2 %vm92_vm0, %v3342_v31 }
  0x2a   :  { %369 = vmatpush.msrb.mxu0 %v3421_v44  ;;  %210 = vmatpush.msrb.mxu2 %v74_v50 }
  0x2b   :  { %331 = vmatpush.msrb.mxu3 %v3352_v33  ;;  %2744 = vmatmul.msk.f32.gmra.mxu0 %vm92_vm0, %v3434_v46 }
  0x2c   :  { %370 = vmatpush.msrb.mxu0 %v3445_v48  ;;  %211 = vmatpush.msrb.mxu2 %v71_v53 }
  0x2d   :  { %332 = vmatpush.msrb.mxu3 %v3373_v36  ;;  %441 = vmatpush.msrb.mxu1 %v3285_v23 }
  0x2e   :  { %371 = vmatpush.msrb.mxu0 %v3462_v51  ;;  %212 = vmatpush.msrb.mxu2 %v68_v57 }
  0x2f   :  { %333 = vmatpush.msrb.mxu3 %v3390_v39  ;;  %442 = vmatpush.msrb.mxu1 %v3305_v26 }
  0x30   :  { %2749 = vmatmul.msk.f32.gmra.mxu3 %vm92_vm0, %v3416_v43  ;;  %372 = vmatpush.msrb.mxu0 %v3483_v55 }
  0x31   :  { %334 = vmatpush.msrb.mxu3 %v3405_v41  ;;  %2757 = vmatmul.msk.f32.gmra.mxu2 %vm92_vm0, %v3416_v43 }
  0x32   :  { %373 = vmatpush.msrb.mxu0 %v3499_v58  ;;  %213 = vmatpush.msrb.mxu2 %v65_v60 }
  0x33   :  { %335 = vmatpush.msrb.mxu3 %v3426_v45  ;;  %2745 = vmatmul.msk.f32.gmra.mxu0 %vm92_vm0, %v3504_v59 }
  0x34   :  { %374 = vmatpush.msrb.mxu0 %v3521_v62  ;;  %214 = vmatpush.msrb.mxu2 %v62_v63 }
  0x35   :  { %336 = vmatpush.msrb.mxu3 %v3450_v49  ;;  %443 = vmatpush.msrb.mxu1 %v3321_v28 }
  0x36   :  { %375 = vmatpush.msrb.mxu0 %v3538_v2  ;;  %456 = vmatpush.msra.mxu2 %v3477_v54 }
  0x37   :  { %337 = vmatpush.msrb.mxu3 %v3467_v52  ;;  %2752 = vmatmul.msk.f32.gmra.mxu1 %vm92_vm0, %v3434_v46 }
  0x38   :  { %338 = vmatmul.f32.vlgmr.msrb.gmra.mxu3 %v5844_v1  ;;  %376 = vmatpush.msrb.mxu0 %v3553_v4 }
  0x39   :  { %342 = vmatpush.msra.mxu3 %v3477_v54  ;;  %2758 = vmatmul.msk.f32.vlgmr.msrb.gmra.mxu2 %vm92_vm0, %v3292_v24  ;;  %v3658_v24 = vld [vmem:[%s5827_s3 + $0x8] sm:$0xff] }
  0x3a   :  { %457 = vmatpush.msra.mxu2 %v3488_v56  ;;  %377 = vmatpush.msrb.mxu0 %v3568_v6  ;;  %5911 = vst [vmem:[#allocation14_spill] sm:$0xff] %v3658_v24 }
  0x3b   :  { %343 = vmatpush.msra.mxu3 %v3488_v56  ;;  %378 = vmatmul.f32.vlgmr.msrb.gmra.mxu0 %v5844_v1 }
  0x3c   :  { %458 = vmatpush.msra.mxu2 %v3515_v61  ;;  %444 = vmatpush.msrb.mxu1 %v3334_v30 }
  0x3d   :  { %344 = vmatpush.msra.mxu3 %v3515_v61  ;;  %550 = vmatpush.msra.mxu0 %v3232_v12 }
  0x3e   :  { %459 = vmatpush.msra.mxu2 %v3532_v0  ;;  %445 = vmatpush.msrb.mxu1 %v3352_v33 }
  0x3f   :  { %345 = vmatpush.msra.mxu3 %v3532_v0  ;;  %2753 = vmatmul.msk.f32.gmra.mxu1 %vm92_vm0, %v3504_v59 }
  0x40   :  { %460 = vmatpush.msra.mxu2 %v3545_v3  ;;  %446 = vmatpush.msrb.mxu1 %v3373_v36 }
  0x41   :  { %346 = vmatpush.msra.mxu3 %v3545_v3  ;;  %2759 = vmatmul.msk.f32.gmra.mxu2 %vm92_vm0, %v3360_v34  ;;  %v84_v34 = vld [vmem:[%s5830_s4] sm:$0x7] }
  0x42   :  { %461 = vmatpush.msra.mxu2 %v3558_v5  ;;  %447 = vmatpush.msrb.mxu1 %v3390_v39  ;;  %v3781_v37 = vperm.slane %v84_v34, 0 }
  0x43   :  { %347 = vmatpush.msra.mxu3 %v3558_v5  ;;  %551 = vmatpush.msra.mxu0 %v3245_v15 }
  0x44   :  { %462 = vmatpush.msra.mxu2 %v3573_v7  ;;  %448 = vmatpush.msrb.mxu1 %v3405_v41  ;;  %5915 = vst [vmem:[#allocation18_spill] sm:$0xff] %v3781_v37 }
  0x45   :  { %348 = vmatpush.msra.mxu3 %v3573_v7  ;;  %552 = vmatpush.msra.mxu0 %v3254_v17 }
  0x46   :  { %463 = vmatpush.msra.mxu2 %v3583_v8  ;;  %449 = vmatpush.msrb.mxu1 %v3426_v45 }
  0x47   :  { %349 = vmatpush.msra.mxu3 %v3583_v8  ;;  %553 = vmatpush.msra.mxu0 %v3265_v19 }
  0x48   :  { %464 = vmatpush.msra.mxu2 %v3592_v9  ;;  %450 = vmatpush.msrb.mxu1 %v3450_v49 }
  0x49   :  { %350 = vmatpush.msra.mxu3 %v3592_v9  ;;  %2760 = vmatmul.msk.f32.gmra.mxu2 %vm92_vm0, %v3434_v46 }
  0x4a   :  { %465 = vmatpush.msra.mxu2 %v3601_v10  ;;  %451 = vmatpush.msrb.mxu1 %v3467_v52 }
  0x4b   :  { %351 = vmatpush.msra.mxu3 %v3601_v10  ;;  %554 = vmatpush.msra.mxu0 %v3274_v21 }
  0x4c   :  { %466 = vmatpush.msra.mxu2 %v3611_v11  ;;  %570 = vmatpush.msra.mxu1 %v3477_v54 }
  0x4d   :  { %352 = vmatpush.msra.mxu3 %v3611_v11  ;;  %555 = vmatpush.msra.mxu0 %v3285_v23 }
  0x4e   :  { %467 = vmatpush.msra.mxu2 %v3621_v13  ;;  %571 = vmatpush.msra.mxu1 %v3488_v56 }
  0x4f   :  { %353 = vmatpush.msra.mxu3 %v3621_v13  ;;  %556 = vmatpush.msra.mxu0 %v3305_v26 }
  0x50   :  { %468 = vmatpush.msra.mxu2 %v3630_v16  ;;  %572 = vmatpush.msra.mxu1 %v3515_v61 }
  0x51   :  { %354 = vmatpush.msra.mxu3 %v3630_v16  ;;  %2761 = vmatmul.msk.f32.gmra.mxu2 %vm92_vm0, %v3504_v59 }
  0x52   :  { %469 = vmatpush.msra.mxu2 %v3639_v18  ;;  %573 = vmatpush.msra.mxu1 %v3532_v0 }
  0x53   :  { %355 = vmatpush.msra.mxu3 %v3639_v18  ;;  %557 = vmatpush.msra.mxu0 %v3321_v28 }
  0x54   :  { %470 = vmatpush.msra.mxu2 %v3649_v20  ;;  %574 = vmatpush.msra.mxu1 %v3545_v3 }
  0x55   :  { %356 = vmatpush.msra.mxu3 %v3649_v20  ;;  %558 = vmatpush.msra.mxu0 %v3334_v30 }
  0x56   :  { %471 = vmatpush.msra.mxu2 %v3658_v24  ;;  %575 = vmatpush.msra.mxu1 %v3558_v5 }
  0x57   :  { %357 = vmatpush.msra.mxu3 %v3658_v24  ;;  %559 = vmatpush.msra.mxu0 %v3352_v33 }
  0x58   :  { %358 = vmatmul.f32.vlgmr.msra.gmra.mxu3 %v5844_v1  ;;  %590 = vmatpush.msrb.mxu2 %v3300_v25 }
  0x59   :  { %476 = vmatpush.msrb.mxu3 %v3300_v25  ;;  %2762 = vmatmul.msk.f32.gmra.mxu2 %vm92_vm0, %v3240_v14 }
  0x5a   :  { %591 = vmatpush.msrb.mxu2 %v3314_v27  ;;  %576 = vmatpush.msra.mxu1 %v3573_v7 }
  0x5b   :  { %477 = vmatpush.msrb.mxu3 %v3314_v27  ;;  %560 = vmatpush.msra.mxu0 %v3373_v36 }
  0x5c   :  { %592 = vmatpush.msrb.mxu2 %v3329_v29  ;;  %577 = vmatpush.msra.mxu1 %v3583_v8 }
  0x5d   :  { %478 = vmatpush.msrb.mxu3 %v3329_v29  ;;  %561 = vmatpush.msra.mxu0 %v3390_v39 }
  0x5e   :  { %593 = vmatpush.msrb.mxu2 %v3347_v32  ;;  %578 = vmatpush.msra.mxu1 %v3592_v9 }
  0x5f   :  { %479 = vmatpush.msrb.mxu3 %v3347_v32  ;;  %562 = vmatpush.msra.mxu0 %v3405_v41 }
  0x60   :  { %594 = vmatpush.msrb.mxu2 %v3368_v35  ;;  %579 = vmatpush.msra.mxu1 %v3601_v10 }
  0x61   :  { %480 = vmatpush.msrb.mxu3 %v3368_v35  ;;  %2763 = vmatmul.msk.f32.gmra.mxu2 %vm92_vm0, %v3280_v22 }
  0x62   :  { %595 = vmatpush.msrb.mxu2 %v3385_v38  ;;  %580 = vmatpush.msra.mxu1 %v3611_v11 }
  0x63   :  { %481 = vmatpush.msrb.mxu3 %v3385_v38  ;;  %563 = vmatpush.msra.mxu0 %v3426_v45 }
  0x64   :  { %596 = vmatpush.msrb.mxu2 %v3398_v40  ;;  %581 = vmatpush.msra.mxu1 %v3621_v13 }
  0x65   :  { %482 = vmatpush.msrb.mxu3 %v3398_v40  ;;  %564 = vmatpush.msra.mxu0 %v3450_v49 }
  0x66   :  { %597 = vmatpush.msrb.mxu2 %v3421_v44  ;;  %582 = vmatpush.msra.mxu1 %v3630_v16 }
  0x67   :  { %483 = vmatpush.msrb.mxu3 %v3421_v44  ;;  %565 = vmatpush.msra.mxu0 %v3467_v52 }
  0x68   :  { %598 = vmatpush.msrb.mxu2 %v3445_v48  ;;  %583 = vmatpush.msra.mxu1 %v3639_v18 }
  0x69   :  { %484 = vmatpush.msrb.mxu3 %v3445_v48  ;;  %2764 = vmatmul.msk.f32.gmra.mxu2 %vm92_vm0, %v3342_v31 }
  0x6a   :  { %599 = vmatpush.msrb.mxu2 %v3462_v51  ;;  %584 = vmatpush.msra.mxu1 %v3649_v20 }
  0x6b   :  { %485 = vmatpush.msrb.mxu3 %v3462_v51  ;;  %684 = vmatpush.msrb.mxu0 %v3477_v54 }
  0x6c   :  { %600 = vmatpush.msrb.mxu2 %v3483_v55  ;;  %585 = vmatpush.msra.mxu1 %v3658_v24 }
  0x6d   :  { %486 = vmatpush.msrb.mxu3 %v3483_v55  ;;  %685 = vmatpush.msrb.mxu0 %v3488_v56 }
  0x6e   :  { %601 = vmatpush.msrb.mxu2 %v3499_v58 }
  0x6f   :  { %487 = vmatpush.msrb.mxu3 %v3499_v58  ;;  %686 = vmatpush.msrb.mxu0 %v3515_v61 }
  0x70   :  { %602 = vmatpush.msrb.mxu2 %v3521_v62 }
  0x71   :  { %488 = vmatpush.msrb.mxu3 %v3521_v62  ;;  %2765 = vmatmul.msk.f32.gmra.mxu2 %vm92_vm0, %v3416_v43 }
  0x72   :  { %603 = vmatpush.msrb.mxu2 %v3538_v2  ;;  %687 = vmatpush.msrb.mxu0 %v3532_v0 }
  0x73   :  { %489 = vmatpush.msrb.mxu3 %v3538_v2 }
  0x74   :  { %604 = vmatpush.msrb.mxu2 %v3553_v4  ;;  %688 = vmatpush.msrb.mxu0 %v3545_v3 }
  0x75   :  { %490 = vmatpush.msrb.mxu3 %v3553_v4 }
  0x76   :  { %605 = vmatpush.msrb.mxu2 %v3568_v6  ;;  %689 = vmatpush.msrb.mxu0 %v3558_v5 }
  0x77   :  { %491 = vmatpush.msrb.mxu3 %v3568_v6 }
  0x78   :  { %690 = vmatpush.msrb.mxu0 %v3573_v7 }
  0x79   :  { %664 = vmatpush.msra.mxu3 %v3232_v12 }
  0x7a   :  { %691 = vmatpush.msrb.mxu0 %v3583_v8 }
  0x7b   :  { %665 = vmatpush.msra.mxu3 %v3245_v15 }
  0x7c   :  { %692 = vmatpush.msrb.mxu0 %v3592_v9 }
  0x7d   :  { %666 = vmatpush.msra.mxu3 %v3254_v17 }
  0x7e   :  { %693 = vmatpush.msrb.mxu0 %v3601_v10 }
  0x7f   :  { %667 = vmatpush.msra.mxu3 %v3265_v19 }
  0x80   :  { %694 = vmatpush.msrb.mxu0 %v3611_v11 }
  0x81   :  { %668 = vmatpush.msra.mxu3 %v3274_v21 }
  0x82   :  { %695 = vmatpush.msrb.mxu0 %v3621_v13 }
  0x83   :  { %669 = vmatpush.msra.mxu3 %v3285_v23 }
  0x84   :  { %696 = vmatpush.msrb.mxu0 %v3630_v16 }
  0x85   :  { %670 = vmatpush.msra.mxu3 %v3305_v26 }
  0x86   :  { %697 = vmatpush.msrb.mxu0 %v3639_v18 }
  0x87   :  { %671 = vmatpush.msra.mxu3 %v3321_v28 }
  0x88   :  { %698 = vmatpush.msrb.mxu0 %v3649_v20 }
  0x89   :  { %672 = vmatpush.msra.mxu3 %v3334_v30 }
  0x8a   :  { %699 = vmatpush.msrb.mxu0 %v3658_v24 }
  0x8b   :  { %673 = vmatpush.msra.mxu3 %v3352_v33 }
  0x8d   :  { %674 = vmatpush.msra.mxu3 %v3373_v36 }
  0x8f   :  { %675 = vmatpush.msra.mxu3 %v3390_v39 }
  0x91   :  { %676 = vmatpush.msra.mxu3 %v3405_v41 }
  0x93   :  { %677 = vmatpush.msra.mxu3 %v3426_v45 }
  0x95   :  { %678 = vmatpush.msra.mxu3 %v3450_v49 }
  0x97   :  { %679 = vmatpush.msra.mxu3 %v3467_v52  ;;  %v134_v46 = vpop.f32.mrf.mxu0 }
  0x98   :  { %v135_v47 = vadd.f32 %v134_v46, %v3781_v37 }
  0x9b   :  { %v3772_v14 = vpop.f32.mrf.mxu3 }
  0x9c   :  { %5912 = vst [vmem:[#allocation15_spill] sm:$0xff] %v3772_v14  ;;  %v3787_v57 = vpop.f32.mrf.mxu2  ;;  %v3795_v14 = vperm.slane %v84_v34, 1 }
  0x9d   :  { %5917 = vst [vmem:[#allocation20_spill] sm:$0xff] %v3787_v57 }
  0x9e   :  { %5921 = vst [vmem:[#allocation24_spill] sm:$0xff] %v3795_v14 }
  0xa0   :  { %v3789_v60 = vpop.f32.mrf.mxu0 }
  0xa1   :  { %5918 = vst [vmem:[#allocation21_spill] sm:$0xff] %v3789_v60 }
  0xa3   :  { %v3774_v22 = vpop.f32.mrf.mxu3 }
  0xa4   :  { %5913 = vst [vmem:[#allocation16_spill] sm:$0xff] %v3774_v22 }
  0xa8   :  { %v3793_v22 = vpop.f32.mrf.mxu0 }
  0xa9   :  { %5920 = vst [vmem:[#allocation23_spill] sm:$0xff] %v3793_v22 }
  0xab   :  { %v3776_v31 = vpop.f32.mrf.mxu3 }
  0xac   :  { %5914 = vst [vmem:[#allocation17_spill] sm:$0xff] %v3776_v31  ;;  %v3791_v31 = vpop.f32.mrf.mxu2 }
  0xad   :  { %5919 = vst [vmem:[#allocation22_spill] sm:$0xff] %v3791_v31 }
  0xb0   :  { %v3800_v57 = vpop.f32.mrf.mxu0 }
  0xb1   :  { %5923 = vst [vmem:[#allocation26_spill] sm:$0xff] %v3800_v57 }
  0xb3   :  { %v155_v42 = vpop.f32.mrf.mxu3 }
  0xb4   :  { %v3784_v43 = vadd.f32 %v155_v42, %v3781_v37  ;;  %v3797_v46 = vpop.f32.mrf.mxu2 }
  0xb5   :  { %5922 = vst [vmem:[#allocation25_spill] sm:$0xff] %v3797_v46 }
  0xb6   :  { %5916 = vst [vmem:[#allocation19_spill] sm:$0xff] %v3784_v43  ;;  %v175_v43 = vpop.f32.mrf.mxu1 }
  0xb8   :  { %v379_v46 = vpop.f32.mrf.mxu0 }
  0xbb   :  { %v339_v50 = vpop.f32.mrf.mxu3 }
  0xbc   :  { %v382_v53 = vadd.f32 %v339_v50, %v135_v47  ;;  %v176_v50 = vadd.f32 %v175_v43, %v3795_v14  ;;  %v3802_v31 = vpop.f32.mrf.mxu2  ;;  %v3807_v43 = vld [vmem:[%s5829_s5] ss:$0 sm:$0xff] }
  0xbd   :  { %5924 = vst [vmem:[#allocation27_spill] sm:$0xff] %v3802_v31 }
  0xbe   :  { %v2766_v59 = vmul.f32 -1.442695, %v382_v53 }
  0xc0   :  { %2846 = vpow2.f32 %v2766_v59 }
  0xc6   :  { %v2847_v63 = vpop.eup %2846 }
  0xc7   :  { %v386_v1 = vadd.f32 1.0, %v2847_v63 }
  0xc9   :  { %2848 = vrcp.f32 %v386_v1  ;;  %vm392_vm1 = vweird.f32 %v386_v1  ;;  %v398_v22 = vand.u32 2147483648, %v386_v1  ;;  %v396_v52 = vand.u32 2147483647, %v386_v1 }
  0xcb   :  { %v399_v57 = vor.u32 1.1754944e-38, %v398_v22  ;;  %vm397_vm4 = vcmp.eq.f32.partialorder %v396_v52, 8.507059e+37 }
  0xcf   :  { %v2849_v42 = vpop.eup %2848 }
  0xd0   :  { %v388_v47 = vmul.f32 %v2849_v42, %v386_v1  ;;  %vm393_vm2 = vweird.f32 %v2849_v42 }
  0xd1   :  { %vm394_vm3 = vmor %vm392_vm1, %vm393_vm2 }
  0xd2   :  { %v389_v59 = vsub.f32 1.0, %v388_v47 }
  0xd4   :  { %v390_v37 = vmul.f32 %v2849_v42, %v389_v59  ;;  %v3810_v59 = vperm.slane %v84_v34, 2 }
  0xd6   :  { %v391_v24 = vadd.f32 %v2849_v42, %v390_v37  ;;  %v216_v37 = vpop.f32.mrf.mxu2 }
  0xd7   :  { %v217_v31 = vadd.f32 %v216_v37, %v3810_v59 }
  0xdb   :  { %v359_v53 = vpop.f32.mrf.mxu3 }
  0xdc   :  { %v402_v60 = vadd.f32 %v359_v53, %v176_v50  ;;  %v422_v53 = vadd.f32 %v3807_v43, %v379_v46 }
  0xde   :  { %v2767_v63 = vmul.f32 -1.442695, %v402_v60  ;;  %v395_v60 = vsel %vm394_vm3, %v2849_v42, %v391_v24 }
  0xe0   :  { %2850 = vpow2.f32 %v2767_v63  ;;  %v400_v63 = vsel %vm397_vm4, %v399_v57, %v395_v60 }
  0xe1   :  { %v423_v1 = vmul.f32 %v422_v53, %v400_v63 }
  0xe3   :  { %v424_v20 = vadd.f32 %v423_v1, %v217_v31  ;;  %v5931_v31 = vld [vmem:[#allocation14_spill] sm:$0xff] }
  0xe6   :  { %v2851_v47 = vpop.eup %2850 }
  0xe7   :  { %v406_v50 = vadd.f32 1.0, %v2851_v47 }
  0xe9   :  { %2852 = vrcp.f32 %v406_v50  ;;  %v418_v4 = vand.u32 2147483648, %v406_v50  ;;  %v416_v22 = vand.u32 2147483647, %v406_v50  ;;  %vm412_vm6 = vweird.f32 %v406_v50 }
  0xea   :  { %2854 = vtanh.f32 %v424_v20  ;;  %v5929_v20 = vld [vmem:[#allocation10_spill] sm:$0xff] }
  0xeb   :  { %v419_v24 = vor.u32 1.1754944e-38, %v418_v4  ;;  %vm417_vm8 = vcmp.eq.f32.partialorder %v416_v22, 8.507059e+37  ;;  %v5926_v4 = vld [vmem:[#allocation9_spill] sm:$0xff]  ;;  %v178_v22 = vpop.f32.mrf.mxu1 }
  0xef   :  { %v2853_v14 = vpop.eup %2852 }
  0xf0   :  { %v408_v6 = vmul.f32 %v2853_v14, %v406_v50  ;;  %vm413_vm5 = vweird.f32 %v2853_v14  ;;  %v2855_v46 = vpop.eup %2854  ;;  %v219_v50 = vpop.f32.mrf.mxu2 }
  0xf1   :  { %vm414_vm7 = vmor %vm412_vm6, %vm413_vm5 }
  0xf2   :  { %v409_v49 = vsub.f32 1.0, %v408_v6  ;;  %v5927_v6 = vld [vmem:[#allocation6_spill] sm:$0xff] }
  0xf4   :  { %v410_v18 = vmul.f32 %v2853_v14, %v409_v49  ;;  %v5925_v49 = vld [vmem:[#allocation12_spill] sm:$0xff] }
  0xf6   :  { %v411_v52 = vadd.f32 %v2853_v14, %v410_v18  ;;  %v5928_v18 = vld [vmem:[#allocation13_spill] sm:$0xff] }
  0xf8   :  { %v415_v34 = vsel %vm414_vm7, %v2853_v14, %v411_v52  ;;  %v5930_v14 = vld [vmem:[#allocation7_spill] sm:$0xff]  ;;  %v3866_v63 = vpop.f32.mrf.mxu2 }
  0xf9   :  { %v420_v57 = vsel %vm417_vm8, %v419_v24, %v415_v34  ;;  %5932 = vst [vmem:[#allocation28_spill] sm:$0xff] %v3866_v63  ;;  %v3874_v24 = vpop.f32.mrf.mxu1 }
  0xfa   :  { %v426_v42 = vsub.f32 1.0, %v420_v57  ;;  %v428_v60 = vmul.f32 0.0, %v420_v57  ;;  %5936 = vst [vmem:[#allocation32_spill] sm:$0xff] %v3874_v24 }
  0xfc   :  { %v427_v47 = vmul.f32 %v2855_v46, %v426_v42  ;;  %v5940_v46 = vld [vmem:[#allocation18_spill] sm:$0xff] }
  0xfe   :  { %v3813_v53 = vadd.f32 %v428_v60, %v427_v47  ;;  %v5941_v47 = vld [vmem:[#allocation21_spill] sm:$0xff] }
  0xff   :  { %v138_v60 = vadd.f32 %v5941_v47, %v5940_v46 }
 0x100   :  { %452 = vmatmul.f32.vlgmr.msrb.gmra.mxu1 %v3813_v53  ;;  %472 = vmatmul.f32.vlgmr.msra.gmra.mxu2 %v3813_v53  ;;  %v3868_v37 = vpop.f32.mrf.mxu2 }
 0x101   :  { %492 = vmatmul.f32.vlgmr.msrb.gmra.mxu3 %v3813_v53  ;;  %704 = vmatpush.msrb.mxu1 %v3300_v25  ;;  %5933 = vst [vmem:[#allocation29_spill] sm:$0xff] %v3868_v37  ;;  %v3878_v57 = vpop.f32.mrf.mxu1  ;;  %v5942_v37 = vld [vmem:[#allocation24_spill] sm:$0xff] }
 0x102   :  { %778 = vmatpush.msra.mxu2 %v3232_v12  ;;  %798 = vmatpush.msrb.mxu3 %v3477_v54  ;;  %5938 = vst [vmem:[#allocation34_spill] sm:$0xff] %v3878_v57 }
 0x103   :  { %705 = vmatpush.msrb.mxu1 %v3314_v27 }
 0x104   :  { %779 = vmatpush.msra.mxu2 %v3245_v15  ;;  %799 = vmatpush.msrb.mxu3 %v3488_v56 }
 0x105   :  { %706 = vmatpush.msrb.mxu1 %v3329_v29 }
 0x106   :  { %780 = vmatpush.msra.mxu2 %v3254_v17  ;;  %800 = vmatpush.msrb.mxu3 %v3515_v61 }
 0x107   :  { %707 = vmatpush.msrb.mxu1 %v3347_v32 }
 0x108   :  { %781 = vmatpush.msra.mxu2 %v3265_v19  ;;  %801 = vmatpush.msrb.mxu3 %v3532_v0  ;;  %v3870_v1 = vpop.f32.mrf.mxu2 }
 0x109   :  { %708 = vmatpush.msrb.mxu1 %v3368_v35  ;;  %5934 = vst [vmem:[#allocation30_spill] sm:$0xff] %v3870_v1 }
 0x10a   :  { %782 = vmatpush.msra.mxu2 %v3274_v21  ;;  %802 = vmatpush.msrb.mxu3 %v3545_v3 }
 0x10b   :  { %709 = vmatpush.msrb.mxu1 %v3385_v38 }
 0x10c   :  { %783 = vmatpush.msra.mxu2 %v3285_v23  ;;  %803 = vmatpush.msrb.mxu3 %v3558_v5 }
 0x10d   :  { %710 = vmatpush.msrb.mxu1 %v3398_v40 }
 0x10e   :  { %784 = vmatpush.msra.mxu2 %v3305_v26  ;;  %804 = vmatpush.msrb.mxu3 %v3573_v7 }
 0x10f   :  { %711 = vmatpush.msrb.mxu1 %v3421_v44 }
 0x110   :  { %785 = vmatpush.msra.mxu2 %v3321_v28  ;;  %805 = vmatpush.msrb.mxu3 %v3583_v8  ;;  %v3872_v52 = vpop.f32.mrf.mxu2 }
 0x111   :  { %712 = vmatpush.msrb.mxu1 %v3445_v48  ;;  %5935 = vst [vmem:[#allocation31_spill] sm:$0xff] %v3872_v52 }
 0x112   :  { %786 = vmatpush.msra.mxu2 %v3334_v30  ;;  %806 = vmatpush.msrb.mxu3 %v3592_v9 }
 0x113   :  { %713 = vmatpush.msrb.mxu1 %v3462_v51 }
 0x114   :  { %787 = vmatpush.msra.mxu2 %v3352_v33  ;;  %807 = vmatpush.msrb.mxu3 %v3601_v10 }
 0x115   :  { %714 = vmatpush.msrb.mxu1 %v3483_v55 }
 0x116   :  { %788 = vmatpush.msra.mxu2 %v3373_v36  ;;  %808 = vmatpush.msrb.mxu3 %v3611_v11 }
 0x117   :  { %715 = vmatpush.msrb.mxu1 %v3499_v58 }
 0x118   :  { %789 = vmatpush.msra.mxu2 %v3390_v39  ;;  %809 = vmatpush.msrb.mxu3 %v3621_v13  ;;  %v3876_v34 = vpop.f32.mrf.mxu2 }
 0x119   :  { %716 = vmatpush.msrb.mxu1 %v3521_v62  ;;  %5937 = vst [vmem:[#allocation33_spill] sm:$0xff] %v3876_v34 }
 0x11a   :  { %790 = vmatpush.msra.mxu2 %v3405_v41  ;;  %810 = vmatpush.msrb.mxu3 %v3630_v16 }
 0x11b   :  { %717 = vmatpush.msrb.mxu1 %v3538_v2 }
 0x11c   :  { %791 = vmatpush.msra.mxu2 %v3426_v45  ;;  %811 = vmatpush.msrb.mxu3 %v5925_v49 }
 0x11d   :  { %718 = vmatpush.msrb.mxu1 %v5926_v4 }
 0x11e   :  { %792 = vmatpush.msra.mxu2 %v5927_v6  ;;  %812 = vmatpush.msrb.mxu3 %v5928_v18 }
 0x11f   :  { %719 = vmatpush.msrb.mxu1 %v5929_v20  ;;  %v179_v20 = vadd.f32 %v178_v22, %v5942_v37 }
 0x120   :  { %793 = vmatpush.msra.mxu2 %v5930_v14  ;;  %813 = vmatpush.msrb.mxu3 %v5931_v31  ;;  %v3880_v42 = vpop.f32.mrf.mxu2 }
 0x121   :  { %5939 = vst [vmem:[#allocation35_spill] sm:$0xff] %v3880_v42 }
 0x17d   :  { %v453_v31 = vpop.f32.mrf.mxu1 }
 0x17e   :  { %v496_v63 = vadd.f32 %v453_v31, %v138_v60 }
 0x180   :  { %v2768_v14 = vmul.f32 -1.442695, %v496_v63 }
 0x182   :  { %2856 = vpow2.f32 %v2768_v14 }
 0x183   :  { %v473_v1 = vpop.f32.mrf.mxu2 }
 0x184   :  { %v516_v18 = vadd.f32 %v473_v1, %v179_v20  ;;  %v493_v22 = vpop.f32.mrf.mxu3 }
 0x185   :  { %v536_v1 = vadd.f32 %v3807_v43, %v493_v22 }
 0x186   :  { %v2769_v52 = vmul.f32 -1.442695, %v516_v18 }
 0x188   :  { %v2857_v6 = vpop.eup %2856  ;;  %2858 = vpow2.f32 %v2769_v52  ;;  %v220_v52 = vadd.f32 %v219_v50, %v3810_v59 }
 0x189   :  { %v500_v24 = vadd.f32 1.0, %v2857_v6 }
 0x18b   :  { %2860 = vrcp.f32 %v500_v24  ;;  %v512_v47 = vand.u32 2147483648, %v500_v24  ;;  %v510_v31 = vand.u32 2147483647, %v500_v24  ;;  %vm506_vm10 = vweird.f32 %v500_v24 }
 0x18d   :  { %v513_v18 = vor.u32 1.1754944e-38, %v512_v47  ;;  %vm511_vm12 = vcmp.eq.f32.partialorder %v510_v31, 8.507059e+37 }
 0x18e   :  { %v2859_v34 = vpop.eup %2858 }
 0x18f   :  { %v520_v57 = vadd.f32 1.0, %v2859_v34 }
 0x191   :  { %v2861_v4 = vpop.eup %2860  ;;  %2862 = vrcp.f32 %v520_v57  ;;  %v530_v45 = vand.u32 2147483647, %v520_v57  ;;  %vm526_vm14 = vweird.f32 %v520_v57 }
 0x192   :  { %v502_v42 = vmul.f32 %v2861_v4, %v500_v24  ;;  %vm507_vm9 = vweird.f32 %v2861_v4 }
 0x193   :  { %vm508_vm11 = vmor %vm506_vm10, %vm507_vm9  ;;  %vm531_vm1 = vcmp.eq.f32.partialorder %v530_v45, 8.507059e+37 }
 0x194   :  { %v503_v49 = vsub.f32 1.0, %v502_v42 }
 0x196   :  { %v504_v46 = vmul.f32 %v2861_v4, %v503_v49  ;;  %v532_v49 = vand.u32 2147483648, %v520_v57 }
 0x197   :  { %v2863_v63 = vpop.eup %2862 }
 0x198   :  { %v522_v14 = vmul.f32 %v2863_v63, %v520_v57  ;;  %v505_v60 = vadd.f32 %v2861_v4, %v504_v46  ;;  %vm527_vm13 = vweird.f32 %v2863_v63  ;;  %v533_v46 = vor.u32 1.1754944e-38, %v532_v49 }
 0x199   :  { %vm528_vm15 = vmor %vm526_vm14, %vm527_vm13 }
 0x19a   :  { %v523_v20 = vsub.f32 1.0, %v522_v14  ;;  %v509_v6 = vsel %vm508_vm11, %v2861_v4, %v505_v60 }
 0x19b   :  { %v514_v34 = vsel %vm511_vm12, %v513_v18, %v509_v6 }
 0x19c   :  { %v524_v42 = vmul.f32 %v2863_v63, %v523_v20  ;;  %v537_v37 = vmul.f32 %v536_v1, %v514_v34 }
 0x19e   :  { %v538_v2 = vadd.f32 %v537_v37, %v220_v52  ;;  %v525_v16 = vadd.f32 %v2863_v63, %v524_v42 }
 0x1a0   :  { %2864 = vtanh.f32 %v538_v2  ;;  %v529_v24 = vsel %vm528_vm15, %v2863_v63, %v525_v16 }
 0x1a1   :  { %v534_v4 = vsel %vm531_vm1, %v533_v46, %v529_v24  ;;  %v5957_v46 = vld [vmem:[#allocation28_spill] sm:$0xff] }
 0x1a2   :  { %v540_v47 = vsub.f32 1.0, %v534_v4  ;;  %v542_v50 = vmul.f32 %v534_v4, %v3813_v53  ;;  %v223_v4 = vadd.f32 %v5957_v46, %v3810_v59 }
 0x1a6   :  { %v2865_v31 = vpop.eup %2864 }
 0x1a7   :  { %v541_v22 = vmul.f32 %v2865_v31, %v540_v47 }
 0x1a9   :  { %v3888_v14 = vadd.f32 %v542_v50, %v541_v22 }
 0x1ab   :  { %566 = vmatmul.f32.vlgmr.msra.gmra.mxu0 %v3888_v14  ;;  %586 = vmatmul.f32.vlgmr.msra.gmra.mxu1 %v3888_v14 }
 0x1ac   :  { %606 = vmatmul.f32.vlgmr.msrb.gmra.mxu2 %v3888_v14  ;;  %818 = vmatpush.msra.mxu0 %v3300_v25  ;;  %v5949_v25 = vld [vmem:[#allocation13_spill] sm:$0xff] }
 0x1ad   :  { %892 = vmatpush.msra.mxu1 %v3232_v12  ;;  %912 = vmatpush.msrb.mxu2 %v3477_v54  ;;  %v5943_v12 = vld [vmem:[#allocation11_spill] sm:$0xff] }
 0x1ae   :  { %819 = vmatpush.msra.mxu0 %v3314_v27  ;;  %v5951_v27 = vld [vmem:[#allocation7_spill] sm:$0xff] }
 0x1af   :  { %893 = vmatpush.msra.mxu1 %v3245_v15  ;;  %913 = vmatpush.msrb.mxu2 %v3488_v56  ;;  %v5944_v15 = vld [vmem:[#allocation8_spill] sm:$0xff] }
 0x1b0   :  { %820 = vmatpush.msra.mxu0 %v3329_v29  ;;  %v5953_v29 = vld [vmem:[#allocation18_spill] sm:$0xff] }
 0x1b1   :  { %894 = vmatpush.msra.mxu1 %v3254_v17  ;;  %914 = vmatpush.msrb.mxu2 %v3515_v61  ;;  %v5945_v17 = vld [vmem:[#allocation5_spill] sm:$0xff] }
 0x1b2   :  { %821 = vmatpush.msra.mxu0 %v3347_v32 }
 0x1b3   :  { %895 = vmatpush.msra.mxu1 %v3265_v19  ;;  %915 = vmatpush.msrb.mxu2 %v3532_v0  ;;  %v5946_v19 = vld [vmem:[#allocation12_spill] sm:$0xff] }
 0x1b4   :  { %822 = vmatpush.msra.mxu0 %v3368_v35  ;;  %v5956_v35 = vld [vmem:[#allocation32_spill] sm:$0xff] }
 0x1b5   :  { %896 = vmatpush.msra.mxu1 %v3274_v21  ;;  %916 = vmatpush.msrb.mxu2 %v3545_v3  ;;  %v5947_v21 = vld [vmem:[#allocation9_spill] sm:$0xff] }
 0x1b6   :  { %823 = vmatpush.msra.mxu0 %v3385_v38 }
 0x1b7   :  { %897 = vmatpush.msra.mxu1 %v3285_v23  ;;  %917 = vmatpush.msrb.mxu2 %v3558_v5  ;;  %v5948_v23 = vld [vmem:[#allocation6_spill] sm:$0xff] }
 0x1b8   :  { %824 = vmatpush.msra.mxu0 %v3398_v40 }
 0x1b9   :  { %898 = vmatpush.msra.mxu1 %v3305_v26  ;;  %918 = vmatpush.msrb.mxu2 %v3573_v7  ;;  %v5950_v26 = vld [vmem:[#allocation10_spill] sm:$0xff] }
 0x1ba   :  { %825 = vmatpush.msra.mxu0 %v3421_v44 }
 0x1bb   :  { %899 = vmatpush.msra.mxu1 %v3321_v28  ;;  %919 = vmatpush.msrb.mxu2 %v3583_v8  ;;  %v5952_v28 = vld [vmem:[#allocation14_spill] sm:$0xff] }
 0x1bc   :  { %826 = vmatpush.msra.mxu0 %v3445_v48 }
 0x1bd   :  { %900 = vmatpush.msra.mxu1 %v3334_v30  ;;  %920 = vmatpush.msrb.mxu2 %v3592_v9  ;;  %v5954_v30 = vld [vmem:[#allocation23_spill] sm:$0xff] }
 0x1be   :  { %827 = vmatpush.msra.mxu0 %v3462_v51  ;;  %v141_v32 = vadd.f32 %v5954_v30, %v5953_v29 }
 0x1bf   :  { %901 = vmatpush.msra.mxu1 %v3352_v33  ;;  %921 = vmatpush.msrb.mxu2 %v3601_v10  ;;  %v5955_v33 = vld [vmem:[#allocation24_spill] sm:$0xff] }
 0x1c0   :  { %828 = vmatpush.msra.mxu0 %v3483_v55 }
 0x1c1   :  { %902 = vmatpush.msra.mxu1 %v3373_v36  ;;  %922 = vmatpush.msrb.mxu2 %v3611_v11  ;;  %v182_v36 = vadd.f32 %v5956_v35, %v5955_v33 }
 0x1c2   :  { %829 = vmatpush.msra.mxu0 %v3499_v58 }
 0x1c3   :  { %903 = vmatpush.msra.mxu1 %v3390_v39  ;;  %923 = vmatpush.msrb.mxu2 %v3621_v13 }
 0x1c4   :  { %830 = vmatpush.msra.mxu0 %v3521_v62 }
 0x1c5   :  { %904 = vmatpush.msra.mxu1 %v3405_v41  ;;  %924 = vmatpush.msrb.mxu2 %v5943_v12 }
 0x1c6   :  { %831 = vmatpush.msra.mxu0 %v5944_v15 }
 0x1c7   :  { %905 = vmatpush.msra.mxu1 %v5945_v17  ;;  %925 = vmatpush.msrb.mxu2 %v5946_v19 }
 0x1c8   :  { %832 = vmatpush.msra.mxu0 %v5947_v21 }
 0x1c9   :  { %906 = vmatpush.msra.mxu1 %v5948_v23  ;;  %926 = vmatpush.msrb.mxu2 %v5949_v25 }
 0x1ca   :  { %833 = vmatpush.msra.mxu0 %v5950_v26 }
 0x1cb   :  { %907 = vmatpush.msra.mxu1 %v5951_v27  ;;  %927 = vmatpush.msrb.mxu2 %v5952_v28 }
 0x228   :  { %v567_v38 = vpop.f32.mrf.mxu0  ;;  %v587_v39 = vpop.f32.mrf.mxu1 }
 0x229   :  { %v610_v40 = vadd.f32 %v567_v38, %v141_v32  ;;  %v630_v41 = vadd.f32 %v587_v39, %v182_v36  ;;  %v3957_v39 = vld [vmem:[%s5827_s3 + $0x178] sm:$0xff] }
 0x22b   :  { %v2770_v44 = vmul.f32 -1.442695, %v610_v40  ;;  %v2771_v45 = vmul.f32 -1.442695, %v630_v41  ;;  %v3963_v40 = vld [vmem:[%s5827_s3 + $0x168] sm:$0xff]  ;;  %v3976_v41 = vld [vmem:[%s5827_s3 + $0x150] sm:$0xff] }
 0x22d   :  { %2866 = vpow2.f32 %v2770_v44  ;;  %v3989_v44 = vld [vmem:[%s5827_s3 + $0x138] sm:$0xff] }
 0x22e   :  { %2868 = vpow2.f32 %v2771_v45  ;;  %v4002_v45 = vld [vmem:[%s5827_s3 + $0x120] sm:$0xff] }
 0x22f   :  { %v607_v6 = vpop.f32.mrf.mxu2 }
 0x230   :  { %v650_v42 = vadd.f32 %v3807_v43, %v607_v6 }
 0x233   :  { %v2867_v48 = vpop.eup %2866 }
 0x234   :  { %v2869_v51 = vpop.eup %2868  ;;  %v614_v55 = vadd.f32 1.0, %v2867_v48  ;;  %v4015_v48 = vld [vmem:[%s5827_s3 + $0x108] sm:$0xff] }
 0x235   :  { %v634_v58 = vadd.f32 1.0, %v2869_v51  ;;  %v4028_v51 = vld [vmem:[%s5827_s3 + $0xf0] sm:$0xff] }
 0x236   :  { %2870 = vrcp.f32 %v614_v55  ;;  %v626_v63 = vand.u32 2147483648, %v614_v55  ;;  %v624_v18 = vand.u32 2147483647, %v614_v55  ;;  %vm620_vm3 = vweird.f32 %v614_v55 }
 0x237   :  { %2872 = vrcp.f32 %v634_v58  ;;  %v646_v31 = vand.u32 2147483648, %v634_v58  ;;  %vm640_vm7 = vweird.f32 %v634_v58  ;;  %v644_v22 = vand.u32 2147483647, %v634_v58 }
 0x238   :  { %v627_v52 = vor.u32 1.1754944e-38, %v626_v63  ;;  %vm625_vm5 = vcmp.eq.f32.partialorder %v624_v18, 8.507059e+37  ;;  %v5959_v18 = vld [vmem:[#allocation26_spill] sm:$0xff] }
 0x239   :  { %v647_v23 = vor.u32 1.1754944e-38, %v646_v31  ;;  %vm645_vm9 = vcmp.eq.f32.partialorder %v644_v22, 8.507059e+37 }
 0x23c   :  { %v2871_v62 = vpop.eup %2870 }
 0x23d   :  { %v2873_v2 = vpop.eup %2872  ;;  %v616_v16 = vmul.f32 %v2871_v62, %v614_v55  ;;  %vm621_vm2 = vweird.f32 %v2871_v62  ;;  %v4041_v55 = vld [vmem:[%s5827_s3 + $0xd8] sm:$0xff] }
 0x23e   :  { %v636_v53 = vmul.f32 %v2873_v2, %v634_v58  ;;  %vm622_vm4 = vmor %vm620_vm3, %vm621_vm2  ;;  %vm641_vm6 = vweird.f32 %v2873_v2  ;;  %v4054_v58 = vld [vmem:[%s5827_s3 + $0xc0] sm:$0xff] }
 0x23f   :  { %v617_v37 = vsub.f32 1.0, %v616_v16  ;;  %vm642_vm8 = vmor %vm640_vm7, %vm641_vm6  ;;  %v4093_v16 = vld [vmem:[%s5827_s3 + $0x78] sm:$0xff] }
 0x240   :  { %v637_v57 = vsub.f32 1.0, %v636_v53  ;;  %v4106_v53 = vld [vmem:[%s5827_s3 + $0x60] sm:$0xff] }
 0x241   :  { %v618_v60 = vmul.f32 %v2871_v62, %v617_v37  ;;  %v4119_v37 = vld [vmem:[%s5827_s3 + $0x48] sm:$0xff] }
 0x242   :  { %v638_v20 = vmul.f32 %v2873_v2, %v637_v57  ;;  %v4135_v57 = vld [vmem:[%s5827_s3 + $0x18] sm:$0xff] }
 0x243   :  { %v619_v1 = vadd.f32 %v2871_v62, %v618_v60 }
 0x244   :  { %v639_v24 = vadd.f32 %v2873_v2, %v638_v20 }
 0x245   :  { %v623_v34 = vsel %vm622_vm4, %v2871_v62, %v619_v1  ;;  %v4067_v62 = vld [vmem:[%s5827_s3 + $0xa8] sm:$0xff] }
 0x246   :  { %v628_v49 = vsel %vm625_vm5, %v627_v52, %v623_v34  ;;  %v643_v17 = vsel %vm642_vm8, %v2873_v2, %v639_v24  ;;  %v4080_v2 = vld [vmem:[%s5827_s3 + $0x90] sm:$0xff] }
 0x247   :  { %v651_v47 = vmul.f32 %v650_v42, %v628_v49  ;;  %v648_v27 = vsel %vm645_vm9, %v647_v23, %v643_v17 }
 0x248   :  { %v654_v30 = vsub.f32 1.0, %v648_v27  ;;  %v656_v36 = vmul.f32 %v648_v27, %v3888_v14  ;;  %v3970_v14 = vld [vmem:[%s5827_s3 + $0x160] sm:$0xff] }
 0x249   :  { %v652_v50 = vadd.f32 %v651_v47, %v223_v4 }
 0x24b   :  { %2874 = vtanh.f32 %v652_v50 }
 0x251   :  { %v2875_v32 = vpop.eup %2874 }
 0x252   :  { %v655_v35 = vmul.f32 %v2875_v32, %v654_v30 }
 0x254   :  { %v3949_v38 = vadd.f32 %v656_v36, %v655_v35 }
 0x256   :  { %680 = vmatmul.f32.vlgmr.msra.gmra.mxu3 %v3949_v38  ;;  %700 = vmatmul.f32.vlgmr.msrb.gmra.mxu0 %v3949_v38 }
 0x257   :  { %720 = vmatmul.f32.vlgmr.msrb.gmra.mxu1 %v3949_v38  ;;  %932 = vmatpush.msra.mxu3 %v3957_v39 }
 0x258   :  { %1006 = vmatpush.msrb.mxu0 %v3963_v40  ;;  %1026 = vmatpush.msrb.mxu1 %v3477_v54  ;;  %v3983_v54 = vld [vmem:[%s5827_s3 + $0x148] sm:$0xff] }
 0x259   :  { %933 = vmatpush.msra.mxu3 %v3970_v14 }
 0x25a   :  { %1007 = vmatpush.msrb.mxu0 %v3976_v41  ;;  %1027 = vmatpush.msrb.mxu1 %v3488_v56  ;;  %v3996_v56 = vld [vmem:[%s5827_s3 + $0x130] sm:$0xff] }
 0x25b   :  { %934 = vmatpush.msra.mxu3 %v3983_v54 }
 0x25c   :  { %1008 = vmatpush.msrb.mxu0 %v3989_v44  ;;  %1028 = vmatpush.msrb.mxu1 %v3515_v61  ;;  %v4009_v61 = vld [vmem:[%s5827_s3 + $0x118] sm:$0xff] }
 0x25d   :  { %935 = vmatpush.msra.mxu3 %v3996_v56 }
 0x25e   :  { %1009 = vmatpush.msrb.mxu0 %v4002_v45  ;;  %1029 = vmatpush.msrb.mxu1 %v3532_v0  ;;  %v4022_v0 = vld [vmem:[%s5827_s3 + $0x100] sm:$0xff] }
 0x25f   :  { %936 = vmatpush.msra.mxu3 %v4009_v61 }
 0x260   :  { %1010 = vmatpush.msrb.mxu0 %v4015_v48  ;;  %1030 = vmatpush.msrb.mxu1 %v3545_v3  ;;  %v4035_v3 = vld [vmem:[%s5827_s3 + $0xe8] sm:$0xff] }
 0x261   :  { %937 = vmatpush.msra.mxu3 %v4022_v0 }
 0x262   :  { %1011 = vmatpush.msrb.mxu0 %v4028_v51  ;;  %1031 = vmatpush.msrb.mxu1 %v3558_v5  ;;  %v4048_v5 = vld [vmem:[%s5827_s3 + $0xd0] sm:$0xff] }
 0x263   :  { %938 = vmatpush.msra.mxu3 %v4035_v3 }
 0x264   :  { %1012 = vmatpush.msrb.mxu0 %v4041_v55  ;;  %1032 = vmatpush.msrb.mxu1 %v3573_v7  ;;  %v4061_v7 = vld [vmem:[%s5827_s3 + $0xb8] sm:$0xff] }
 0x265   :  { %939 = vmatpush.msra.mxu3 %v4048_v5 }
 0x266   :  { %1013 = vmatpush.msrb.mxu0 %v4054_v58  ;;  %1033 = vmatpush.msrb.mxu1 %v3583_v8  ;;  %v4074_v8 = vld [vmem:[%s5827_s3 + $0xa0] sm:$0xff] }
 0x267   :  { %940 = vmatpush.msra.mxu3 %v4061_v7 }
 0x268   :  { %1014 = vmatpush.msrb.mxu0 %v4067_v62  ;;  %1034 = vmatpush.msrb.mxu1 %v3592_v9  ;;  %v4087_v9 = vld [vmem:[%s5827_s3 + $0x88] sm:$0xff] }
 0x269   :  { %941 = vmatpush.msra.mxu3 %v4074_v8 }
 0x26a   :  { %1015 = vmatpush.msrb.mxu0 %v4080_v2  ;;  %1035 = vmatpush.msrb.mxu1 %v3601_v10  ;;  %v4100_v10 = vld [vmem:[%s5827_s3 + $0x70] sm:$0xff] }
 0x26b   :  { %942 = vmatpush.msra.mxu3 %v4087_v9 }
 0x26c   :  { %1016 = vmatpush.msrb.mxu0 %v4093_v16  ;;  %1036 = vmatpush.msrb.mxu1 %v3611_v11  ;;  %v4113_v11 = vld [vmem:[%s5827_s3 + $0x58] sm:$0xff] }
 0x26d   :  { %943 = vmatpush.msra.mxu3 %v4100_v10 }
 0x26e   :  { %1017 = vmatpush.msrb.mxu0 %v4106_v53  ;;  %1037 = vmatpush.msrb.mxu1 %v3621_v13  ;;  %v4127_v13 = vld [vmem:[%s5827_s3 + $0x30] sm:$0xff] }
 0x26f   :  { %944 = vmatpush.msra.mxu3 %v4113_v11 }
 0x270   :  { %1018 = vmatpush.msrb.mxu0 %v4119_v37  ;;  %1038 = vmatpush.msrb.mxu1 %v5943_v12  ;;  %v4143_v12 = vld [vmem:[%s5827_s3] sm:$0xff] }
 0x271   :  { %945 = vmatpush.msra.mxu3 %v5944_v15  ;;  %v5958_v15 = vld [vmem:[#allocation34_spill] sm:$0xff] }
 0x272   :  { %1019 = vmatpush.msrb.mxu0 %v4127_v13  ;;  %1039 = vmatpush.msrb.mxu1 %v5946_v19  ;;  %v185_v19 = vadd.f32 %v5958_v15, %v5955_v33 }
 0x273   :  { %946 = vmatpush.msra.mxu3 %v5947_v21 }
 0x274   :  { %1020 = vmatpush.msrb.mxu0 %v4135_v57  ;;  %1040 = vmatpush.msrb.mxu1 %v5949_v25  ;;  %v144_v25 = vadd.f32 %v5959_v18, %v5953_v29 }
 0x275   :  { %947 = vmatpush.msra.mxu3 %v5950_v26 }
 0x276   :  { %1021 = vmatpush.msrb.mxu0 %v4143_v12  ;;  %1041 = vmatpush.msrb.mxu1 %v5952_v28 }
 0x2d3   :  { %v701_v21 = vpop.f32.mrf.mxu0 }
 0x2d4   :  { %v744_v63 = vadd.f32 %v701_v21, %v185_v19  ;;  %v721_v17 = vpop.f32.mrf.mxu1  ;;  %v5960_v19 = vld [vmem:[#allocation29_spill] sm:$0xff] }
 0x2d5   :  { %v764_v32 = vadd.f32 %v3807_v43, %v721_v17  ;;  %v226_v21 = vadd.f32 %v5960_v19, %v3810_v59 }
 0x2d6   :  { %v2773_v60 = vmul.f32 -1.442695, %v744_v63 }
 0x2d8   :  { %2876 = vpow2.f32 %v2773_v60 }
 0x2d9   :  { %v681_v26 = vpop.f32.mrf.mxu3 }
 0x2da   :  { %v724_v20 = vadd.f32 %v681_v26, %v144_v25 }
 0x2dc   :  { %v2772_v6 = vmul.f32 -1.442695, %v724_v20 }
 0x2de   :  { %v2877_v1 = vpop.eup %2876  ;;  %2878 = vpow2.f32 %v2772_v6 }
 0x2df   :  { %v748_v52 = vadd.f32 1.0, %v2877_v1 }
 0x2e1   :  { %2880 = vrcp.f32 %v748_v52  ;;  %v760_v63 = vand.u32 2147483648, %v748_v52  ;;  %vm754_vm15 = vweird.f32 %v748_v52  ;;  %v758_v18 = vand.u32 2147483647, %v748_v52 }
 0x2e3   :  { %v761_v20 = vor.u32 1.1754944e-38, %v760_v63  ;;  %vm759_vm2 = vcmp.eq.f32.partialorder %v758_v18, 8.507059e+37 }
 0x2e4   :  { %v2879_v34 = vpop.eup %2878 }
 0x2e5   :  { %v728_v42 = vadd.f32 1.0, %v2879_v34 }
 0x2e7   :  { %2882 = vrcp.f32 %v728_v42  ;;  %v2881_v28 = vpop.eup %2880  ;;  %v740_v31 = vand.u32 2147483648, %v728_v42  ;;  %v738_v50 = vand.u32 2147483647, %v728_v42  ;;  %vm734_vm11 = vweird.f32 %v728_v42 }
 0x2e8   :  { %v750_v49 = vmul.f32 %v2881_v28, %v748_v52  ;;  %vm755_vm14 = vweird.f32 %v2881_v28  ;;  %v3037_v52 = vld [vmem:[%s5827_s3 + $0x170] sm:$0xff] }
 0x2e9   :  { %v741_v30 = vor.u32 1.1754944e-38, %v740_v31  ;;  %vm739_vm13 = vcmp.eq.f32.partialorder %v738_v50, 8.507059e+37  ;;  %vm756_vm1 = vmor %vm754_vm15, %vm755_vm14  ;;  %v5962_v31 = vld [vmem:[#allocation20_spill] sm:$0xff] }
 0x2ea   :  { %v751_v4 = vsub.f32 1.0, %v750_v49 }
 0x2ec   :  { %v752_v23 = vmul.f32 %v2881_v28, %v751_v4  ;;  %v3055_v4 = vld [vmem:[%s5827_s3 + $0x8] sm:$0xff] }
 0x2ed   :  { %v2883_v24 = vpop.eup %2882 }
 0x2ee   :  { %v730_v46 = vmul.f32 %v2883_v24, %v728_v42  ;;  %vm735_vm10 = vweird.f32 %v2883_v24  ;;  %v753_v15 = vadd.f32 %v2881_v28, %v752_v23 }
 0x2ef   :  { %vm736_vm12 = vmor %vm734_vm11, %vm735_vm10 }
 0x2f0   :  { %v731_v47 = vsub.f32 1.0, %v730_v46  ;;  %v757_v26 = vsel %vm756_vm1, %v2881_v28, %v753_v15  ;;  %v4228_v28 = vld [vmem:[%s5827_s3 + $0x40] sm:$0xff] }
 0x2f1   :  { %v762_v6 = vsel %vm759_vm2, %v761_v20, %v757_v26  ;;  %v3053_v46 = vld [vmem:[%s5827_s3 + $0x20] sm:$0xff] }
 0x2f2   :  { %v732_v22 = vmul.f32 %v2883_v24, %v731_v47  ;;  %v768_v1 = vsub.f32 1.0, %v762_v6  ;;  %v770_v49 = vmul.f32 %v762_v6, %v3949_v38  ;;  %v3038_v38 = vld [vmem:[%s5827_s3 + $0x158] sm:$0xff] }
 0x2f4   :  { %v733_v27 = vadd.f32 %v2883_v24, %v732_v22  ;;  %v188_v22 = vadd.f32 %v5962_v31, %v5955_v33 }
 0x2f6   :  { %v737_v35 = vsel %vm736_vm12, %v2883_v24, %v733_v27 }
 0x2f7   :  { %v742_v36 = vsel %vm739_vm13, %v741_v30, %v737_v35 }
 0x2f8   :  { %v765_v60 = vmul.f32 %v764_v32, %v742_v36 }
 0x2fa   :  { %v766_v25 = vadd.f32 %v765_v60, %v226_v21 }
 0x2fc   :  { %2884 = vtanh.f32 %v766_v25 }
 0x302   :  { %v2885_v34 = vpop.eup %2884 }
 0x303   :  { %v769_v42 = vmul.f32 %v2885_v34, %v768_v1 }
 0x305   :  { %v4155_v24 = vadd.f32 %v770_v49, %v769_v42 }
 0x307   :  { %794 = vmatmul.f32.vlgmr.msra.gmra.mxu2 %v4155_v24  ;;  %814 = vmatmul.f32.vlgmr.msrb.gmra.mxu3 %v4155_v24 }
 0x308   :  { %834 = vmatmul.f32.vlgmr.msra.gmra.mxu0 %v4155_v24  ;;  %1046 = vmatpush.msra.mxu2 %v3957_v39 }
 0x309   :  { %1120 = vmatpush.msrb.mxu3 %v3963_v40  ;;  %1140 = vmatpush.msra.mxu0 %v3037_v52  ;;  %v3039_v40 = vld [vmem:[%s5827_s3 + $0x140] sm:$0xff] }
 0x30a   :  { %1047 = vmatpush.msra.mxu2 %v3970_v14 }
 0x30b   :  { %1121 = vmatpush.msrb.mxu3 %v3976_v41  ;;  %1141 = vmatpush.msra.mxu0 %v3038_v38  ;;  %v3040_v41 = vld [vmem:[%s5827_s3 + $0x128] sm:$0xff] }
 0x30c   :  { %1048 = vmatpush.msra.mxu2 %v3983_v54 }
 0x30d   :  { %1122 = vmatpush.msrb.mxu3 %v3989_v44  ;;  %1142 = vmatpush.msra.mxu0 %v3039_v40  ;;  %v3041_v44 = vld [vmem:[%s5827_s3 + $0x110] sm:$0xff] }
 0x30e   :  { %1049 = vmatpush.msra.mxu2 %v3996_v56 }
 0x30f   :  { %1123 = vmatpush.msrb.mxu3 %v4002_v45  ;;  %1143 = vmatpush.msra.mxu0 %v3040_v41  ;;  %v3042_v45 = vld [vmem:[%s5827_s3 + $0xf8] sm:$0xff] }
 0x310   :  { %1050 = vmatpush.msra.mxu2 %v4009_v61 }
 0x311   :  { %1124 = vmatpush.msrb.mxu3 %v4015_v48  ;;  %1144 = vmatpush.msra.mxu0 %v3041_v44  ;;  %v3043_v48 = vld [vmem:[%s5827_s3 + $0xe0] sm:$0xff]  ;;  %v5963_v44 = vld [vmem:[#allocation30_spill] sm:$0xff] }
 0x312   :  { %1051 = vmatpush.msra.mxu2 %v4022_v0 }
 0x313   :  { %1125 = vmatpush.msrb.mxu3 %v4028_v51  ;;  %1145 = vmatpush.msra.mxu0 %v3042_v45  ;;  %v3044_v51 = vld [vmem:[%s5827_s3 + $0xc8] sm:$0xff]  ;;  %v229_v45 = vadd.f32 %v5963_v44, %v3810_v59 }
 0x314   :  { %1052 = vmatpush.msra.mxu2 %v4035_v3 }
 0x315   :  { %1126 = vmatpush.msrb.mxu3 %v4041_v55  ;;  %1146 = vmatpush.msra.mxu0 %v3043_v48  ;;  %v3045_v55 = vld [vmem:[%s5827_s3 + $0xb0] sm:$0xff] }
 0x316   :  { %1053 = vmatpush.msra.mxu2 %v4048_v5 }
 0x317   :  { %1127 = vmatpush.msrb.mxu3 %v4054_v58  ;;  %1147 = vmatpush.msra.mxu0 %v3044_v51  ;;  %v3046_v58 = vld [vmem:[%s5827_s3 + $0x98] sm:$0xff] }
 0x318   :  { %1054 = vmatpush.msra.mxu2 %v4061_v7 }
 0x319   :  { %1128 = vmatpush.msrb.mxu3 %v4067_v62  ;;  %1148 = vmatpush.msra.mxu0 %v3045_v55  ;;  %v3047_v62 = vld [vmem:[%s5827_s3 + $0x80] sm:$0xff] }
 0x31a   :  { %1055 = vmatpush.msra.mxu2 %v4074_v8 }
 0x31b   :  { %1129 = vmatpush.msrb.mxu3 %v4080_v2  ;;  %1149 = vmatpush.msra.mxu0 %v3046_v58  ;;  %v3048_v2 = vld [vmem:[%s5827_s3 + $0x68] sm:$0xff] }
 0x31c   :  { %1056 = vmatpush.msra.mxu2 %v4087_v9 }
 0x31d   :  { %1130 = vmatpush.msrb.mxu3 %v4093_v16  ;;  %1150 = vmatpush.msra.mxu0 %v3047_v62  ;;  %v3049_v16 = vld [vmem:[%s5827_s3 + $0x50] sm:$0xff] }
 0x31e   :  { %1057 = vmatpush.msra.mxu2 %v4100_v10 }
 0x31f   :  { %1131 = vmatpush.msrb.mxu3 %v4106_v53  ;;  %1151 = vmatpush.msra.mxu0 %v3048_v2  ;;  %v3051_v53 = vld [vmem:[%s5827_s3 + $0x38] sm:$0xff] }
 0x320   :  { %1058 = vmatpush.msra.mxu2 %v4113_v11 }
 0x321   :  { %1132 = vmatpush.msrb.mxu3 %v4119_v37  ;;  %1152 = vmatpush.msra.mxu0 %v3049_v16  ;;  %v4238_v37 = vld [vmem:[%s5827_s3 + $0x28] sm:$0xff] }
 0x322   :  { %1059 = vmatpush.msra.mxu2 %v4228_v28 }
 0x323   :  { %1133 = vmatpush.msrb.mxu3 %v4127_v13  ;;  %1153 = vmatpush.msra.mxu0 %v3051_v53  ;;  %v4248_v13 = vld [vmem:[%s5827_s3 + $0x10] sm:$0xff]  ;;  %s3107_s3 = smov 64  }
 0x324   :  { %1060 = vmatpush.msra.mxu2 %v4238_v37 }
 0x325   :  { %1134 = vmatpush.msrb.mxu3 %v4135_v57  ;;  %1154 = vmatpush.msra.mxu0 %v3053_v46  ;;  %v5961_v57 = vld [vmem:[#allocation15_spill] sm:$0xff] }
 0x326   :  { %1061 = vmatpush.msra.mxu2 %v4248_v13  ;;  %v147_v47 = vadd.f32 %v5961_v57, %v5953_v29 }
 0x327   :  { %1135 = vmatpush.msrb.mxu3 %v4143_v12  ;;  %1155 = vmatpush.msra.mxu0 %v3055_v4 }
 0x385   :  { %v835_v1 = vpop.f32.mrf.mxu0 }
 0x386   :  { %v878_v52 = vadd.f32 %v3807_v43, %v835_v1 }
 0x38a   :  { %v795_v50 = vpop.f32.mrf.mxu2  ;;  %v815_v17 = vpop.f32.mrf.mxu3 }
 0x38b   :  { %v838_v23 = vadd.f32 %v795_v50, %v147_v47  ;;  %v858_v27 = vadd.f32 %v815_v17, %v188_v22 }
 0x38d   :  { %v2774_v30 = vmul.f32 -1.442695, %v838_v23  ;;  %v2775_v32 = vmul.f32 -1.442695, %v858_v27 }
 0x38f   :  { %2886 = vpow2.f32 %v2774_v30 }
 0x390   :  { %2888 = vpow2.f32 %v2775_v32 }
 0x395   :  { %v2887_v12 = vpop.eup %2886 }
 0x396   :  { %v2889_v35 = vpop.eup %2888  ;;  %v842_v36 = vadd.f32 1.0, %v2887_v12 }
 0x397   :  { %v862_v15 = vadd.f32 1.0, %v2889_v35  ;;  %v4291_v35 = vld [vmem:[%s5829_s5] ss:$0 sm:$0xff] }
 0x398   :  { %2890 = vrcp.f32 %v842_v36  ;;  %v854_v25 = vand.u32 2147483648, %v842_v36  ;;  %v852_v6 = vand.u32 2147483647, %v842_v36  ;;  %vm848_vm4 = vweird.f32 %v842_v36 }
 0x399   :  { %2892 = vrcp.f32 %v862_v15  ;;  %v874_v48 = vand.u32 2147483648, %v862_v15  ;;  %vm868_vm8 = vweird.f32 %v862_v15  ;;  %v872_v55 = vand.u32 2147483647, %v862_v15 }
 0x39a   :  { %v855_v49 = vor.u32 1.1754944e-38, %v854_v25  ;;  %vm853_vm6 = vcmp.eq.f32.partialorder %v852_v6, 8.507059e+37 }
 0x39b   :  { %v875_v2 = vor.u32 1.1754944e-38, %v874_v48  ;;  %vm873_vm10 = vcmp.eq.f32.partialorder %v872_v55, 8.507059e+37 }
 0x39e   :  { %v2891_v19 = vpop.eup %2890 }
 0x39f   :  { %v2893_v21 = vpop.eup %2892  ;;  %v844_v63 = vmul.f32 %v2891_v19, %v842_v36  ;;  %vm849_vm3 = vweird.f32 %v2891_v19 }
 0x3a0   :  { %v864_v60 = vmul.f32 %v2893_v21, %v862_v15  ;;  %vm850_vm5 = vmor %vm848_vm4, %vm849_vm3  ;;  %vm869_vm7 = vweird.f32 %v2893_v21  ;;  %v5966_v15 = vld [vmem:[#allocation31_spill] sm:$0xff] }
 0x3a1   :  { %v845_v18 = vsub.f32 1.0, %v844_v63  ;;  %vm870_vm9 = vmor %vm868_vm8, %vm869_vm7 }
 0x3a2   :  { %v865_v26 = vsub.f32 1.0, %v864_v60 }
 0x3a3   :  { %v846_v20 = vmul.f32 %v2891_v19, %v845_v18 }
 0x3a4   :  { %v866_v34 = vmul.f32 %v2893_v21, %v865_v26 }
 0x3a5   :  { %v847_v42 = vadd.f32 %v2891_v19, %v846_v20 }
 0x3a6   :  { %v867_v41 = vadd.f32 %v2893_v21, %v866_v34 }
 0x3a7   :  { %v851_v38 = vsel %vm850_vm5, %v2891_v19, %v847_v42  ;;  %v232_v19 = vadd.f32 %v5966_v15, %v3810_v59 }
 0x3a8   :  { %v856_v40 = vsel %vm853_vm6, %v855_v49, %v851_v38  ;;  %v871_v62 = vsel %vm870_vm9, %v2893_v21, %v867_v41  ;;  %v5967_v41 = vld [vmem:[#allocation17_spill] sm:$0xff] }
 0x3a9   :  { %v879_v51 = vmul.f32 %v878_v52, %v856_v40  ;;  %v876_v16 = vsel %vm873_vm10, %v875_v2, %v871_v62  ;;  %v153_v44 = vadd.f32 %v5967_v41, %v5953_v29 }
 0x3aa   :  { %v882_v43 = vsub.f32 1.0, %v876_v16  ;;  %v884_v4 = vmul.f32 %v876_v16, %v4155_v24 }
 0x3ab   :  { %v880_v58 = vadd.f32 %v879_v51, %v229_v45  ;;  %v5968_v45 = vld [vmem:[#allocation25_spill] sm:$0xff] }
 0x3ac   :  { %v194_v48 = vadd.f32 %v5968_v45, %v5955_v33 }
 0x3ad   :  { %2894 = vtanh.f32 %v880_v58 }
 0x3b3   :  { %v2895_v53 = vpop.eup %2894 }
 0x3b4   :  { %v883_v46 = vmul.f32 %v2895_v53, %v882_v43 }
 0x3b6   :  { %v4263_v57 = vadd.f32 %v884_v4, %v883_v46 }
 0x3b8   :  { %908 = vmatmul.f32.vlgmr.msra.gmra.mxu1 %v4263_v57  ;;  %928 = vmatmul.f32.vlgmr.msrb.gmra.mxu2 %v4263_v57 }
 0x3b9   :  { %948 = vmatmul.f32.vlgmr.msra.gmra.mxu3 %v4263_v57  ;;  %1160 = vmatpush.msra.mxu1 %v3957_v39  ;;  %v5964_v39 = vld [vmem:[#allocation16_spill] sm:$0xff] }
 0x3bb   :  { %1161 = vmatpush.msra.mxu1 %v3970_v14  ;;  %v150_v14 = vadd.f32 %v5964_v39, %v5953_v29 }
 0x3bd   :  { %1162 = vmatpush.msra.mxu1 %v3983_v54 }
 0x3bf   :  { %1163 = vmatpush.msra.mxu1 %v3996_v56 }
 0x3c1   :  { %1164 = vmatpush.msra.mxu1 %v4009_v61 }
 0x3c3   :  { %1165 = vmatpush.msra.mxu1 %v4022_v0  ;;  %v5965_v0 = vld [vmem:[#allocation22_spill] sm:$0xff] }
 0x3c5   :  { %1166 = vmatpush.msra.mxu1 %v4035_v3  ;;  %v191_v3 = vadd.f32 %v5965_v0, %v5955_v33 }
 0x3c7   :  { %1167 = vmatpush.msra.mxu1 %v4048_v5 }
 0x3c9   :  { %1168 = vmatpush.msra.mxu1 %v4061_v7 }
 0x3cb   :  { %1169 = vmatpush.msra.mxu1 %v4074_v8 }
 0x3cd   :  { %1170 = vmatpush.msra.mxu1 %v4087_v9 }
 0x3cf   :  { %1171 = vmatpush.msra.mxu1 %v4100_v10 }
 0x3d1   :  { %1172 = vmatpush.msra.mxu1 %v4113_v11 }
 0x3d3   :  { %1173 = vmatpush.msra.mxu1 %v4228_v28 }
 0x3d5   :  { %1174 = vmatpush.msra.mxu1 %v4238_v37 }
 0x3d7   :  { %1175 = vmatpush.msra.mxu1 %v4248_v13 }
 0x435   :  { %v909_v54 = vpop.f32.mrf.mxu1 }
 0x436   :  { %v952_v56 = vadd.f32 %v909_v54, %v150_v14 }
 0x438   :  { %v2776_v61 = vmul.f32 -1.442695, %v952_v56 }
 0x43a   :  { %2896 = vpow2.f32 %v2776_v61 }
 0x43b   :  { %v929_v5 = vpop.f32.mrf.mxu2 }
 0x43c   :  { %v972_v7 = vadd.f32 %v929_v5, %v191_v3  ;;  %v949_v17 = vpop.f32.mrf.mxu3 }
 0x43d   :  { %v992_v36 = vadd.f32 %v4291_v35, %v949_v17 }
 0x43e   :  { %v2777_v8 = vmul.f32 -1.442695, %v972_v7 }
 0x440   :  { %v2897_v9 = vpop.eup %2896  ;;  %2898 = vpow2.f32 %v2777_v8 }
 0x441   :  { %v956_v10 = vadd.f32 1.0, %v2897_v9 }
 0x443   :  { %2900 = vrcp.f32 %v956_v10  ;;  %v968_v47 = vand.u32 2147483648, %v956_v10  ;;  %v966_v22 = vand.u32 2147483647, %v956_v10  ;;  %vm962_vm12 = vweird.f32 %v956_v10 }
 0x445   :  { %v969_v30 = vor.u32 1.1754944e-38, %v968_v47  ;;  %vm967_vm14 = vcmp.eq.f32.partialorder %v966_v22, 8.507059e+37 }
 0x446   :  { %v2899_v11 = vpop.eup %2898 }
 0x447   :  { %v976_v24 = vadd.f32 1.0, %v2899_v11 }
 0x449   :  { %v2901_v28 = vpop.eup %2900  ;;  %2902 = vrcp.f32 %v976_v24  ;;  %v988_v18 = vand.u32 2147483648, %v976_v24  ;;  %v986_v25 = vand.u32 2147483647, %v976_v24  ;;  %vm982_vm1 = vweird.f32 %v976_v24 }
 0x44a   :  { %v958_v37 = vmul.f32 %v2901_v28, %v956_v10  ;;  %vm963_vm11 = vweird.f32 %v2901_v28 }
 0x44b   :  { %vm964_vm13 = vmor %vm962_vm12, %vm963_vm11  ;;  %v989_v1 = vor.u32 1.1754944e-38, %v988_v18  ;;  %vm987_vm3 = vcmp.eq.f32.partialorder %v986_v25, 8.507059e+37  ;;  %v1239_v18 = vld [vmem:[%s5832_s6 + $0x58] sm:$0xff]  ;;  %v5970_v25 = vld [vmem:[#allocation27_spill] sm:$0xff] }
 0x44c   :  { %v959_v13 = vsub.f32 1.0, %v958_v37  ;;  %v5969_v37 = vld [vmem:[#allocation33_spill] sm:$0xff] }
 0x44e   :  { %v960_v31 = vmul.f32 %v2901_v28, %v959_v13  ;;  %v235_v13 = vadd.f32 %v5969_v37, %v3810_v59 }
 0x44f   :  { %v2903_v50 = vpop.eup %2902 }
 0x450   :  { %v978_v23 = vmul.f32 %v2903_v50, %v976_v24  ;;  %v961_v27 = vadd.f32 %v2901_v28, %v960_v31  ;;  %vm983_vm15 = vweird.f32 %v2903_v50 }
 0x451   :  { %vm984_vm2 = vmor %vm982_vm1, %vm983_vm15 }
 0x452   :  { %v979_v32 = vsub.f32 1.0, %v978_v23  ;;  %v965_v12 = vsel %vm964_vm13, %v2901_v28, %v961_v27 }
 0x453   :  { %v970_v21 = vsel %vm967_vm14, %v969_v30, %v965_v12 }
 0x454   :  { %v980_v63 = vmul.f32 %v2903_v50, %v979_v32  ;;  %v993_v60 = vmul.f32 %v992_v36, %v970_v21  ;;  %v1242_v21 = vld [vmem:[%s5832_s6 + $0x70] sm:$0xff] }
 0x456   :  { %v994_v26 = vadd.f32 %v993_v60, %v232_v19  ;;  %v981_v20 = vadd.f32 %v2903_v50, %v980_v63  ;;  %v1243_v19 = vld [vmem:[%s5832_s6 + $0x78] sm:$0xff]  ;;  %v1241_v63 = vld [vmem:[%s5832_s6 + $0x68] sm:$0xff]  ;;  %v1240_v60 = vld [vmem:[%s5832_s6 + $0x60] sm:$0xff] }
 0x457   :  { %1248 = vmatpush.msrb.mxu2 %v1243_v19  ;;  %v1401_v19 = vld [vmem:[%s5834_s8 + $0x78] sm:$0xff] }
 0x458   :  { %2904 = vtanh.f32 %v994_v26  ;;  %v985_v6 = vsel %vm984_vm2, %v2903_v50, %v981_v20  ;;  %v197_v26 = vadd.f32 %v5970_v25, %v5955_v33  ;;  %v1238_v20 = vld [vmem:[%s5832_s6 + $0x50] sm:$0xff]  ;;  %v1235_v33 = vld [vmem:[%s5832_s6 + $0x38] sm:$0xff]  ;;  %v4403_v25 = vld [vmem:[%s5835_s10 + $0x120] sm:$0xff] }
 0x459   :  { %v990_v34 = vsel %vm987_vm3, %v989_v1, %v985_v6  ;;  %1249 = vmatpush.msrb.mxu2 %v1242_v21  ;;  %v1398_v21 = vld [vmem:[%s5834_s8 + $0x60] sm:$0xff] }
 0x45a   :  { %v996_v42 = vsub.f32 1.0, %v990_v34  ;;  %v998_v38 = vmul.f32 %v990_v34, %v4263_v57  ;;  %v1237_v34 = vld [vmem:[%s5832_s6 + $0x48] sm:$0xff] }
 0x45b   :  { %1250 = vmatpush.msrb.mxu2 %v1241_v63  ;;  %v4389_v63 = vld [vmem:[%s5835_s10 + $0x150] sm:$0xff] }
 0x45d   :  { %1251 = vmatpush.msrb.mxu2 %v1240_v60  ;;  %v4394_v60 = vld [vmem:[%s5835_s10 + $0x138] sm:$0xff] }
 0x45e   :  { %v2905_v49 = vpop.eup %2904 }
 0x45f   :  { %v997_v52 = vmul.f32 %v2905_v49, %v996_v42  ;;  %1252 = vmatpush.msrb.mxu2 %v1239_v18  ;;  %v1236_v49 = vld [vmem:[%s5832_s6 + $0x40] sm:$0xff]  ;;  %v1395_v18 = vld [vmem:[%s5834_s8 + $0x48] sm:$0xff] }
 0x461   :  { %v999_v40 = vadd.f32 %v998_v38, %v997_v52  ;;  %1253 = vmatpush.msrb.mxu2 %v1238_v20  ;;  %v1234_v52 = vld [vmem:[%s5832_s6 + $0x30] sm:$0xff]  ;;  %v1304_v20 = vld [vmem:[%s5836_s9 + $0xa8] sm:$0xff] }
 0x462   :  { %1326 = vmatpush.msra.mxu3 %v1304_v20  ;;  %v4656_v20 = vld [vmem:[%s5835_s10 + $0x140] sm:$0xff] }
 0x463   :  { %1022 = vmatmul.f32.vlgmr.msrb.gmra.mxu0 %v999_v40  ;;  %1042 = vmatmul.f32.vlgmr.msrb.gmra.mxu1 %v999_v40 }
 0x464   :  { %1062 = vmatmul.f32.vlgmr.msra.gmra.mxu2 %v999_v40 }
 0x465   :  { %1254 = vmatpush.msrb.mxu2 %v1237_v34  ;;  %v1389_v34 = vld [vmem:[%s5834_s8 + $0x18] sm:$0xff] }
 0x467   :  { %1255 = vmatpush.msrb.mxu2 %v1236_v49  ;;  %v4430_v49 = vld [vmem:[%s5835_s10 + $0xf0] sm:$0xff] }
 0x469   :  { %1256 = vmatpush.msrb.mxu2 %v1235_v33  ;;  %v1305_v33 = vld [vmem:[%s5836_s9 + $0xb0] sm:$0xff] }
 0x46a   :  { %1346 = vmatpush.msrb.mxu0 %v1305_v33  ;;  %v4680_v33 = vld [vmem:[%s5828_s0 + $0x30] sm:$0xff] }
 0x46b   :  { %1257 = vmatpush.msrb.mxu2 %v1234_v52  ;;  %v1386_v52 = vld [vmem:[%s5834_s8] sm:$0xff] }
 0x4e0   :  { %v1023_v51 = vpop.f32.mrf.mxu0  ;;  %v1043_v55 = vpop.f32.mrf.mxu1 }
 0x4e1   :  { %v1066_v58 = vadd.f32 %v1023_v51, %v153_v44  ;;  %v1086_v62 = vadd.f32 %v1043_v55, %v194_v48  ;;  %v1233_v44 = vld [vmem:[%s5832_s6 + $0x28] sm:$0xff]  ;;  %v1232_v48 = vld [vmem:[%s5832_s6 + $0x20] sm:$0xff]  ;;  %v1231_v55 = vld [vmem:[%s5832_s6 + $0x18] sm:$0xff] }
 0x4e2   :  { %1258 = vmatpush.msrb.mxu2 %v1233_v44  ;;  %v4453_v44 = vld [vmem:[%s5835_s10 + $0xd8] sm:$0xff] }
 0x4e3   :  { %v2778_v2 = vmul.f32 -1.442695, %v1066_v58  ;;  %v2779_v16 = vmul.f32 -1.442695, %v1086_v62  ;;  %v1230_v62 = vld [vmem:[%s5832_s6 + $0x10] sm:$0xff] }
 0x4e4   :  { %1259 = vmatpush.msrb.mxu2 %v1232_v48  ;;  %v4464_v48 = vld [vmem:[%s5835_s10 + $0xc0] sm:$0xff] }
 0x4e5   :  { %2906 = vpow2.f32 %v2778_v2  ;;  %v1229_v2 = vld [vmem:[%s5832_s6 + $0x8] sm:$0xff] }
 0x4e6   :  { %2908 = vpow2.f32 %v2779_v16  ;;  %1260 = vmatpush.msrb.mxu2 %v1231_v55  ;;  %v4472_v55 = vld [vmem:[%s5835_s10 + $0x160] sm:$0xff] }
 0x4e7   :  { %v1063_v7 = vpop.f32.mrf.mxu2 }
 0x4e8   :  { %v1106_v11 = vadd.f32 %v4291_v35, %v1063_v7  ;;  %1261 = vmatpush.msrb.mxu2 %v1230_v62  ;;  %v1302_v62 = vld [vmem:[%s5836_s9 + $0x98] sm:$0xff] }
 0x4e9   :  { %1347 = vmatpush.msrb.mxu0 %v1302_v62  ;;  %v4705_v62 = vld [vmem:[%s5835_s10 + $0x110] sm:$0xff] }
 0x4ea   :  { %1262 = vmatpush.msrb.mxu2 %v1229_v2 }
 0x4eb   :  { %v2907_v43 = vpop.eup %2906 }
 0x4ec   :  { %v2909_v53 = vpop.eup %2908  ;;  %v1070_v46 = vadd.f32 1.0, %v2907_v43  ;;  %v1228_v43 = vld [vmem:[%s5832_s6] sm:$0xff] }
 0x4ed   :  { %v1090_v4 = vadd.f32 1.0, %v2909_v53  ;;  %1263 = vmatpush.msrb.mxu2 %v1228_v43  ;;  %v1289_v43 = vld [vmem:[%s5836_s9 + $0x30] sm:$0xff] }
 0x4ee   :  { %2910 = vrcp.f32 %v1070_v46  ;;  %v1082_v61 = vand.u32 2147483648, %v1070_v46  ;;  %v1080_v3 = vand.u32 2147483647, %v1070_v46  ;;  %vm1076_vm5 = vweird.f32 %v1070_v46 }
 0x4ef   :  { %2912 = vrcp.f32 %v1090_v4  ;;  %v1102_v31 = vand.u32 2147483648, %v1090_v4  ;;  %vm1096_vm9 = vweird.f32 %v1090_v4  ;;  %v1100_v22 = vand.u32 2147483647, %v1090_v4 }
 0x4f0   :  { %v1083_v9 = vor.u32 1.1754944e-38, %v1082_v61  ;;  %vm1081_vm7 = vcmp.eq.f32.partialorder %v1080_v3, 8.507059e+37 }
 0x4f1   :  { %v1103_v23 = vor.u32 1.1754944e-38, %v1102_v31  ;;  %vm1101_vm11 = vcmp.eq.f32.partialorder %v1100_v22, 8.507059e+37 }
 0x4f4   :  { %v2911_v57 = vpop.eup %2910 }
 0x4f5   :  { %v2913_v39 = vpop.eup %2912  ;;  %v1072_v29 = vmul.f32 %v2911_v57, %v1070_v46  ;;  %vm1077_vm4 = vweird.f32 %v2911_v57  ;;  %v1272_v46 = vld [vmem:[%s5833_s1] sm:$0xff] }
 0x4f6   :  { %v1092_v14 = vmul.f32 %v2913_v39, %v1090_v4  ;;  %vm1078_vm6 = vmor %vm1076_vm5, %vm1077_vm4  ;;  %vm1097_vm8 = vweird.f32 %v2913_v39  ;;  %1274 = vrot.lane.b32.xlu0 %v1272_v46, %s3107_s3  ;;  %v1299_v46 = vld [vmem:[%s5836_s9 + $0x80] sm:$0xff] }
 0x4f7   :  { %v1073_v54 = vsub.f32 1.0, %v1072_v29  ;;  %vm1098_vm10 = vmor %vm1096_vm9, %vm1097_vm8  ;;  %1348 = vmatpush.msrb.mxu0 %v1299_v46  ;;  %v4716_v46 = vld [vmem:[%s5828_s0 + $0x38] sm:$0xff] }
 0x4f8   :  { %v1093_v56 = vsub.f32 1.0, %v1092_v14 }
 0x4f9   :  { %v1074_v0 = vmul.f32 %v2911_v57, %v1073_v54 }
 0x4fa   :  { %v1094_v5 = vmul.f32 %v2913_v39, %v1093_v56 }
 0x4fb   :  { %v1075_v8 = vadd.f32 %v2911_v57, %v1074_v0 }
 0x4fc   :  { %v1095_v28 = vadd.f32 %v2913_v39, %v1094_v5 }
 0x4fd   :  { %v1079_v10 = vsel %vm1078_vm6, %v2911_v57, %v1075_v8 }
 0x4fe   :  { %v1084_v24 = vsel %vm1081_vm7, %v1083_v9, %v1079_v10  ;;  %v1099_v17 = vsel %vm1098_vm10, %v2913_v39, %v1095_v28  ;;  %v5972_v28 = vld [vmem:[#allocation35_spill] sm:$0xff] }
 0x4ff   :  { %v1107_v47 = vmul.f32 %v1106_v11, %v1084_v24  ;;  %v1104_v27 = vsel %vm1101_vm11, %v1103_v23, %v1099_v17  ;;  %v238_v37 = vadd.f32 %v5972_v28, %v3810_v59  ;;  %v1407_v59 = vld [vmem:[%s5834_s8 + $0xa8] sm:$0xff] }
 0x500   :  { %v1110_v30 = vsub.f32 1.0, %v1104_v27  ;;  %v1112_v36 = vmul.f32 %v1104_v27, %v999_v40  ;;  %v5971_v40 = vld [vmem:[#allocation19_spill] sm:$0xff]  ;;  %1442 = vmatpush.msra.mxu2 %v1407_v59  ;;  %v1300_v28 = vld [vmem:[%s5836_s9 + $0x88] sm:$0xff] }
 0x501   :  { %v1108_v50 = vadd.f32 %v1107_v47, %v235_v13  ;;  %v4627_v59 = vld [vmem:[%s5835_s10 + $0x170] sm:$0xff] }
 0x503   :  { %2914 = vtanh.f32 %v1108_v50 }
 0x509   :  { %v2915_v32 = vpop.eup %2914 }
 0x50a   :  { %v1111_v12 = vmul.f32 %v2915_v32, %v1110_v30 }
 0x50c   :  { %v4304_v15 = vadd.f32 %v1112_v36, %v1111_v12  ;;  %v1404_v36 = vld [vmem:[%s5834_s8 + $0x90] sm:$0xff] }
 0x50d   :  { %1443 = vmatpush.msra.mxu2 %v1404_v36  ;;  %v1291_v36 = vld [vmem:[%s5836_s9 + $0x40] sm:$0xff] }
 0x50e   :  { %1136 = vmatmul.f32.vlgmr.msrb.gmra.mxu3 %v4304_v15  ;;  %1156 = vmatmul.f32.vlgmr.msra.gmra.mxu0 %v4304_v15 }
 0x50f   :  { %1176 = vmatmul.f32.vlgmr.msra.gmra.mxu1 %v4304_v15  ;;  %1444 = vmatpush.msra.mxu2 %v1401_v19  ;;  %v4635_v19 = vld [vmem:[%s5835_s10 + $0xe8] sm:$0xff] }
 0x511   :  { %1445 = vmatpush.msra.mxu2 %v1398_v21  ;;  %v1403_v21 = vld [vmem:[%s5834_s8 + $0x88] sm:$0xff] }
 0x513   :  { %1446 = vmatpush.msra.mxu2 %v1395_v18  ;;  %v4645_v18 = vld [vmem:[%s5835_s10 + $0x158] sm:$0xff] }
 0x58b   :  { %v1157_v6 = vpop.f32.mrf.mxu0 }
 0x58c   :  { %v1200_v1 = vadd.f32 %v1157_v6, %v197_v26  ;;  %v1177_v5 = vpop.f32.mrf.mxu1  ;;  %v1392_v26 = vld [vmem:[%s5834_s8 + $0x30] sm:$0xff]  ;;  %v4415_v6 = vld [vmem:[%s5835_s10 + $0x108] sm:$0xff] }
 0x58d   :  { %v1220_v9 = vadd.f32 %v4291_v35, %v1177_v5  ;;  %1447 = vmatpush.msra.mxu2 %v1392_v26  ;;  %v1306_v5 = vld [vmem:[%s5836_s9 + $0xb8] sm:$0xff] }
 0x58e   :  { %v2781_v42 = vmul.f32 -1.442695, %v1200_v1  ;;  %v1301_v1 = vld [vmem:[%s5836_s9 + $0x90] sm:$0xff]  ;;  %v4651_v26 = vld [vmem:[%s5828_s0 + $0x18] sm:$0xff] }
 0x58f   :  { %1327 = vmatpush.msra.mxu3 %v1301_v1  ;;  %1448 = vmatpush.msra.mxu2 %v1389_v34  ;;  %v5976_v1 = vmov 0.0   ;;  %v4666_v34 = vld [vmem:[%s5828_s0 + $0x20] sm:$0xff] }
 0x590   :  { %2916 = vpow2.f32 %v2781_v42  ;;  %v1298_v42 = vld [vmem:[%s5836_s9 + $0x78] sm:$0xff] }
 0x591   :  { %v1137_v38 = vpop.f32.mrf.mxu3  ;;  %1328 = vmatpush.msra.mxu3 %v1298_v42  ;;  %1449 = vmatpush.msra.mxu2 %v1386_v52  ;;  %v4673_v42 = vld [vmem:[%s5828_s0 + $0x28] sm:$0xff] }
 0x592   :  { %v1180_v41 = vadd.f32 %v1137_v38, %v5971_v40  ;;  %v1295_v38 = vld [vmem:[%s5836_s9 + $0x60] sm:$0xff]  ;;  %v1288_v52 = vld [vmem:[%s5836_s9 + $0x28] sm:$0xff] }
 0x593   :  { %v2844_v40 = vld [vmem:[%s5831_s7] ss:$0 sm:$0xff]  ;;  %1329 = vmatpush.msra.mxu3 %v1295_v38  ;;  %v1400_v38 = vld [vmem:[%s5834_s8 + $0x70] sm:$0xff] }
 0x594   :  { %v2780_v45 = vmul.f32 -1.442695, %v1180_v41  ;;  %v4448_v41 = vld [vmem:[%s5828_s0] sm:$0xff] }
 0x596   :  { %v2917_v51 = vpop.eup %2916  ;;  %2918 = vpow2.f32 %v2780_v45  ;;  %v4459_v45 = vld [vmem:[%s5835_s10 + $0x178] sm:$0xff] }
 0x597   :  { %v1204_v58 = vadd.f32 1.0, %v2917_v51 }
 0x599   :  { %2920 = vrcp.f32 %v1204_v58  ;;  %v1216_v13 = vand.u32 2147483648, %v1204_v58  ;;  %vm1210_vm2 = vweird.f32 %v1204_v58  ;;  %v1214_v31 = vand.u32 2147483647, %v1204_v58 }
 0x59b   :  { %v1217_v17 = vor.u32 1.1754944e-38, %v1216_v13  ;;  %vm1215_vm4 = vcmp.eq.f32.partialorder %v1214_v31, 8.507059e+37  ;;  %v4580_v13 = vld [vmem:[%s5835_s10 + $0x30] sm:$0xff] }
 0x59c   :  { %v2919_v16 = vpop.eup %2918  ;;  %5973 = vst [vmem:[#allocation21_spill] sm:$0xff] %v4580_v13  ;;  %v1297_v31 = vld [vmem:[%s5836_s9 + $0x70] sm:$0xff] }
 0x59d   :  { %v1184_v53 = vadd.f32 1.0, %v2919_v16  ;;  %v4486_v16 = vld [vmem:[%s5835_s10 + $0xa8] sm:$0xff] }
 0x59f   :  { %2922 = vrcp.f32 %v1184_v53  ;;  %v2921_v4 = vpop.eup %2920  ;;  %v1196_v56 = vand.u32 2147483648, %v1184_v53  ;;  %v1194_v0 = vand.u32 2147483647, %v1184_v53  ;;  %vm1190_vm13 = vweird.f32 %v1184_v53 }
 0x5a0   :  { %v1206_v57 = vmul.f32 %v2921_v4, %v1204_v58  ;;  %vm1211_vm1 = vweird.f32 %v2921_v4  ;;  %v1292_v58 = vld [vmem:[%s5836_s9 + $0x48] sm:$0xff] }
 0x5a1   :  { %v1197_v8 = vor.u32 1.1754944e-38, %v1196_v56  ;;  %vm1195_vm15 = vcmp.eq.f32.partialorder %v1194_v0, 8.507059e+37  ;;  %vm1212_vm3 = vmor %vm1210_vm2, %vm1211_vm1  ;;  %1330 = vmatpush.msra.mxu3 %v1292_v58  ;;  %v4535_v0 = vld [vmem:[%s5835_s10 + $0x78] sm:$0xff] }
 0x5a2   :  { %v1207_v14 = vsub.f32 1.0, %v1206_v57  ;;  %v1397_v58 = vld [vmem:[%s5834_s8 + $0x58] sm:$0xff] }
 0x5a3   :  { %1331 = vmatpush.msra.mxu3 %v1289_v43  ;;  %v4710_v43 = vld [vmem:[%s5835_s10 + $0xd0] sm:$0xff] }
 0x5a4   :  { %v1208_v3 = vmul.f32 %v2921_v4, %v1207_v14  ;;  %v1283_v14 = vld [vmem:[%s5836_s9] sm:$0xff] }
 0x5a5   :  { %v2923_v39 = vpop.eup %2922 }
 0x5a6   :  { %v1186_v29 = vmul.f32 %v2923_v39, %v1184_v53  ;;  %vm1191_vm12 = vweird.f32 %v2923_v39  ;;  %v1209_v24 = vadd.f32 %v2921_v4, %v1208_v3  ;;  %v4495_v53 = vld [vmem:[%s5835_s10 + $0x148] sm:$0xff]  ;;  %v1293_v3 = vld [vmem:[%s5836_s9 + $0x50] sm:$0xff] }
 0x5a7   :  { %vm1192_vm14 = vmor %vm1190_vm13, %vm1191_vm12 }
 0x5a8   :  { %v1187_v54 = vsub.f32 1.0, %v1186_v29  ;;  %v1213_v50 = vsel %vm1212_vm3, %v2921_v4, %v1209_v24  ;;  %v1286_v4 = vld [vmem:[%s5836_s9 + $0x18] sm:$0xff]  ;;  %v1296_v29 = vld [vmem:[%s5836_s9 + $0x68] sm:$0xff]  ;;  %v1287_v24 = vld [vmem:[%s5836_s9 + $0x20] sm:$0xff] }
 0x5a9   :  { %v1218_v23 = vsel %vm1215_vm4, %v1217_v17, %v1213_v50  ;;  %1332 = vmatpush.msra.mxu3 %v1286_v4  ;;  %1349 = vmatpush.msrb.mxu0 %v1296_v29  ;;  %v4597_v17 = vld [vmem:[%s5828_s0 + $0x10] sm:$0xff]  ;;  %v1394_v4 = vld [vmem:[%s5834_s8 + $0x40] sm:$0xff]  ;;  %v1391_v29 = vld [vmem:[%s5834_s8 + $0x28] sm:$0xff] }
 0x5aa   :  { %v1188_v61 = vmul.f32 %v2923_v39, %v1187_v54  ;;  %v1224_v35 = vsub.f32 1.0, %v1218_v23  ;;  %v1226_v32 = vmul.f32 %v1218_v23, %v4304_v15  ;;  %v4380_v15 = vld [vmem:[%s5835_s10 + $0x168] sm:$0xff]  ;;  %v4524_v54 = vld [vmem:[%s5835_s10 + $0x130] sm:$0xff] }
 0x5ab   :  { %1641 = vmatpush.msrb.mxu1 %v4380_v15  ;;  %1333 = vmatpush.msra.mxu3 %v1283_v14  ;;  %v4736_v14 = vld [vmem:[%s5835_s10 + $0xe0] sm:$0xff] }
 0x5ac   :  { %v1189_v7 = vadd.f32 %v2923_v39, %v1188_v61  ;;  %v4529_v61 = vld [vmem:[%s5828_s0 + $0x8] sm:$0xff]  ;;  %1350 = vmatpush.msrb.mxu0 %v1293_v3  ;;  %v1388_v3 = vld [vmem:[%s5834_s8 + $0x10] sm:$0xff] }
 0x5ad   :  { %1642 = vmatpush.msrb.mxu1 %v4389_v63  ;;  %1366 = vmatpush.msrb.mxu3 %v1306_v5  ;;  %v4751_v5 = vld [vmem:[%s5835_s10 + $0xc8] sm:$0xff] }
 0x5ae   :  { %v1193_v10 = vsel %vm1192_vm14, %v2923_v39, %v1189_v7  ;;  %v4512_v39 = vld [vmem:[%s5835_s10 + $0x90] sm:$0xff]  ;;  %v4547_v7 = vld [vmem:[%s5835_s10 + $0x60] sm:$0xff] }
 0x5af   :  { %v1198_v11 = vsel %vm1195_vm15, %v1197_v8, %v1193_v10  ;;  %1643 = vmatpush.msrb.mxu1 %v4394_v60  ;;  %v1290_v8 = vld [vmem:[%s5836_s9 + $0x38] sm:$0xff]  ;;  %v4562_v10 = vld [vmem:[%s5835_s10 + $0x48] sm:$0xff] }
 0x5b0   :  { %v1221_v47 = vmul.f32 %v1220_v9, %v1198_v11  ;;  %v1303_v9 = vld [vmem:[%s5836_s9 + $0xa0] sm:$0xff]  ;;  %v4567_v11 = vld [vmem:[%s5835_s10 + $0x118] sm:$0xff]  ;;  %1351 = vmatpush.msrb.mxu0 %v1290_v8  ;;  %v4757_v8 = vld [vmem:[%s5835_s10 + $0xb0] sm:$0xff] }
 0x5b1   :  { %1644 = vmatpush.msrb.mxu1 %v4403_v25  ;;  %1367 = vmatpush.msrb.mxu3 %v1303_v9  ;;  %v4762_v9 = vld [vmem:[%s5835_s10 + $0xa0] sm:$0xff] }
 0x5b2   :  { %v1222_v22 = vadd.f32 %v1221_v47, %v238_v37  ;;  %v1275_v37 = vpop.permute.xlu0 %1274  ;;  %v1284_v47 = vld [vmem:[%s5836_s9 + $0x8] sm:$0xff]  ;;  %1352 = vmatpush.msrb.mxu0 %v1287_v24  ;;  %v4769_v24 = vld [vmem:[%s5835_s10 + $0x98] sm:$0xff] }
 0x5b3   :  { %1645 = vmatpush.msrb.mxu1 %v4415_v6  ;;  %1368 = vmatpush.msrb.mxu3 %v1300_v28  ;;  %v4775_v28 = vld [vmem:[%s5835_s10 + $0x80] sm:$0xff] }
 0x5b4   :  { %2924 = vtanh.f32 %v1222_v22  ;;  %v4592_v22 = vld [vmem:[%s5835_s10 + $0x100] sm:$0xff]  ;;  %1353 = vmatpush.msrb.mxu0 %v1284_v47  ;;  %v4787_v47 = vld [vmem:[%s5835_s10 + $0x68] sm:$0xff] }
 0x5b5   :  { %1646 = vmatpush.msrb.mxu1 %v4430_v49  ;;  %1369 = vmatpush.msrb.mxu3 %v1297_v31  ;;  %v4792_v31 = vld [vmem:[%s5835_s10 + $0x50] sm:$0xff] }
 0x5b7   :  { %1647 = vmatpush.msrb.mxu1 %v4453_v44 }
 0x5b9   :  { %1648 = vmatpush.msrb.mxu1 %v4464_v48 }
 0x5ba   :  { %v2925_v27 = vpop.eup %2924 }
 0x5bb   :  { %v1225_v30 = vmul.f32 %v2925_v27, %v1224_v35  ;;  %1649 = vmatpush.msrb.mxu1 %v4486_v16  ;;  %v4603_v35 = vld [vmem:[%s5835_s10 + $0x18] sm:$0xff] }
 0x5bc   :  { %5974 = vst [vmem:[#allocation11_spill] sm:$0xff] %v4603_v35  ;;  %v1409_v27 = vld [vmem:[%s5834_s8 + $0xb8] sm:$0xff] }
 0x5bd   :  { %v1227_v12 = vadd.f32 %v1226_v32, %v1225_v30  ;;  %1650 = vmatpush.msrb.mxu1 %v4512_v39  ;;  %v1294_v30 = vld [vmem:[%s5836_s9 + $0x58] sm:$0xff]  ;;  %v4618_v32 = vld [vmem:[%s5835_s10] sm:$0xff]  ;;  %1524 = vmatpush.msra.mxu0 %v1409_v27 }
 0x5be   :  { %5975 = vst [vmem:[#allocation8_spill] sm:$0xff] %v4618_v32  ;;  %1370 = vmatpush.msrb.mxu3 %v1294_v30  ;;  %v4809_v27 = vld [vmem:[%s5835_s10 + $0x38] sm:$0xff]  ;;  %v4816_v30 = vld [vmem:[%s5835_s10 + $0x20] sm:$0xff] }
 0x5bf   :  { %1264 = vmatmul.f32.vlgmr.msrb.gmra.mxu2 %v1227_v12  ;;  %1651 = vmatpush.msrb.mxu1 %v4535_v0  ;;  %v1406_v12 = vld [vmem:[%s5834_s8 + $0xa0] sm:$0xff]  ;;  %5977 = vst [vmem:[#allocation5_spill] sm:$0xff] %v4809_v27 }
 0x5c0   :  { %1681 = vmatpush.msrb.mxu2 %v4459_v45  ;;  %1525 = vmatpush.msra.mxu0 %v1406_v12  ;;  %5978 = vst [vmem:[#allocation12_spill] sm:$0xff] %v4816_v30  ;;  %v4822_v12 = vld [vmem:[%s5835_s10 + $0x8] sm:$0xff] }
 0x5c1   :  { %1652 = vmatpush.msrb.mxu1 %v4547_v7  ;;  %1371 = vmatpush.msrb.mxu3 %v1291_v36  ;;  %5979 = vst [vmem:[#allocation9_spill] sm:$0xff] %v4822_v12  ;;  %v4828_v36 = vld [vmem:[%s5835_s10 + $0x40] sm:$0xff] }
 0x5c2   :  { %1682 = vmatpush.msrb.mxu2 %v4472_v55  ;;  %1526 = vmatpush.msra.mxu0 %v1403_v21  ;;  %v4833_v21 = vld [vmem:[%s5835_s10 + $0x28] sm:$0xff] }
 0x5c3   :  { %1653 = vmatpush.msrb.mxu1 %v4562_v10  ;;  %1372 = vmatpush.msrb.mxu3 %v1288_v52  ;;  %5980 = vst [vmem:[#allocation6_spill] sm:$0xff] %v4833_v21  ;;  %v4841_v52 = vld [vmem:[%s5835_s10 + $0x10] sm:$0xff] }
 0x5c4   :  { %1683 = vmatpush.msrb.mxu2 %v4495_v53  ;;  %1527 = vmatpush.msra.mxu0 %v1400_v38  ;;  %5981 = vst [vmem:[#allocation13_spill] sm:$0xff] %v4841_v52 }
 0x5c5   :  { %1654 = vmatpush.msrb.mxu1 %v4580_v13 }
 0x5c6   :  { %1684 = vmatpush.msrb.mxu2 %v4524_v54  ;;  %1528 = vmatpush.msra.mxu0 %v1397_v58  ;;  %v1408_v58 = vld [vmem:[%s5834_s8 + $0xb0] sm:$0xff] }
 0x5c7   :  { %2785 = vmatmul.msk.f32.vlgmr.msra.gmra.mxu2 %vm92_vm0, %v4448_v41  ;;  %1655 = vmatpush.msrb.mxu1 %v4603_v35 }
 0x5c8   :  { %1685 = vmatpush.msrb.mxu2 %v4567_v11  ;;  %1529 = vmatpush.msra.mxu0 %v1394_v4  ;;  %v1405_v4 = vld [vmem:[%s5834_s8 + $0x98] sm:$0xff] }
 0x5c9   :  { %1656 = vmatpush.msrb.mxu1 %v4618_v32 }
 0x5ca   :  { %1686 = vmatpush.msrb.mxu2 %v4592_v22  ;;  %1657 = vmatmul.f32.vlgmr.msrb.gmra.mxu1 %v5976_v1 }
 0x5cb   :  { %1661 = vmatpush.msra.mxu1 %v4627_v59  ;;  %1530 = vmatpush.msra.mxu0 %v1391_v29  ;;  %v1396_v29 = vld [vmem:[%s5834_s8 + $0x50] sm:$0xff] }
 0x5cc   :  { %1687 = vmatpush.msrb.mxu2 %v4635_v19 }
 0x5cd   :  { %1662 = vmatpush.msra.mxu1 %v4645_v18  ;;  %1531 = vmatpush.msra.mxu0 %v1388_v3  ;;  %v1393_v3 = vld [vmem:[%s5834_s8 + $0x38] sm:$0xff] }
 0x5ce   :  { %1688 = vmatpush.msrb.mxu2 %v4710_v43 }
 0x5cf   :  { %2786 = vmatmul.msk.f32.gmra.mxu2 %vm92_vm0, %v4529_v61  ;;  %1663 = vmatpush.msra.mxu1 %v4656_v20 }
 0x5d7   :  { %2787 = vmatmul.msk.f32.gmra.mxu2 %vm92_vm0, %v4597_v17 }
 0x5df   :  { %2788 = vmatmul.msk.f32.gmra.mxu2 %vm92_vm0, %v4651_v26 }
 0x5e7   :  { %2789 = vmatmul.msk.f32.gmra.mxu2 %vm92_vm0, %v4666_v34 }
 0x5ef   :  { %2790 = vmatmul.msk.f32.gmra.mxu2 %vm92_vm0, %v4673_v42 }
 0x5f7   :  { %2791 = vmatmul.msk.f32.gmra.mxu2 %vm92_vm0, %v4680_v33 }
 0x5ff   :  { %2792 = vmatmul.msk.f32.gmra.mxu2 %vm92_vm0, %v4716_v46 }
 0x642   :  { %v1265_v51 = vpop.f32.mrf.mxu2 }
 0x643   :  { %v4480_v2 = vadd.f32 %v2844_v40, %v1265_v51  ;;  %v4693_v40 = vld [vmem:[%s5835_s10 + $0x128] sm:$0xff]  ;;  %v1285_v51 = vld [vmem:[%s5836_s9 + $0x10] sm:$0xff] }
 0x644   :  { %1664 = vmatpush.msra.mxu1 %v4693_v40  ;;  %1373 = vmatpush.msrb.mxu3 %v1285_v51 }
 0x645   :  { %1268 = vst [vmem:[%s5837_s16] sm:$0xff] %v4480_v2  ;;  %v1269_v57 = vmul.f32 0.5, %v4480_v2 }
 0x646   :  { %1665 = vmatpush.msra.mxu1 %v4705_v62 }
 0x647   :  { %v1270_v56 = vmul.f32 1.442695, %v1269_v57  ;;  %v4725_v57 = vld [vmem:[%s5835_s10 + $0xf8] sm:$0xff] }
 0x648   :  { %1666 = vmatpush.msra.mxu1 %v4725_v57 }
 0x649   :  { %2926 = vpow2.f32 %v1270_v56  ;;  %v4741_v56 = vld [vmem:[%s5835_s10 + $0xb8] sm:$0xff] }
 0x64a   :  { %1689 = vmatpush.msrb.mxu2 %v4741_v56  ;;  %1667 = vmatpush.msra.mxu1 %v4736_v14 }
 0x64c   :  { %1668 = vmatpush.msra.mxu1 %v4751_v5  ;;  %1690 = vmatpush.msrb.mxu2 %v4762_v9 }
 0x64e   :  { %1669 = vmatpush.msra.mxu1 %v4757_v8 }
 0x64f   :  { %v2927_v50 = vpop.eup %2926 }
 0x650   :  { %v1277_v23 = vmul.f32 %v2927_v50, %v1275_v37  ;;  %1670 = vmatpush.msra.mxu1 %v4769_v24  ;;  %v4780_v37 = vld [vmem:[%s5835_s10 + $0x88] sm:$0xff]  ;;  %v4797_v50 = vld [vmem:[%s5835_s10 + $0x70] sm:$0xff] }
 0x651   :  { %1691 = vmatpush.msrb.mxu2 %v4780_v37 }
 0x652   :  { %1279 = vrot.lane.b32.xlu0 %v1277_v23, %s3107_s3  ;;  %1671 = vmatpush.msra.mxu1 %v4775_v28  ;;  %v4804_v23 = vld [vmem:[%s5835_s10 + $0x58] sm:$0xff] }
 0x653   :  { %1692 = vmatpush.msrb.mxu2 %v4797_v50 }
 0x654   :  { %1672 = vmatpush.msra.mxu1 %v4787_v47 }
 0x655   :  { %1693 = vmatpush.msrb.mxu2 %v4804_v23 }
 0x656   :  { %1673 = vmatpush.msra.mxu1 %v4792_v31 }
 0x657   :  { %1694 = vmatpush.msrb.mxu2 %v4828_v36 }
 0x658   :  { %1674 = vmatpush.msra.mxu1 %v4809_v27 }
 0x659   :  { %1695 = vmatpush.msrb.mxu2 %v4833_v21 }
 0x65a   :  { %1675 = vmatpush.msra.mxu1 %v4816_v30 }
 0x65b   :  { %1696 = vmatpush.msrb.mxu2 %v4841_v52 }
 0x65c   :  { %1676 = vmatpush.msra.mxu1 %v4822_v12  ;;  %1697 = vmatmul.f32.vlgmr.msrb.gmra.mxu2 %v5976_v1 }
 0x65d   :  { %1677 = vmatmul.f32.vlgmr.msra.gmra.mxu1 %v5976_v1  ;;  %1876 = vmatpush.msra.mxu2 %v4380_v15  ;;  %v1399_v1 = vld [vmem:[%s5834_s8 + $0x68] sm:$0xff] }
 0x65e   :  { %1798 = vmatpush.msrb.mxu1 %v4459_v45 }
 0x65f   :  { %1877 = vmatpush.msra.mxu2 %v4389_v63 }
 0x660   :  { %1799 = vmatpush.msrb.mxu1 %v4472_v55 }
 0x661   :  { %1878 = vmatpush.msra.mxu2 %v4394_v60 }
 0x662   :  { %1800 = vmatpush.msrb.mxu1 %v4495_v53 }
 0x663   :  { %1879 = vmatpush.msra.mxu2 %v4403_v25 }
 0x664   :  { %1801 = vmatpush.msrb.mxu1 %v4524_v54 }
 0x665   :  { %1880 = vmatpush.msra.mxu2 %v4415_v6 }
 0x666   :  { %1802 = vmatpush.msrb.mxu1 %v4567_v11 }
 0x667   :  { %1881 = vmatpush.msra.mxu2 %v4430_v49 }
 0x668   :  { %1803 = vmatpush.msrb.mxu1 %v4592_v22 }
 0x669   :  { %1882 = vmatpush.msra.mxu2 %v4453_v44 }
 0x66a   :  { %1804 = vmatpush.msrb.mxu1 %v4635_v19 }
 0x66b   :  { %1883 = vmatpush.msra.mxu2 %v4464_v48 }
 0x66c   :  { %1805 = vmatpush.msrb.mxu1 %v4710_v43 }
 0x66d   :  { %1884 = vmatpush.msra.mxu2 %v4486_v16 }
 0x66e   :  { %1806 = vmatpush.msrb.mxu1 %v4741_v56 }
 0x66f   :  { %1885 = vmatpush.msra.mxu2 %v4512_v39 }
 0x670   :  { %1807 = vmatpush.msrb.mxu1 %v4762_v9 }
 0x671   :  { %1886 = vmatpush.msra.mxu2 %v4535_v0 }
 0x672   :  { %1808 = vmatpush.msrb.mxu1 %v4780_v37 }
 0x673   :  { %1887 = vmatpush.msra.mxu2 %v4547_v7 }
 0x674   :  { %1809 = vmatpush.msrb.mxu1 %v4797_v50 }
 0x675   :  { %1888 = vmatpush.msra.mxu2 %v4562_v10 }
 0x676   :  { %1810 = vmatpush.msrb.mxu1 %v4804_v23 }
 0x677   :  { %1889 = vmatpush.msra.mxu2 %v4580_v13 }
 0x678   :  { %1811 = vmatpush.msrb.mxu1 %v4828_v36 }
 0x679   :  { %1890 = vmatpush.msra.mxu2 %v4603_v35 }
 0x67a   :  { %1812 = vmatpush.msrb.mxu1 %v4833_v21 }
 0x67b   :  { %1891 = vmatpush.msra.mxu2 %v4618_v32 }
 0x67c   :  { %1813 = vmatpush.msrb.mxu1 %v4841_v52 }
 0x67d   :  { %2014 = vmatpush.msrb.mxu2 %v4627_v59 }
 0x67e   :  { %1994 = vmatpush.msra.mxu1 %v4380_v15 }
 0x67f   :  { %2015 = vmatpush.msrb.mxu2 %v4645_v18 }
 0x680   :  { %1995 = vmatpush.msra.mxu1 %v4389_v63 }
 0x681   :  { %2016 = vmatpush.msrb.mxu2 %v4656_v20 }
 0x682   :  { %1996 = vmatpush.msra.mxu1 %v4394_v60 }
 0x683   :  { %2017 = vmatpush.msrb.mxu2 %v4693_v40 }
 0x684   :  { %1997 = vmatpush.msra.mxu1 %v4403_v25 }
 0x685   :  { %2018 = vmatpush.msrb.mxu2 %v4705_v62 }
 0x686   :  { %1998 = vmatpush.msra.mxu1 %v4415_v6 }
 0x687   :  { %2019 = vmatpush.msrb.mxu2 %v4725_v57 }
 0x688   :  { %1999 = vmatpush.msra.mxu1 %v4430_v49 }
 0x689   :  { %2020 = vmatpush.msrb.mxu2 %v4736_v14 }
 0x68a   :  { %2000 = vmatpush.msra.mxu1 %v4453_v44 }
 0x68b   :  { %2021 = vmatpush.msrb.mxu2 %v4751_v5 }
 0x68c   :  { %2001 = vmatpush.msra.mxu1 %v4464_v48 }
 0x68d   :  { %2022 = vmatpush.msrb.mxu2 %v4757_v8 }
 0x68e   :  { %2002 = vmatpush.msra.mxu1 %v4486_v16 }
 0x68f   :  { %2023 = vmatpush.msrb.mxu2 %v4769_v24 }
 0x690   :  { %2003 = vmatpush.msra.mxu1 %v4512_v39 }
 0x691   :  { %2024 = vmatpush.msrb.mxu2 %v4775_v28 }
 0x692   :  { %2004 = vmatpush.msra.mxu1 %v4535_v0 }
 0x693   :  { %2025 = vmatpush.msrb.mxu2 %v4787_v47 }
 0x694   :  { %2005 = vmatpush.msra.mxu1 %v4547_v7 }
 0x695   :  { %2026 = vmatpush.msrb.mxu2 %v4792_v31 }
 0x696   :  { %2006 = vmatpush.msra.mxu1 %v4562_v10 }
 0x697   :  { %2027 = vmatpush.msrb.mxu2 %v4809_v27 }
 0x698   :  { %2007 = vmatpush.msra.mxu1 %v4580_v13 }
 0x699   :  { %2028 = vmatpush.msrb.mxu2 %v4816_v30 }
 0x69a   :  { %2008 = vmatpush.msra.mxu1 %v4603_v35 }
 0x69b   :  { %2029 = vmatpush.msrb.mxu2 %v4822_v12 }
 0x69c   :  { %2009 = vmatpush.msra.mxu1 %v4618_v32 }
 0x6c4   :  { %v1280_v38 = vpop.permute.xlu0 %1279 }
 0x6c5   :  { %v1282_v51 = vadd.f32 %v1280_v38, %v4480_v2  ;;  %v1402_v2 = vld [vmem:[%s5834_s8 + $0x80] sm:$0xff] }
 0x6c6   :  { %v1390_v38 = vld [vmem:[%s5834_s8 + $0x20] sm:$0xff] }
 0x6c7   :  { %2782 = vmatmul.msk.f32.vlgmr.msra.gmra.mxu3 %vm92_vm0, %v1282_v51  ;;  %2783 = vmatmul.msk.f32.vlgmr.msrb.gmra.mxu0 %vm92_vm0, %v1282_v51 }
 0x6c8   :  { %1483 = vmatpush.msra.mxu3 %v1408_v58  ;;  %1778 = vmatpush.msrb.mxu0 %v4627_v59  ;;  %v1307_v58 = vld [vmem:[%s5839_s11] sm:$0x7] }
 0x6ca   :  { %1484 = vmatpush.msra.mxu3 %v1405_v4  ;;  %1779 = vmatpush.msrb.mxu0 %v4645_v18  ;;  %v1309_v4 = vperm.slane %v1307_v58, 0 }
 0x6cc   :  { %1485 = vmatpush.msra.mxu3 %v1402_v2  ;;  %1780 = vmatpush.msrb.mxu0 %v4656_v20 }
 0x6ce   :  { %1486 = vmatpush.msra.mxu3 %v1399_v1  ;;  %1781 = vmatpush.msrb.mxu0 %v4693_v40 }
 0x6cf   :  { %2784 = vmatmul.msk.f32.vlgmr.msrb.gmra.mxu3 %vm92_vm0, %v1282_v51  ;;  %2801 = vmatmul.msk.f32.vlgmr.msra.gmra.mxu0 %vm92_vm0, %v4448_v41  ;;  %v1387_v51 = vld [vmem:[%s5834_s8 + $0x8] sm:$0xff] }
 0x6d0   :  { %1487 = vmatpush.msra.mxu3 %v1396_v29  ;;  %1782 = vmatpush.msrb.mxu0 %v4705_v62 }
 0x6d2   :  { %1488 = vmatpush.msra.mxu3 %v1393_v3  ;;  %1783 = vmatpush.msrb.mxu0 %v4725_v57 }
 0x6d4   :  { %1489 = vmatpush.msra.mxu3 %v1390_v38  ;;  %1784 = vmatpush.msrb.mxu0 %v4736_v14  ;;  %v1658_v38 = vpop.f32.mrf.mxu1 }
 0x6d6   :  { %1490 = vmatpush.msra.mxu3 %v1387_v51  ;;  %1785 = vmatpush.msrb.mxu0 %v4751_v5 }
 0x6d7   :  { %2793 = vmatmul.msk.f32.vlgmr.msra.gmra.mxu3 %vm92_vm0, %v4448_v41  ;;  %2802 = vmatmul.msk.f32.gmra.mxu0 %vm92_vm0, %v4529_v61  ;;  %v1451_v41 = vpop.f32.mrf.mxu2 }
 0x6d8   :  { %1758 = vmatpush.msrb.mxu3 %v4380_v15  ;;  %1786 = vmatpush.msrb.mxu0 %v4757_v8 }
 0x6da   :  { %1759 = vmatpush.msrb.mxu3 %v4389_v63  ;;  %1787 = vmatpush.msrb.mxu0 %v4769_v24 }
 0x6dc   :  { %1760 = vmatpush.msrb.mxu3 %v4394_v60  ;;  %1788 = vmatpush.msrb.mxu0 %v4775_v28 }
 0x6de   :  { %1761 = vmatpush.msrb.mxu3 %v4403_v25  ;;  %1789 = vmatpush.msrb.mxu0 %v4787_v47 }
 0x6df   :  { %2794 = vmatmul.msk.f32.gmra.mxu3 %vm92_vm0, %v4529_v61  ;;  %2803 = vmatmul.msk.f32.gmra.mxu0 %vm92_vm0, %v4597_v17  ;;  %v5022_v61 = vpop.f32.mrf.mxu2 }
 0x6e0   :  { %1762 = vmatpush.msrb.mxu3 %v4415_v6  ;;  %1790 = vmatpush.msrb.mxu0 %v4792_v31  ;;  %5982 = vst [vmem:[#allocation10_spill] sm:$0xff] %v5022_v61 }
 0x6e2   :  { %1763 = vmatpush.msrb.mxu3 %v4430_v49  ;;  %1791 = vmatpush.msrb.mxu0 %v4809_v27 }
 0x6e4   :  { %1764 = vmatpush.msrb.mxu3 %v4453_v44  ;;  %1792 = vmatpush.msrb.mxu0 %v4816_v30 }
 0x6e6   :  { %1765 = vmatpush.msrb.mxu3 %v4464_v48  ;;  %1793 = vmatpush.msrb.mxu0 %v4822_v12 }
 0x6e7   :  { %2795 = vmatmul.msk.f32.gmra.mxu3 %vm92_vm0, %v4597_v17  ;;  %2804 = vmatmul.msk.f32.gmra.mxu0 %vm92_vm0, %v4651_v26  ;;  %v5036_v17 = vpop.f32.mrf.mxu2 }
 0x6e8   :  { %1766 = vmatpush.msrb.mxu3 %v4486_v16  ;;  %1916 = vmatpush.msra.mxu0 %v4459_v45  ;;  %5983 = vst [vmem:[#allocation7_spill] sm:$0xff] %v5036_v17 }
 0x6ea   :  { %1767 = vmatpush.msrb.mxu3 %v4512_v39  ;;  %1917 = vmatpush.msra.mxu0 %v4472_v55 }
 0x6ec   :  { %1768 = vmatpush.msrb.mxu3 %v4535_v0  ;;  %1918 = vmatpush.msra.mxu0 %v4495_v53 }
 0x6ee   :  { %1769 = vmatpush.msrb.mxu3 %v4547_v7  ;;  %1919 = vmatpush.msra.mxu0 %v4524_v54 }
 0x6ef   :  { %2796 = vmatmul.msk.f32.gmra.mxu3 %vm92_vm0, %v4651_v26  ;;  %2805 = vmatmul.msk.f32.gmra.mxu0 %vm92_vm0, %v4666_v34  ;;  %v1460_v26 = vpop.f32.mrf.mxu2 }
 0x6f0   :  { %1770 = vmatpush.msrb.mxu3 %v4562_v10  ;;  %1920 = vmatpush.msra.mxu0 %v4567_v11 }
 0x6f2   :  { %1771 = vmatpush.msrb.mxu3 %v4580_v13  ;;  %1921 = vmatpush.msra.mxu0 %v4592_v22 }
 0x6f4   :  { %1772 = vmatpush.msrb.mxu3 %v4603_v35  ;;  %1922 = vmatpush.msra.mxu0 %v4635_v19 }
 0x6f6   :  { %1773 = vmatpush.msrb.mxu3 %v4618_v32  ;;  %1923 = vmatpush.msra.mxu0 %v4710_v43 }
 0x6f7   :  { %2797 = vmatmul.msk.f32.gmra.mxu3 %vm92_vm0, %v4666_v34  ;;  %2806 = vmatmul.msk.f32.gmra.mxu0 %vm92_vm0, %v4673_v42  ;;  %v1463_v34 = vpop.f32.mrf.mxu2 }
 0x6f8   :  { %1896 = vmatpush.msra.mxu3 %v4627_v59  ;;  %1924 = vmatpush.msra.mxu0 %v4741_v56 }
 0x6fa   :  { %1897 = vmatpush.msra.mxu3 %v4645_v18  ;;  %1925 = vmatpush.msra.mxu0 %v4762_v9 }
 0x6fc   :  { %1898 = vmatpush.msra.mxu3 %v4656_v20  ;;  %1926 = vmatpush.msra.mxu0 %v4780_v37 }
 0x6fe   :  { %1899 = vmatpush.msra.mxu3 %v4693_v40  ;;  %1927 = vmatpush.msra.mxu0 %v4797_v50 }
 0x6ff   :  { %2798 = vmatmul.msk.f32.gmra.mxu3 %vm92_vm0, %v4673_v42  ;;  %2807 = vmatmul.msk.f32.gmra.mxu0 %vm92_vm0, %v4680_v33  ;;  %v1466_v42 = vpop.f32.mrf.mxu2 }
 0x700   :  { %1900 = vmatpush.msra.mxu3 %v4705_v62  ;;  %1928 = vmatpush.msra.mxu0 %v4804_v23 }
 0x702   :  { %1901 = vmatpush.msra.mxu3 %v4725_v57  ;;  %1929 = vmatpush.msra.mxu0 %v4828_v36 }
 0x704   :  { %1902 = vmatpush.msra.mxu3 %v4736_v14  ;;  %1930 = vmatpush.msra.mxu0 %v4833_v21 }
 0x706   :  { %1903 = vmatpush.msra.mxu3 %v4751_v5  ;;  %1931 = vmatpush.msra.mxu0 %v4841_v52 }
 0x707   :  { %2799 = vmatmul.msk.f32.gmra.mxu3 %vm92_vm0, %v4680_v33  ;;  %2808 = vmatmul.msk.f32.gmra.mxu0 %vm92_vm0, %v4716_v46  ;;  %v1469_v33 = vpop.f32.mrf.mxu2 }
 0x708   :  { %1904 = vmatpush.msra.mxu3 %v4757_v8 }
 0x70a   :  { %1905 = vmatpush.msra.mxu3 %v4769_v24 }
 0x70c   :  { %1906 = vmatpush.msra.mxu3 %v4775_v28 }
 0x70e   :  { %1907 = vmatpush.msra.mxu3 %v4787_v47 }
 0x70f   :  { %2800 = vmatmul.msk.f32.gmra.mxu3 %vm92_vm0, %v4716_v46  ;;  %v1472_v1 = vpop.f32.mrf.mxu2 }
 0x710   :  { %1908 = vmatpush.msra.mxu3 %v4792_v31 }
 0x712   :  { %1909 = vmatpush.msra.mxu3 %v4809_v27 }
 0x714   :  { %1910 = vmatpush.msra.mxu3 %v4816_v30 }
 0x716   :  { %1911 = vmatpush.msra.mxu3 %v4822_v12 }
 0x744   :  { %v1355_v46 = vpop.f32.mrf.mxu0 }
 0x74a   :  { %v1335_v2 = vpop.f32.mrf.mxu3 }
 0x74b   :  { %v5041_v29 = vadd.f32 %v1335_v2, %v1309_v4  ;;  %v1311_v2 = vperm.slane %v1307_v58, 2 }
 0x74c   :  { %v1533_v3 = vpop.f32.mrf.mxu0 }
 0x74d   :  { %5984 = vst [vmem:[#allocation14_spill] sm:$0xff] %v5041_v29  ;;  %v5044_v51 = vadd.f32 %v1472_v1, %v5041_v29  ;;  %v1638_v17 = vadd.f32 %v1451_v41, %v5041_v29  ;;  %v5048_v61 = vadd.f32 %v1460_v26, %v5041_v29  ;;  %v5051_v12 = vadd.f32 %v1463_v34, %v5041_v29 }
 0x74e   :  { %v5054_v32 = vadd.f32 %v1466_v42, %v5041_v29  ;;  %v5057_v52 = vadd.f32 %v1469_v33, %v5041_v29 }
 0x74f   :  { %5985 = vst [vmem:[#allocation18_spill] sm:$0xff] %v5044_v51  ;;  %v1701_v4 = vadd.f32 %v1658_v38, %v1638_v17  ;;  %v1310_v51 = vperm.slane %v1307_v58, 1 }
 0x750   :  { %5986 = vst [vmem:[#allocation23_spill] sm:$0xff] %v5048_v61  ;;  %v1678_v61 = vpop.f32.mrf.mxu1 }
 0x751   :  { %5987 = vst [vmem:[#allocation24_spill] sm:$0xff] %v5051_v12  ;;  %v2809_v30 = vmul.f32 -1.442695, %v1701_v4  ;;  %v5064_v12 = vadd.f32 %v1355_v46, %v1310_v51 }
 0x752   :  { %5988 = vst [vmem:[#allocation32_spill] sm:$0xff] %v5054_v32  ;;  %v1375_v35 = vpop.f32.mrf.mxu3 }
 0x753   :  { %5989 = vst [vmem:[#allocation28_spill] sm:$0xff] %v5057_v52  ;;  %2928 = vpow2.f32 %v2809_v30  ;;  %v5059_v1 = vadd.f32 %v1375_v35, %v1311_v2  ;;  %v1698_v52 = vpop.f32.mrf.mxu2 }
 0x754   :  { %v1536_v41 = vpop.f32.mrf.mxu0  ;;  %5992 = vst [vmem:[#allocation29_spill] sm:$0xff] %v5064_v12 }
 0x755   :  { %5990 = vst [vmem:[#allocation34_spill] sm:$0xff] %v5059_v1  ;;  %v5062_v26 = vadd.f32 %v1536_v41, %v5059_v1 }
 0x757   :  { %5991 = vst [vmem:[#allocation26_spill] sm:$0xff] %v5062_v26 }
 0x759   :  { %v2929_v34 = vpop.eup %2928 }
 0x75a   :  { %v1705_v42 = vadd.f32 1.0, %v2929_v34  ;;  %v1492_v32 = vpop.f32.mrf.mxu3 }
 0x75b   :  { %v1639_v33 = vadd.f32 %v1492_v32, %v5064_v12  ;;  %v5078_v32 = vld [vmem:[%s5838_s12] ss:$0 sm:$0xff] }
 0x75c   :  { %2930 = vrcp.f32 %v1705_v42  ;;  %v1539_v17 = vpop.f32.mrf.mxu0  ;;  %v1717_v34 = vand.u32 2147483648, %v1705_v42  ;;  %vm1711_vm5 = vweird.f32 %v1705_v42 }
 0x75d   :  { %v5068_v38 = vadd.f32 %v1539_v17, %v5059_v1  ;;  %v1721_v35 = vadd.f32 %v1678_v61, %v1639_v33  ;;  %v1715_v33 = vand.u32 2147483647, %v1705_v42 }
 0x75f   :  { %5993 = vst [vmem:[#allocation15_spill] sm:$0xff] %v5068_v38  ;;  %v2810_v30 = vmul.f32 -1.442695, %v1721_v35  ;;  %vm1716_vm7 = vcmp.eq.f32.partialorder %v1715_v33, 8.507059e+37 }
 0x761   :  { %2932 = vpow2.f32 %v2810_v30 }
 0x762   :  { %v2931_v58 = vpop.eup %2930  ;;  %v5070_v4 = vpop.f32.mrf.mxu3 }
 0x763   :  { %5994 = vst [vmem:[#allocation20_spill] sm:$0xff] %v5070_v4  ;;  %v1707_v2 = vmul.f32 %v2931_v58, %v1705_v42  ;;  %vm1712_vm0 = vweird.f32 %v2931_v58  ;;  %v1640_v42 = vadd.f32 %v1533_v3, %v5059_v1 }
 0x764   :  { %v1542_v41 = vpop.f32.mrf.mxu0  ;;  %vm1713_vm6 = vmor %vm1711_vm5, %vm1712_vm0 }
 0x765   :  { %v5073_v46 = vadd.f32 %v1542_v41, %v5059_v1  ;;  %v1708_v51 = vsub.f32 1.0, %v1707_v2  ;;  %v1718_v41 = vor.u32 1.1754944e-38, %v1717_v34  ;;  %v1741_v2 = vadd.f32 %v5078_v32, %v1698_v52 }
 0x767   :  { %5995 = vst [vmem:[#allocation30_spill] sm:$0xff] %v5073_v46  ;;  %v2933_v17 = vpop.eup %2932  ;;  %v1709_v61 = vmul.f32 %v2931_v58, %v1708_v51 }
 0x768   :  { %v1725_v35 = vadd.f32 1.0, %v2933_v17 }
 0x769   :  { %v1710_v30 = vadd.f32 %v2931_v58, %v1709_v61 }
 0x76a   :  { %2934 = vrcp.f32 %v1725_v35  ;;  %v1498_v38 = vpop.f32.mrf.mxu3  ;;  %vm1731_vm9 = vweird.f32 %v1725_v35 }
 0x76b   :  { %v5082_v46 = vadd.f32 %v1498_v38, %v5064_v12  ;;  %v1714_v26 = vsel %vm1713_vm6, %v2931_v58, %v1710_v30  ;;  %v1737_v38 = vand.u32 2147483648, %v1725_v35 }
 0x76c   :  { %v1719_v29 = vsel %vm1716_vm7, %v1718_v41, %v1714_v26  ;;  %v1545_v4 = vpop.f32.mrf.mxu0  ;;  %v1735_v26 = vand.u32 2147483647, %v1725_v35 }
 0x76d   :  { %5996 = vst [vmem:[#allocation16_spill] sm:$0xff] %v5082_v46  ;;  %v5085_v51 = vadd.f32 %v1545_v4, %v5059_v1  ;;  %v1742_v21 = vmul.f32 %v1741_v2, %v1719_v29  ;;  %v1738_v3 = vor.u32 1.1754944e-38, %v1737_v38  ;;  %v6015_v38 = vld [vmem:[#allocation14_spill] sm:$0xff] }
 0x76e   :  { %vm1736_vm11 = vcmp.eq.f32.partialorder %v1735_v26, 8.507059e+37 }
 0x76f   :  { %5997 = vst [vmem:[#allocation22_spill] sm:$0xff] %v5085_v51  ;;  %v1743_v27 = vadd.f32 %v1742_v21, %v1640_v42 }
 0x770   :  { %v2935_v17 = vpop.eup %2934 }
 0x771   :  { %v1727_v61 = vmul.f32 %v2935_v17, %v1725_v35  ;;  %vm1732_vm8 = vweird.f32 %v2935_v17  ;;  %2936 = vtanh.f32 %v1743_v27 }
 0x772   :  { %v1501_v13 = vpop.f32.mrf.mxu3  ;;  %vm1733_vm10 = vmor %vm1731_vm9, %vm1732_vm8 }
 0x773   :  { %v1728_v34 = vsub.f32 1.0, %v1727_v61  ;;  %v5089_v52 = vadd.f32 %v1501_v13, %v5064_v12 }
 0x774   :  { %v1548_v46 = vpop.f32.mrf.mxu0 }
 0x775   :  { %v1729_v58 = vmul.f32 %v2935_v17, %v1728_v34  ;;  %v5092_v33 = vadd.f32 %v1548_v46, %v5059_v1 }
 0x777   :  { %5998 = vst [vmem:[#allocation31_spill] sm:$0xff] %v5092_v33  ;;  %v1730_v29 = vadd.f32 %v2935_v17, %v1729_v58  ;;  %v2937_v2 = vpop.eup %2936  ;;  %v6016_v58 = vld [vmem:[#allocation10_spill] sm:$0xff] }
 0x778   :  { %v1755_v26 = vadd.f32 %v6016_v58, %v6015_v38 }
 0x779   :  { %v1734_v21 = vsel %vm1733_vm10, %v2935_v17, %v1730_v29 }
 0x77a   :  { %v1739_v4 = vsel %vm1736_vm11, %v1738_v3, %v1734_v21  ;;  %v1504_v30 = vpop.f32.mrf.mxu3 }
 0x77b   :  { %v1745_v41 = vsub.f32 1.0, %v1739_v4  ;;  %v5095_v13 = vadd.f32 %v1504_v30, %v5064_v12  ;;  %v1747_v34 = vmul.f32 0.0, %v1739_v4 }
 0x77c   :  { %v1551_v42 = vpop.f32.mrf.mxu0 }
 0x77d   :  { %5999 = vst [vmem:[#allocation17_spill] sm:$0xff] %v5095_v13  ;;  %v1746_v61 = vmul.f32 %v2937_v2, %v1745_v41  ;;  %v5098_v46 = vadd.f32 %v1551_v42, %v5059_v1 }
 0x77f   :  { %6000 = vst [vmem:[#allocation25_spill] sm:$0xff] %v5098_v46  ;;  %v5100_v27 = vadd.f32 %v1747_v34, %v1746_v61 }
 0x781   :  { %6001 = vst [vmem:[#allocation33_spill] sm:$0xff] %v5100_v27  ;;  %1774 = vmatmul.f32.vlgmr.msrb.gmra.mxu3 %v5100_v27  ;;  %1794 = vmatmul.f32.vlgmr.msrb.gmra.mxu0 %v5100_v27 }
 0x782   :  { %1814 = vmatmul.f32.vlgmr.msrb.gmra.mxu1 %v5100_v27  ;;  %v1507_v35 = vpop.f32.mrf.mxu3  ;;  %2034 = vmatpush.msrb.mxu3 %v4459_v45 }
 0x783   :  { %v5107_v17 = vadd.f32 %v1507_v35, %v5064_v12  ;;  %2112 = vmatpush.msrb.mxu0 %v4380_v15  ;;  %2132 = vmatpush.msrb.mxu1 %v4627_v59 }
 0x784   :  { %2035 = vmatpush.msrb.mxu3 %v4472_v55  ;;  %v6011_v55 = vld [vmem:[#allocation9_spill] sm:$0xff] }
 0x785   :  { %6002 = vst [vmem:[#allocation27_spill] sm:$0xff] %v5107_v17  ;;  %2113 = vmatpush.msrb.mxu0 %v4389_v63  ;;  %2133 = vmatpush.msrb.mxu1 %v4645_v18  ;;  %v6004_v63 = vld [vmem:[#allocation21_spill] sm:$0xff] }
 0x786   :  { %2036 = vmatpush.msrb.mxu3 %v4495_v53 }
 0x787   :  { %2114 = vmatpush.msrb.mxu0 %v4394_v60  ;;  %2134 = vmatpush.msrb.mxu1 %v4656_v20  ;;  %v6005_v60 = vld [vmem:[#allocation5_spill] sm:$0xff] }
 0x788   :  { %2037 = vmatpush.msrb.mxu3 %v4524_v54 }
 0x789   :  { %2115 = vmatpush.msrb.mxu0 %v4403_v25  ;;  %2135 = vmatpush.msrb.mxu1 %v4693_v40  ;;  %v6006_v25 = vld [vmem:[#allocation6_spill] sm:$0xff] }
 0x78a   :  { %v1510_v15 = vpop.f32.mrf.mxu3  ;;  %2038 = vmatpush.msrb.mxu3 %v4567_v11 }
 0x78b   :  { %v5122_v45 = vadd.f32 %v1510_v15, %v5064_v12  ;;  %2116 = vmatpush.msrb.mxu0 %v4415_v6  ;;  %2136 = vmatpush.msrb.mxu1 %v4705_v62  ;;  %v6007_v6 = vld [vmem:[#allocation11_spill] sm:$0xff] }
 0x78c   :  { %2039 = vmatpush.msrb.mxu3 %v4592_v22 }
 0x78d   :  { %6003 = vst [vmem:[#allocation19_spill] sm:$0xff] %v5122_v45  ;;  %2117 = vmatpush.msrb.mxu0 %v4430_v49  ;;  %2137 = vmatpush.msrb.mxu1 %v4725_v57  ;;  %v6008_v49 = vld [vmem:[#allocation12_spill] sm:$0xff] }
 0x78e   :  { %2040 = vmatpush.msrb.mxu3 %v4635_v19 }
 0x78f   :  { %2118 = vmatpush.msrb.mxu0 %v4453_v44  ;;  %2138 = vmatpush.msrb.mxu1 %v4736_v14  ;;  %v6009_v44 = vld [vmem:[#allocation13_spill] sm:$0xff] }
 0x790   :  { %2041 = vmatpush.msrb.mxu3 %v4710_v43 }
 0x791   :  { %2119 = vmatpush.msrb.mxu0 %v4464_v48  ;;  %2139 = vmatpush.msrb.mxu1 %v4751_v5  ;;  %v6010_v48 = vld [vmem:[#allocation8_spill] sm:$0xff] }
 0x792   :  { %2042 = vmatpush.msrb.mxu3 %v4741_v56  ;;  %v5161_v53 = vpop.f32.mrf.mxu3 }
 0x793   :  { %2120 = vmatpush.msrb.mxu0 %v4486_v16  ;;  %2140 = vmatpush.msrb.mxu1 %v4757_v8  ;;  %v5159_v16 = vpop.f32.mrf.mxu0  ;;  %6013 = vst [vmem:[#allocation21_spill] sm:$0xff] %v5161_v53 }
 0x794   :  { %2043 = vmatpush.msrb.mxu3 %v4762_v9  ;;  %6012 = vst [vmem:[#allocation35_spill] sm:$0xff] %v5159_v16  ;;  %v6030_v16 = vld [vmem:[#allocation23_spill] sm:$0xff] }
 0x795   :  { %2121 = vmatpush.msrb.mxu0 %v4512_v39  ;;  %2141 = vmatpush.msrb.mxu1 %v4769_v24  ;;  %v6014_v39 = vld [vmem:[#allocation20_spill] sm:$0xff] }
 0x796   :  { %2044 = vmatpush.msrb.mxu3 %v4780_v37  ;;  %v1756_v54 = vadd.f32 %v6014_v39, %v5064_v12 }
 0x797   :  { %2122 = vmatpush.msrb.mxu0 %v4535_v0  ;;  %2142 = vmatpush.msrb.mxu1 %v4775_v28 }
 0x798   :  { %2045 = vmatpush.msrb.mxu3 %v4797_v50 }
 0x799   :  { %2123 = vmatpush.msrb.mxu0 %v4547_v7  ;;  %2143 = vmatpush.msrb.mxu1 %v4787_v47 }
 0x79a   :  { %2046 = vmatpush.msrb.mxu3 %v4804_v23 }
 0x79b   :  { %2124 = vmatpush.msrb.mxu0 %v4562_v10  ;;  %2144 = vmatpush.msrb.mxu1 %v4792_v31 }
 0x79c   :  { %2047 = vmatpush.msrb.mxu3 %v4828_v36 }
 0x79d   :  { %2125 = vmatpush.msrb.mxu0 %v6004_v63  ;;  %2145 = vmatpush.msrb.mxu1 %v6005_v60 }
 0x79e   :  { %2048 = vmatpush.msrb.mxu3 %v6006_v25 }
 0x79f   :  { %2126 = vmatpush.msrb.mxu0 %v6007_v6  ;;  %2146 = vmatpush.msrb.mxu1 %v6008_v49 }
 0x7a0   :  { %2049 = vmatpush.msrb.mxu3 %v6009_v44 }
 0x7a1   :  { %2127 = vmatpush.msrb.mxu0 %v6010_v48  ;;  %2147 = vmatpush.msrb.mxu1 %v6011_v55 }
 0x7fe   :  { %v1795_v0 = vpop.f32.mrf.mxu0 }
 0x7ff   :  { %v1838_v7 = vadd.f32 %v1795_v0, %v1756_v54  ;;  %v1815_v0 = vpop.f32.mrf.mxu1 }
 0x800   :  { %v1858_v58 = vadd.f32 %v5078_v32, %v1815_v0 }
 0x801   :  { %v2812_v10 = vmul.f32 -1.442695, %v1838_v7 }
 0x803   :  { %2938 = vpow2.f32 %v2812_v10 }
 0x804   :  { %v1775_v29 = vpop.f32.mrf.mxu3 }
 0x805   :  { %v1818_v3 = vadd.f32 %v1775_v29, %v1755_v26 }
 0x807   :  { %v2811_v21 = vmul.f32 -1.442695, %v1818_v3 }
 0x809   :  { %v2939_v4 = vpop.eup %2938  ;;  %2940 = vpow2.f32 %v2811_v21 }
 0x80a   :  { %v1842_v30 = vadd.f32 1.0, %v2939_v4 }
 0x80c   :  { %2942 = vrcp.f32 %v1842_v30  ;;  %v1854_v21 = vand.u32 2147483648, %v1842_v30  ;;  %vm1848_vm2 = vweird.f32 %v1842_v30 }
 0x80f   :  { %v2941_v41 = vpop.eup %2940 }
 0x810   :  { %v1822_v2 = vadd.f32 1.0, %v2941_v41  ;;  %v1852_v41 = vand.u32 2147483647, %v1842_v30 }
 0x812   :  { %2944 = vrcp.f32 %v1822_v2  ;;  %v2943_v42 = vpop.eup %2942  ;;  %v1834_v6 = vand.u32 2147483648, %v1822_v2  ;;  %v1832_v39 = vand.u32 2147483647, %v1822_v2  ;;  %vm1828_vm13 = vweird.f32 %v1822_v2 }
 0x813   :  { %v1844_v61 = vmul.f32 %v2943_v42, %v1842_v30  ;;  %vm1849_vm1 = vweird.f32 %v2943_v42  ;;  %vm1853_vm4 = vcmp.eq.f32.partialorder %v1852_v41, 8.507059e+37  ;;  %v5178_v30 = vld [vmem:[%s5835_s10 + $0x178] sm:$0xff] }
 0x814   :  { %v1835_v10 = vor.u32 1.1754944e-38, %v1834_v6  ;;  %vm1833_vm15 = vcmp.eq.f32.partialorder %v1832_v39, 8.507059e+37  ;;  %vm1850_vm3 = vmor %vm1848_vm2, %vm1849_vm1 }
 0x815   :  { %v1845_v15 = vsub.f32 1.0, %v1844_v61  ;;  %v6017_v61 = vld [vmem:[#allocation26_spill] sm:$0xff] }
 0x817   :  { %v1846_v54 = vmul.f32 %v2943_v42, %v1845_v15 }
 0x818   :  { %v2945_v34 = vpop.eup %2944 }
 0x819   :  { %v1824_v35 = vmul.f32 %v2945_v34, %v1822_v2  ;;  %vm1829_vm12 = vweird.f32 %v2945_v34  ;;  %v1847_v29 = vadd.f32 %v2943_v42, %v1846_v54  ;;  %v5191_v54 = vld [vmem:[%s5835_s10 + $0x160] sm:$0xff] }
 0x81a   :  { %vm1830_vm14 = vmor %vm1828_vm13, %vm1829_vm12 }
 0x81b   :  { %v1825_v63 = vsub.f32 1.0, %v1824_v35  ;;  %v1851_v15 = vsel %vm1850_vm3, %v2943_v42, %v1847_v29  ;;  %v5184_v42 = vld [vmem:[%s5835_s10 + $0x168] sm:$0xff] }
 0x81d   :  { %v1826_v48 = vmul.f32 %v2945_v34, %v1825_v63  ;;  %v1855_v63 = vor.u32 1.1754944e-38, %v1854_v21 }
 0x81f   :  { %v1827_v7 = vadd.f32 %v2945_v34, %v1826_v48  ;;  %v1856_v2 = vsel %vm1853_vm4, %v1855_v63, %v1851_v15 }
 0x820   :  { %v1862_v6 = vsub.f32 1.0, %v1856_v2 }
 0x821   :  { %v1831_v26 = vsel %vm1830_vm14, %v2945_v34, %v1827_v7  ;;  %v1864_v34 = vmul.f32 %v1856_v2, %v5100_v27  ;;  %v5197_v7 = vld [vmem:[%s5835_s10 + $0x150] sm:$0xff] }
 0x822   :  { %v1836_v3 = vsel %vm1833_vm15, %v1835_v10, %v1831_v26  ;;  %v5210_v10 = vld [vmem:[%s5835_s10 + $0x138] sm:$0xff]  ;;  %v5239_v26 = vld [vmem:[%s5835_s10 + $0xf0] sm:$0xff] }
 0x823   :  { %v1859_v4 = vmul.f32 %v1858_v58, %v1836_v3  ;;  %v5223_v58 = vld [vmem:[%s5835_s10 + $0x120] sm:$0xff] }
 0x825   :  { %v1860_v35 = vadd.f32 %v1859_v4, %v6017_v61 }
 0x827   :  { %2946 = vtanh.f32 %v1860_v35 }
 0x82d   :  { %v2947_v48 = vpop.eup %2946 }
 0x82e   :  { %v1863_v0 = vmul.f32 %v2947_v48, %v1862_v6 }
 0x830   :  { %v5170_v39 = vadd.f32 %v1864_v34, %v1863_v0 }
 0x832   :  { %6018 = vst [vmem:[#allocation5_spill] sm:$0xff] %v5170_v39  ;;  %1892 = vmatmul.f32.vlgmr.msra.gmra.mxu2 %v5170_v39  ;;  %1912 = vmatmul.f32.vlgmr.msra.gmra.mxu3 %v5170_v39 }
 0x833   :  { %1932 = vmatmul.f32.vlgmr.msra.gmra.mxu0 %v5170_v39  ;;  %2152 = vmatpush.msra.mxu2 %v5178_v30 }
 0x834   :  { %2230 = vmatpush.msra.mxu3 %v5184_v42  ;;  %2250 = vmatpush.msra.mxu0 %v4627_v59  ;;  %v5204_v59 = vld [vmem:[%s5835_s10 + $0x148] sm:$0xff] }
 0x835   :  { %2153 = vmatpush.msra.mxu2 %v5191_v54 }
 0x836   :  { %2231 = vmatpush.msra.mxu3 %v5197_v7  ;;  %2251 = vmatpush.msra.mxu0 %v4645_v18  ;;  %v5217_v18 = vld [vmem:[%s5835_s10 + $0x130] sm:$0xff] }
 0x837   :  { %2154 = vmatpush.msra.mxu2 %v5204_v59 }
 0x838   :  { %2232 = vmatpush.msra.mxu3 %v5210_v10  ;;  %2252 = vmatpush.msra.mxu0 %v4656_v20  ;;  %v5231_v20 = vld [vmem:[%s5835_s10 + $0x108] sm:$0xff] }
 0x839   :  { %2155 = vmatpush.msra.mxu2 %v5217_v18 }
 0x83a   :  { %2233 = vmatpush.msra.mxu3 %v5223_v58  ;;  %2253 = vmatpush.msra.mxu0 %v4693_v40  ;;  %v5271_v40 = vld [vmem:[%s5835_s10 + $0x90] sm:$0xff] }
 0x83b   :  { %2156 = vmatpush.msra.mxu2 %v4567_v11  ;;  %v5247_v11 = vld [vmem:[%s5835_s10 + $0xd8] sm:$0xff] }
 0x83c   :  { %2234 = vmatpush.msra.mxu3 %v5231_v20  ;;  %2254 = vmatpush.msra.mxu0 %v4705_v62  ;;  %v5279_v62 = vld [vmem:[%s5835_s10 + $0x78] sm:$0xff] }
 0x83d   :  { %2157 = vmatpush.msra.mxu2 %v4592_v22  ;;  %v5255_v22 = vld [vmem:[%s5835_s10 + $0xc0] sm:$0xff] }
 0x83e   :  { %2235 = vmatpush.msra.mxu3 %v5239_v26  ;;  %2255 = vmatpush.msra.mxu0 %v4725_v57  ;;  %v5295_v57 = vld [vmem:[%s5835_s10 + $0x48] sm:$0xff] }
 0x83f   :  { %2158 = vmatpush.msra.mxu2 %v4635_v19  ;;  %v5263_v19 = vld [vmem:[%s5835_s10 + $0xa8] sm:$0xff] }
 0x840   :  { %2236 = vmatpush.msra.mxu3 %v5247_v11  ;;  %2256 = vmatpush.msra.mxu0 %v4736_v14  ;;  %v5303_v14 = vld [vmem:[%s5835_s10 + $0x30] sm:$0xff] }
 0x841   :  { %2159 = vmatpush.msra.mxu2 %v4710_v43  ;;  %v5287_v43 = vld [vmem:[%s5835_s10 + $0x60] sm:$0xff]  ;;  %6019 = vst [vmem:[#allocation6_spill] sm:$0xff] %v5303_v14 }
 0x842   :  { %2237 = vmatpush.msra.mxu3 %v5255_v22  ;;  %2257 = vmatpush.msra.mxu0 %v4751_v5  ;;  %v5319_v5 = vld [vmem:[%s5835_s10] sm:$0xff] }
 0x843   :  { %2160 = vmatpush.msra.mxu2 %v4741_v56  ;;  %v5311_v56 = vld [vmem:[%s5835_s10 + $0x18] sm:$0xff]  ;;  %6021 = vst [vmem:[#allocation12_spill] sm:$0xff] %v5319_v5 }
 0x844   :  { %2238 = vmatpush.msra.mxu3 %v5263_v19  ;;  %2258 = vmatpush.msra.mxu0 %v4757_v8  ;;  %6020 = vst [vmem:[#allocation11_spill] sm:$0xff] %v5311_v56  ;;  %v6022_v8 = vld [vmem:[#allocation7_spill] sm:$0xff] }
 0x845   :  { %2161 = vmatpush.msra.mxu2 %v4762_v9  ;;  %v1873_v9 = vadd.f32 %v6022_v8, %v6015_v38 }
 0x846   :  { %2239 = vmatpush.msra.mxu3 %v5271_v40  ;;  %2259 = vmatpush.msra.mxu0 %v4769_v24 }
 0x847   :  { %2162 = vmatpush.msra.mxu2 %v4780_v37 }
 0x848   :  { %2240 = vmatpush.msra.mxu3 %v5279_v62  ;;  %2260 = vmatpush.msra.mxu0 %v4775_v28 }
 0x849   :  { %2163 = vmatpush.msra.mxu2 %v4797_v50 }
 0x84a   :  { %2241 = vmatpush.msra.mxu3 %v5287_v43  ;;  %2261 = vmatpush.msra.mxu0 %v4787_v47  ;;  %v6023_v47 = vld [vmem:[#allocation16_spill] sm:$0xff] }
 0x84b   :  { %2164 = vmatpush.msra.mxu2 %v4804_v23 }
 0x84c   :  { %2242 = vmatpush.msra.mxu3 %v5295_v57  ;;  %2262 = vmatpush.msra.mxu0 %v4792_v31 }
 0x84d   :  { %2165 = vmatpush.msra.mxu2 %v4828_v36 }
 0x84e   :  { %2243 = vmatpush.msra.mxu3 %v5303_v14  ;;  %2263 = vmatpush.msra.mxu0 %v6005_v60 }
 0x84f   :  { %2166 = vmatpush.msra.mxu2 %v6006_v25 }
 0x850   :  { %2244 = vmatpush.msra.mxu3 %v5311_v56  ;;  %2264 = vmatpush.msra.mxu0 %v6008_v49 }
 0x851   :  { %2167 = vmatpush.msra.mxu2 %v6009_v44 }
 0x852   :  { %2245 = vmatpush.msra.mxu3 %v5319_v5  ;;  %2265 = vmatpush.msra.mxu0 %v6011_v55 }
 0x8b0   :  { %v1933_v35 = vpop.f32.mrf.mxu0 }
 0x8b1   :  { %v1976_v6 = vadd.f32 %v5078_v32, %v1933_v35  ;;  %v5402_v35 = vld [vmem:[%s5835_s10 + $0xe0] sm:$0xff] }
 0x8b5   :  { %v1893_v24 = vpop.f32.mrf.mxu2  ;;  %v1913_v28 = vpop.f32.mrf.mxu3 }
 0x8b6   :  { %v1936_v37 = vadd.f32 %v1893_v24, %v1873_v9  ;;  %v1956_v31 = vadd.f32 %v1913_v28, %v6023_v47  ;;  %v6024_v28 = vld [vmem:[#allocation15_spill] sm:$0xff] }
 0x8b8   :  { %v2813_v50 = vmul.f32 -1.442695, %v1936_v37  ;;  %v2814_v23 = vmul.f32 -1.442695, %v1956_v31 }
 0x8ba   :  { %2948 = vpow2.f32 %v2813_v50 }
 0x8bb   :  { %2950 = vpow2.f32 %v2814_v23 }
 0x8c0   :  { %v2949_v36 = vpop.eup %2948 }
 0x8c1   :  { %v2951_v60 = vpop.eup %2950  ;;  %v1940_v25 = vadd.f32 1.0, %v2949_v36 }
 0x8c2   :  { %v1960_v49 = vadd.f32 1.0, %v2951_v60 }
 0x8c3   :  { %2952 = vrcp.f32 %v1940_v25  ;;  %v1952_v21 = vand.u32 2147483648, %v1940_v25  ;;  %v1950_v61 = vand.u32 2147483647, %v1940_v25  ;;  %vm1946_vm5 = vweird.f32 %v1940_v25 }
 0x8c4   :  { %2954 = vrcp.f32 %v1960_v49  ;;  %v1972_v9 = vand.u32 2147483648, %v1960_v49  ;;  %vm1966_vm9 = vweird.f32 %v1960_v49  ;;  %v1970_v24 = vand.u32 2147483647, %v1960_v49 }
 0x8c5   :  { %v1953_v2 = vor.u32 1.1754944e-38, %v1952_v21  ;;  %vm1951_vm7 = vcmp.eq.f32.partialorder %v1950_v61, 8.507059e+37  ;;  %v5376_v21 = vld [vmem:[%s5835_s10 + $0x110] sm:$0xff]  ;;  %v5395_v61 = vld [vmem:[%s5835_s10 + $0xe8] sm:$0xff] }
 0x8c6   :  { %v1973_v31 = vor.u32 1.1754944e-38, %v1972_v9  ;;  %vm1971_vm11 = vcmp.eq.f32.partialorder %v1970_v24, 8.507059e+37  ;;  %v5460_v9 = vld [vmem:[%s5835_s10 + $0x70] sm:$0xff]  ;;  %v5467_v24 = vld [vmem:[%s5835_s10 + $0x68] sm:$0xff] }
 0x8c9   :  { %v2953_v44 = vpop.eup %2952 }
 0x8ca   :  { %v2955_v55 = vpop.eup %2954  ;;  %v1942_v29 = vmul.f32 %v2953_v44, %v1940_v25  ;;  %vm1947_vm0 = vweird.f32 %v2953_v44 }
 0x8cb   :  { %v1962_v3 = vmul.f32 %v2955_v55, %v1960_v49  ;;  %vm1948_vm6 = vmor %vm1946_vm5, %vm1947_vm0  ;;  %vm1967_vm8 = vweird.f32 %v2955_v55  ;;  %v5339_v49 = vld [vmem:[%s5835_s10 + $0x170] sm:$0xff] }
 0x8cc   :  { %v1943_v38 = vsub.f32 1.0, %v1942_v29  ;;  %vm1968_vm10 = vmor %vm1966_vm9, %vm1967_vm8  ;;  %v5355_v29 = vld [vmem:[%s5835_s10 + $0x140] sm:$0xff] }
 0x8cd   :  { %v1963_v4 = vsub.f32 1.0, %v1962_v3  ;;  %v5363_v3 = vld [vmem:[%s5835_s10 + $0x128] sm:$0xff] }
 0x8ce   :  { %v1944_v41 = vmul.f32 %v2953_v44, %v1943_v38  ;;  %v5369_v38 = vld [vmem:[%s5835_s10 + $0x118] sm:$0xff] }
 0x8cf   :  { %v1964_v15 = vmul.f32 %v2955_v55, %v1963_v4  ;;  %v5382_v4 = vld [vmem:[%s5835_s10 + $0x100] sm:$0xff] }
 0x8d0   :  { %v1945_v63 = vadd.f32 %v2953_v44, %v1944_v41  ;;  %v5389_v41 = vld [vmem:[%s5835_s10 + $0xf8] sm:$0xff] }
 0x8d1   :  { %v1965_v34 = vadd.f32 %v2955_v55, %v1964_v15  ;;  %v5408_v15 = vld [vmem:[%s5835_s10 + $0xd0] sm:$0xff] }
 0x8d2   :  { %v1949_v48 = vsel %vm1948_vm6, %v2953_v44, %v1945_v63  ;;  %v5415_v63 = vld [vmem:[%s5835_s10 + $0xc8] sm:$0xff] }
 0x8d3   :  { %v1954_v0 = vsel %vm1951_vm7, %v1953_v2, %v1949_v48  ;;  %v1969_v47 = vsel %vm1968_vm10, %v2955_v55, %v1965_v34  ;;  %v5347_v55 = vld [vmem:[%s5835_s10 + $0x158] sm:$0xff]  ;;  %v5434_v48 = vld [vmem:[%s5835_s10 + $0xa0] sm:$0xff]  ;;  %v5447_v34 = vld [vmem:[%s5835_s10 + $0x88] sm:$0xff] }
 0x8d4   :  { %v1977_v8 = vmul.f32 %v1976_v6, %v1954_v0  ;;  %v1974_v50 = vsel %vm1971_vm11, %v1973_v31, %v1969_v47  ;;  %v5421_v2 = vld [vmem:[%s5835_s10 + $0xb8] sm:$0xff]  ;;  %v5428_v6 = vld [vmem:[%s5835_s10 + $0xb0] sm:$0xff]  ;;  %v5486_v47 = vld [vmem:[%s5835_s10 + $0x40] sm:$0xff] }
 0x8d5   :  { %v1980_v23 = vsub.f32 1.0, %v1974_v50  ;;  %v1982_v25 = vmul.f32 %v1974_v50, %v5170_v39  ;;  %v5441_v0 = vld [vmem:[%s5835_s10 + $0x98] sm:$0xff]  ;;  %v5499_v50 = vld [vmem:[%s5835_s10 + $0x28] sm:$0xff] }
 0x8d6   :  { %v1978_v37 = vadd.f32 %v1977_v8, %v6024_v28  ;;  %v5454_v8 = vld [vmem:[%s5835_s10 + $0x80] sm:$0xff]  ;;  %v5473_v28 = vld [vmem:[%s5835_s10 + $0x58] sm:$0xff]  ;;  %6026 = vst [vmem:[#allocation8_spill] sm:$0xff] %v5499_v50 }
 0x8d7   :  { %v5493_v31 = vld [vmem:[%s5835_s10 + $0x38] sm:$0xff] }
 0x8d8   :  { %2956 = vtanh.f32 %v1978_v37  ;;  %v5480_v37 = vld [vmem:[%s5835_s10 + $0x50] sm:$0xff]  ;;  %6025 = vst [vmem:[#allocation13_spill] sm:$0xff] %v5493_v31 }
 0x8de   :  { %v2957_v36 = vpop.eup %2956 }
 0x8df   :  { %v1981_v60 = vmul.f32 %v2957_v36, %v1980_v23  ;;  %v5506_v23 = vld [vmem:[%s5835_s10 + $0x20] sm:$0xff]  ;;  %v5512_v36 = vld [vmem:[%s5835_s10 + $0x10] sm:$0xff] }
 0x8e0   :  { %6027 = vst [vmem:[#allocation9_spill] sm:$0xff] %v5506_v23 }
 0x8e1   :  { %v5329_v44 = vadd.f32 %v1982_v25, %v1981_v60  ;;  %6028 = vst [vmem:[#allocation20_spill] sm:$0xff] %v5512_v36  ;;  %v5519_v60 = vld [vmem:[%s5835_s10 + $0x8] sm:$0xff] }
 0x8e2   :  { %6029 = vst [vmem:[#allocation14_spill] sm:$0xff] %v5519_v60 }
 0x8e3   :  { %2010 = vmatmul.f32.vlgmr.msra.gmra.mxu1 %v5329_v44  ;;  %2030 = vmatmul.f32.vlgmr.msrb.gmra.mxu2 %v5329_v44 }
 0x8e4   :  { %2050 = vmatmul.f32.vlgmr.msrb.gmra.mxu3 %v5329_v44  ;;  %2270 = vmatpush.msra.mxu1 %v5178_v30 }
 0x8e5   :  { %2348 = vmatpush.msrb.mxu2 %v5184_v42  ;;  %2368 = vmatpush.msrb.mxu3 %v5339_v49 }
 0x8e6   :  { %2271 = vmatpush.msra.mxu1 %v5191_v54 }
 0x8e7   :  { %2349 = vmatpush.msrb.mxu2 %v5197_v7  ;;  %2369 = vmatpush.msrb.mxu3 %v5347_v55 }
 0x8e8   :  { %2272 = vmatpush.msra.mxu1 %v5204_v59 }
 0x8e9   :  { %2350 = vmatpush.msrb.mxu2 %v5210_v10  ;;  %2370 = vmatpush.msrb.mxu3 %v5355_v29 }
 0x8ea   :  { %2273 = vmatpush.msra.mxu1 %v5217_v18 }
 0x8eb   :  { %2351 = vmatpush.msrb.mxu2 %v5223_v58  ;;  %2371 = vmatpush.msrb.mxu3 %v5363_v3 }
 0x8ec   :  { %2274 = vmatpush.msra.mxu1 %v5369_v38 }
 0x8ed   :  { %2352 = vmatpush.msrb.mxu2 %v5231_v20  ;;  %2372 = vmatpush.msrb.mxu3 %v5376_v21 }
 0x8ee   :  { %2275 = vmatpush.msra.mxu1 %v5382_v4 }
 0x8ef   :  { %2353 = vmatpush.msrb.mxu2 %v5239_v26  ;;  %2373 = vmatpush.msrb.mxu3 %v5389_v41 }
 0x8f0   :  { %2276 = vmatpush.msra.mxu1 %v5395_v61 }
 0x8f1   :  { %2354 = vmatpush.msrb.mxu2 %v5247_v11  ;;  %2374 = vmatpush.msrb.mxu3 %v5402_v35 }
 0x8f2   :  { %2277 = vmatpush.msra.mxu1 %v5408_v15 }
 0x8f3   :  { %2355 = vmatpush.msrb.mxu2 %v5255_v22  ;;  %2375 = vmatpush.msrb.mxu3 %v5415_v63 }
 0x8f4   :  { %2278 = vmatpush.msra.mxu1 %v5421_v2 }
 0x8f5   :  { %2356 = vmatpush.msrb.mxu2 %v5263_v19  ;;  %2376 = vmatpush.msrb.mxu3 %v5428_v6 }
 0x8f6   :  { %2279 = vmatpush.msra.mxu1 %v5434_v48 }
 0x8f7   :  { %2357 = vmatpush.msrb.mxu2 %v5271_v40  ;;  %2377 = vmatpush.msrb.mxu3 %v5441_v0 }
 0x8f8   :  { %2280 = vmatpush.msra.mxu1 %v5447_v34 }
 0x8f9   :  { %2358 = vmatpush.msrb.mxu2 %v5279_v62  ;;  %2378 = vmatpush.msrb.mxu3 %v5454_v8 }
 0x8fa   :  { %2281 = vmatpush.msra.mxu1 %v5460_v9 }
 0x8fb   :  { %2359 = vmatpush.msrb.mxu2 %v5287_v43  ;;  %2379 = vmatpush.msrb.mxu3 %v5467_v24 }
 0x8fc   :  { %2282 = vmatpush.msra.mxu1 %v5473_v28 }
 0x8fd   :  { %2360 = vmatpush.msrb.mxu2 %v5295_v57  ;;  %2380 = vmatpush.msrb.mxu3 %v5480_v37 }
 0x8fe   :  { %2283 = vmatpush.msra.mxu1 %v5486_v47 }
 0x8ff   :  { %2361 = vmatpush.msrb.mxu2 %v5303_v14  ;;  %2381 = vmatpush.msrb.mxu3 %v5493_v31  ;;  %v6031_v31 = vld [vmem:[#allocation30_spill] sm:$0xff] }
 0x900   :  { %2284 = vmatpush.msra.mxu1 %v5499_v50 }
 0x901   :  { %2362 = vmatpush.msrb.mxu2 %v5311_v56  ;;  %2382 = vmatpush.msrb.mxu3 %v5506_v23 }
 0x902   :  { %2285 = vmatpush.msra.mxu1 %v5512_v36 }
 0x903   :  { %2363 = vmatpush.msrb.mxu2 %v5319_v5  ;;  %2383 = vmatpush.msrb.mxu3 %v5519_v60 }
 0x960   :  { %v2011_v25 = vpop.f32.mrf.mxu1 }
 0x961   :  { %v2054_v1 = vadd.f32 %v2011_v25, %v6030_v16 }
 0x963   :  { %v2815_v53 = vmul.f32 -1.442695, %v2054_v1 }
 0x965   :  { %2958 = vpow2.f32 %v2815_v53 }
 0x966   :  { %v2031_v12 = vpop.f32.mrf.mxu2 }
 0x967   :  { %v2074_v46 = vadd.f32 %v2031_v12, %v5089_v52  ;;  %v2051_v53 = vpop.f32.mrf.mxu3 }
 0x969   :  { %v2816_v45 = vmul.f32 -1.442695, %v2074_v46 }
 0x96b   :  { %v2959_v39 = vpop.eup %2958  ;;  %2960 = vpow2.f32 %v2816_v45 }
 0x96c   :  { %v2058_v27 = vadd.f32 1.0, %v2959_v39 }
 0x96e   :  { %2962 = vrcp.f32 %v2058_v27  ;;  %v2070_v60 = vand.u32 2147483648, %v2058_v27  ;;  %v2068_v16 = vand.u32 2147483647, %v2058_v27  ;;  %vm2064_vm13 = vweird.f32 %v2058_v27 }
 0x970   :  { %v2071_v12 = vor.u32 1.1754944e-38, %v2070_v60  ;;  %vm2069_vm15 = vcmp.eq.f32.partialorder %v2068_v16, 8.507059e+37 }
 0x971   :  { %v2961_v33 = vpop.eup %2960 }
 0x972   :  { %v2078_v17 = vadd.f32 1.0, %v2961_v33  ;;  %v2094_v33 = vadd.f32 %v5078_v32, %v2051_v53 }
 0x974   :  { %v2963_v51 = vpop.eup %2962  ;;  %2964 = vrcp.f32 %v2078_v17  ;;  %vm2084_vm2 = vweird.f32 %v2078_v17 }
 0x975   :  { %v2060_v13 = vmul.f32 %v2963_v51, %v2058_v27  ;;  %vm2065_vm12 = vweird.f32 %v2963_v51 }
 0x976   :  { %vm2066_vm14 = vmor %vm2064_vm13, %vm2065_vm12 }
 0x977   :  { %v2061_v5 = vsub.f32 1.0, %v2060_v13  ;;  %v2090_v13 = vand.u32 2147483648, %v2078_v17 }
 0x979   :  { %v2062_v36 = vmul.f32 %v2963_v51, %v2061_v5  ;;  %v2088_v5 = vand.u32 2147483647, %v2078_v17 }
 0x97a   :  { %v2965_v1 = vpop.eup %2964 }
 0x97b   :  { %v2080_v25 = vmul.f32 %v2965_v1, %v2078_v17  ;;  %v2063_v23 = vadd.f32 %v2963_v51, %v2062_v36  ;;  %vm2085_vm1 = vweird.f32 %v2965_v1  ;;  %v2091_v36 = vor.u32 1.1754944e-38, %v2090_v13  ;;  %v6032_v17 = vld [vmem:[#allocation6_spill] sm:$0xff] }
 0x97c   :  { %vm2086_vm3 = vmor %vm2084_vm2, %vm2085_vm1  ;;  %vm2089_vm4 = vcmp.eq.f32.partialorder %v2088_v5, 8.507059e+37 }
 0x97d   :  { %v2081_v52 = vsub.f32 1.0, %v2080_v25  ;;  %v2067_v46 = vsel %vm2066_vm14, %v2963_v51, %v2063_v23 }
 0x97e   :  { %v2072_v45 = vsel %vm2069_vm15, %v2071_v12, %v2067_v46 }
 0x97f   :  { %v2082_v39 = vmul.f32 %v2965_v1, %v2081_v52  ;;  %v2095_v56 = vmul.f32 %v2094_v33, %v2072_v45 }
 0x981   :  { %v2083_v50 = vadd.f32 %v2965_v1, %v2082_v39  ;;  %v2096_v14 = vadd.f32 %v2095_v56, %v6031_v31 }
 0x983   :  { %v2087_v27 = vsel %vm2086_vm3, %v2965_v1, %v2083_v50  ;;  %2966 = vtanh.f32 %v2096_v14 }
 0x984   :  { %v2092_v60 = vsel %vm2089_vm4, %v2091_v36, %v2087_v27  ;;  %v6042_v36 = vld [vmem:[#allocation22_spill] sm:$0xff] }
 0x985   :  { %v2098_v51 = vsub.f32 1.0, %v2092_v60  ;;  %v2100_v53 = vmul.f32 %v2092_v60, %v5329_v44 }
 0x989   :  { %v2967_v23 = vpop.eup %2966 }
 0x98a   :  { %v2099_v16 = vmul.f32 %v2967_v23, %v2098_v51 }
 0x98c   :  { %v5527_v25 = vadd.f32 %v2100_v53, %v2099_v16 }
 0x98e   :  { %2128 = vmatmul.f32.vlgmr.msrb.gmra.mxu0 %v5527_v25  ;;  %2148 = vmatmul.f32.vlgmr.msrb.gmra.mxu1 %v5527_v25 }
 0x98f   :  { %2168 = vmatmul.f32.vlgmr.msra.gmra.mxu2 %v5527_v25  ;;  %2388 = vmatpush.msrb.mxu0 %v5178_v30 }
 0x990   :  { %2466 = vmatpush.msrb.mxu1 %v5184_v42  ;;  %2486 = vmatpush.msra.mxu2 %v5339_v49  ;;  %v6033_v42 = vld [vmem:[#allocation13_spill] sm:$0xff] }
 0x991   :  { %2389 = vmatpush.msrb.mxu0 %v5191_v54 }
 0x992   :  { %2467 = vmatpush.msrb.mxu1 %v5197_v7  ;;  %2487 = vmatpush.msra.mxu2 %v5347_v55  ;;  %v6034_v7 = vld [vmem:[#allocation8_spill] sm:$0xff] }
 0x993   :  { %2390 = vmatpush.msrb.mxu0 %v5204_v59 }
 0x994   :  { %2468 = vmatpush.msrb.mxu1 %v5210_v10  ;;  %2488 = vmatpush.msra.mxu2 %v5355_v29  ;;  %v6035_v10 = vld [vmem:[#allocation11_spill] sm:$0xff] }
 0x995   :  { %2391 = vmatpush.msrb.mxu0 %v5217_v18 }
 0x996   :  { %2469 = vmatpush.msrb.mxu1 %v5223_v58  ;;  %2489 = vmatpush.msra.mxu2 %v5363_v3  ;;  %v6036_v58 = vld [vmem:[#allocation9_spill] sm:$0xff] }
 0x997   :  { %2392 = vmatpush.msrb.mxu0 %v5369_v38 }
 0x998   :  { %2470 = vmatpush.msrb.mxu1 %v5231_v20  ;;  %2490 = vmatpush.msra.mxu2 %v5376_v21  ;;  %v6037_v20 = vld [vmem:[#allocation20_spill] sm:$0xff] }
 0x999   :  { %2393 = vmatpush.msrb.mxu0 %v5382_v4 }
 0x99a   :  { %2471 = vmatpush.msrb.mxu1 %v5239_v26  ;;  %2491 = vmatpush.msra.mxu2 %v5389_v41  ;;  %v6038_v26 = vld [vmem:[#allocation12_spill] sm:$0xff] }
 0x99b   :  { %2394 = vmatpush.msrb.mxu0 %v5395_v61 }
 0x99c   :  { %2472 = vmatpush.msrb.mxu1 %v5247_v11  ;;  %2492 = vmatpush.msra.mxu2 %v5402_v35  ;;  %v6039_v11 = vld [vmem:[#allocation14_spill] sm:$0xff] }
 0x99d   :  { %2395 = vmatpush.msrb.mxu0 %v5408_v15 }
 0x99e   :  { %2473 = vmatpush.msrb.mxu1 %v5255_v22  ;;  %2493 = vmatpush.msra.mxu2 %v5415_v63 }
 0x99f   :  { %2396 = vmatpush.msrb.mxu0 %v5421_v2 }
 0x9a0   :  { %2474 = vmatpush.msrb.mxu1 %v5263_v19  ;;  %2494 = vmatpush.msra.mxu2 %v5428_v6 }
 0x9a1   :  { %2397 = vmatpush.msrb.mxu0 %v5434_v48 }
 0x9a2   :  { %2475 = vmatpush.msrb.mxu1 %v5271_v40  ;;  %2495 = vmatpush.msra.mxu2 %v5441_v0  ;;  %v6040_v40 = vld [vmem:[#allocation24_spill] sm:$0xff] }
 0x9a3   :  { %2398 = vmatpush.msrb.mxu0 %v5447_v34 }
 0x9a4   :  { %2476 = vmatpush.msrb.mxu1 %v5279_v62  ;;  %2496 = vmatpush.msra.mxu2 %v5454_v8 }
 0x9a5   :  { %2399 = vmatpush.msrb.mxu0 %v5460_v9 }
 0x9a6   :  { %2477 = vmatpush.msrb.mxu1 %v5287_v43  ;;  %2497 = vmatpush.msra.mxu2 %v5467_v24  ;;  %v6041_v43 = vld [vmem:[#allocation17_spill] sm:$0xff] }
 0x9a7   :  { %2400 = vmatpush.msrb.mxu0 %v5473_v28 }
 0x9a8   :  { %2478 = vmatpush.msrb.mxu1 %v5295_v57  ;;  %2498 = vmatpush.msra.mxu2 %v5480_v37 }
 0x9a9   :  { %2401 = vmatpush.msrb.mxu0 %v5486_v47 }
 0x9aa   :  { %2479 = vmatpush.msrb.mxu1 %v6032_v17  ;;  %2499 = vmatpush.msra.mxu2 %v6033_v42 }
 0x9ab   :  { %2402 = vmatpush.msrb.mxu0 %v6034_v7 }
 0x9ac   :  { %2480 = vmatpush.msrb.mxu1 %v6035_v10  ;;  %2500 = vmatpush.msra.mxu2 %v6036_v58  ;;  %v2600_v10 = vld [vmem:[%s5840_s13 + $0x80] sm:$0xff] }
 0x9ad   :  { %2403 = vmatpush.msrb.mxu0 %v6037_v20 }
 0x9ae   :  { %2481 = vmatpush.msrb.mxu1 %v6038_v26  ;;  %2501 = vmatpush.msra.mxu2 %v6039_v11  ;;  %v2596_v11 = vld [vmem:[%s5840_s13 + $0x60] sm:$0xff] }
 0xa0b   :  { %v2129_v22 = vpop.f32.mrf.mxu0  ;;  %v2149_v19 = vpop.f32.mrf.mxu1 }
 0xa0c   :  { %v2172_v62 = vadd.f32 %v2129_v22, %v6040_v40  ;;  %v2192_v57 = vadd.f32 %v2149_v19, %v6041_v43  ;;  %v2594_v22 = vld [vmem:[%s5840_s13 + $0x50] sm:$0xff]  ;;  %v2592_v40 = vld [vmem:[%s5840_s13 + $0x40] sm:$0xff] }
 0xa0e   :  { %v2817_v14 = vmul.f32 -1.442695, %v2172_v62  ;;  %v2818_v56 = vmul.f32 -1.442695, %v2192_v57  ;;  %v2590_v57 = vld [vmem:[%s5840_s13 + $0x30] sm:$0xff] }
 0xa10   :  { %2968 = vpow2.f32 %v2817_v14  ;;  %v2588_v14 = vld [vmem:[%s5840_s13 + $0x20] sm:$0xff] }
 0xa11   :  { %2970 = vpow2.f32 %v2818_v56  ;;  %v2586_v56 = vld [vmem:[%s5840_s13 + $0x10] sm:$0xff] }
 0xa12   :  { %v2169_v50 = vpop.f32.mrf.mxu2 }
 0xa13   :  { %v2212_v46 = vadd.f32 %v5078_v32, %v2169_v50 }
 0xa16   :  { %v2969_v49 = vpop.eup %2968 }
 0xa17   :  { %v2971_v55 = vpop.eup %2970  ;;  %v2176_v29 = vadd.f32 1.0, %v2969_v49 }
 0xa18   :  { %v2196_v3 = vadd.f32 1.0, %v2971_v55  ;;  %v2584_v55 = vld [vmem:[%s5840_s13] sm:$0xff] }
 0xa19   :  { %2972 = vrcp.f32 %v2176_v29  ;;  %v2188_v8 = vand.u32 2147483648, %v2176_v29  ;;  %v2186_v37 = vand.u32 2147483647, %v2176_v29  ;;  %vm2182_vm5 = vweird.f32 %v2176_v29 }
 0xa1a   :  { %2974 = vrcp.f32 %v2196_v3  ;;  %v2208_v39 = vand.u32 2147483648, %v2196_v3  ;;  %vm2202_vm9 = vweird.f32 %v2196_v3  ;;  %v2206_v5 = vand.u32 2147483647, %v2196_v3 }
 0xa1b   :  { %v2189_v12 = vor.u32 1.1754944e-38, %v2188_v8  ;;  %vm2187_vm7 = vcmp.eq.f32.partialorder %v2186_v37, 8.507059e+37 }
 0xa1c   :  { %v2209_v51 = vor.u32 1.1754944e-38, %v2208_v39  ;;  %vm2207_vm11 = vcmp.eq.f32.partialorder %v2206_v5, 8.507059e+37  ;;  %v6045_v39 = vld [vmem:[#allocation31_spill] sm:$0xff] }
 0xa1f   :  { %v2973_v21 = vpop.eup %2972 }
 0xa20   :  { %v2975_v41 = vpop.eup %2974  ;;  %v2178_v35 = vmul.f32 %v2973_v21, %v2176_v29  ;;  %vm2183_vm0 = vweird.f32 %v2973_v21 }
 0xa21   :  { %v2198_v63 = vmul.f32 %v2975_v41, %v2196_v3  ;;  %vm2184_vm6 = vmor %vm2182_vm5, %vm2183_vm0  ;;  %vm2203_vm8 = vweird.f32 %v2975_v41 }
 0xa22   :  { %v2179_v6 = vsub.f32 1.0, %v2178_v35  ;;  %vm2204_vm10 = vmor %vm2202_vm9, %vm2203_vm8 }
 0xa23   :  { %v2199_v0 = vsub.f32 1.0, %v2198_v63 }
 0xa24   :  { %v2180_v24 = vmul.f32 %v2973_v21, %v2179_v6 }
 0xa25   :  { %v2200_v31 = vmul.f32 %v2975_v41, %v2199_v0 }
 0xa26   :  { %v2181_v1 = vadd.f32 %v2973_v21, %v2180_v24 }
 0xa27   :  { %v2201_v33 = vadd.f32 %v2975_v41, %v2200_v31  ;;  %v5659_v31 = vld [vmem:[%s5838_s12] ss:$0 sm:$0xff] }
 0xa28   :  { %v2185_v52 = vsel %vm2184_vm6, %v2973_v21, %v2181_v1 }
 0xa29   :  { %v2190_v45 = vsel %vm2187_vm7, %v2189_v12, %v2185_v52  ;;  %v2205_v60 = vsel %vm2204_vm10, %v2975_v41, %v2201_v33 }
 0xa2a   :  { %v2213_v13 = vmul.f32 %v2212_v46, %v2190_v45  ;;  %v2210_v23 = vsel %vm2207_vm11, %v2209_v51, %v2205_v60 }
 0xa2b   :  { %v2216_v16 = vsub.f32 1.0, %v2210_v23  ;;  %v2218_v32 = vmul.f32 %v2210_v23, %v5527_v25 }
 0xa2c   :  { %v2214_v27 = vadd.f32 %v2213_v13, %v6042_v36 }
 0xa2e   :  { %2976 = vtanh.f32 %v2214_v27 }
 0xa34   :  { %v2977_v53 = vpop.eup %2976 }
 0xa35   :  { %v2217_v17 = vmul.f32 %v2977_v53, %v2216_v16 }
 0xa37   :  { %v5585_v42 = vadd.f32 %v2218_v32, %v2217_v17  ;;  %v6046_v17 = vld [vmem:[#allocation33_spill] sm:$0xff] }
 0xa38   :  { %v6047_v32 = vld [vmem:[#allocation5_spill] sm:$0xff] }
 0xa39   :  { %2246 = vmatmul.f32.vlgmr.msra.gmra.mxu3 %v5585_v42  ;;  %2266 = vmatmul.f32.vlgmr.msra.gmra.mxu0 %v5585_v42 }
 0xa3a   :  { %2286 = vmatmul.f32.vlgmr.msra.gmra.mxu1 %v5585_v42  ;;  %2506 = vmatpush.msra.mxu3 %v5178_v30  ;;  %v2614_v30 = vld [vmem:[%s5840_s13 + $0xf0] sm:$0xff] }
 0xa3b   :  { %2622 = vmatpush.msra.mxu0 %v2614_v30  ;;  %v2615_v30 = vld [vmem:[%s5840_s13 + $0xf8] sm:$0xff] }
 0xa3c   :  { %2507 = vmatpush.msra.mxu3 %v5191_v54  ;;  %v2612_v54 = vld [vmem:[%s5840_s13 + $0xe0] sm:$0xff]  ;;  %2663 = vmatpush.msra.mxu1 %v2615_v30 }
 0xa3d   :  { %2623 = vmatpush.msra.mxu0 %v2612_v54  ;;  %v2613_v54 = vld [vmem:[%s5840_s13 + $0xe8] sm:$0xff] }
 0xa3e   :  { %2508 = vmatpush.msra.mxu3 %v5204_v59  ;;  %2664 = vmatpush.msra.mxu1 %v2613_v54  ;;  %v6050_v54 = vld [vmem:[#allocation25_spill] sm:$0xff] }
 0xa40   :  { %2509 = vmatpush.msra.mxu3 %v5217_v18  ;;  %v6043_v18 = vld [vmem:[#allocation27_spill] sm:$0xff] }
 0xa42   :  { %2510 = vmatpush.msra.mxu3 %v5369_v38 }
 0xa44   :  { %2511 = vmatpush.msra.mxu3 %v5382_v4  ;;  %v2610_v4 = vld [vmem:[%s5840_s13 + $0xd0] sm:$0xff] }
 0xa45   :  { %2624 = vmatpush.msra.mxu0 %v2610_v4  ;;  %v2609_v4 = vld [vmem:[%s5840_s13 + $0xc8] sm:$0xff] }
 0xa46   :  { %2512 = vmatpush.msra.mxu3 %v5395_v61 }
 0xa48   :  { %2513 = vmatpush.msra.mxu3 %v5408_v15  ;;  %v2608_v15 = vld [vmem:[%s5840_s13 + $0xc0] sm:$0xff] }
 0xa49   :  { %2625 = vmatpush.msra.mxu0 %v2608_v15 }
 0xa4a   :  { %2514 = vmatpush.msra.mxu3 %v5421_v2  ;;  %v2606_v2 = vld [vmem:[%s5840_s13 + $0xb0] sm:$0xff] }
 0xa4b   :  { %2626 = vmatpush.msra.mxu0 %v2606_v2 }
 0xa4c   :  { %2515 = vmatpush.msra.mxu3 %v5434_v48 }
 0xa4e   :  { %2516 = vmatpush.msra.mxu3 %v5447_v34  ;;  %v6044_v34 = vld [vmem:[#allocation32_spill] sm:$0xff] }
 0xa50   :  { %2517 = vmatpush.msra.mxu3 %v5460_v9 }
 0xa52   :  { %2518 = vmatpush.msra.mxu3 %v5473_v28  ;;  %v2604_v28 = vld [vmem:[%s5840_s13 + $0xa0] sm:$0xff] }
 0xa53   :  { %2627 = vmatpush.msra.mxu0 %v2604_v28  ;;  %v6049_v28 = vld [vmem:[#allocation19_spill] sm:$0xff] }
 0xa54   :  { %2519 = vmatpush.msra.mxu3 %v5486_v47 }
 0xa56   :  { %2520 = vmatpush.msra.mxu3 %v6034_v7  ;;  %v2602_v7 = vld [vmem:[%s5840_s13 + $0x90] sm:$0xff] }
 0xa57   :  { %2628 = vmatpush.msra.mxu0 %v2602_v7  ;;  %v2605_v7 = vld [vmem:[%s5840_s13 + $0xa8] sm:$0xff] }
 0xa58   :  { %2521 = vmatpush.msra.mxu3 %v6037_v20  ;;  %v2598_v20 = vld [vmem:[%s5840_s13 + $0x70] sm:$0xff] }
 0xa59   :  { %2629 = vmatpush.msra.mxu0 %v2600_v10 }
 0xa5b   :  { %2630 = vmatpush.msra.mxu0 %v2598_v20 }
 0xa5d   :  { %2631 = vmatpush.msra.mxu0 %v2596_v11 }
 0xa5f   :  { %2632 = vmatpush.msra.mxu0 %v2594_v22  ;;  %v2601_v22 = vld [vmem:[%s5840_s13 + $0x88] sm:$0xff] }
 0xa61   :  { %2633 = vmatpush.msra.mxu0 %v2592_v40  ;;  %v2597_v40 = vld [vmem:[%s5840_s13 + $0x68] sm:$0xff] }
 0xa63   :  { %2634 = vmatpush.msra.mxu0 %v2590_v57  ;;  %v2595_v57 = vld [vmem:[%s5840_s13 + $0x58] sm:$0xff] }
 0xa65   :  { %2635 = vmatpush.msra.mxu0 %v2588_v14 }
 0xa67   :  { %2636 = vmatpush.msra.mxu0 %v2586_v56 }
 0xa69   :  { %2637 = vmatpush.msra.mxu0 %v2584_v55 }
 0xab6   :  { %v2267_v59 = vpop.f32.mrf.mxu0 }
 0xab7   :  { %v2310_v38 = vadd.f32 %v2267_v59, %v6043_v18  ;;  %v2287_v8 = vpop.f32.mrf.mxu1  ;;  %v2611_v18 = vld [vmem:[%s5840_s13 + $0xd8] sm:$0xff] }
 0xab8   :  { %v2330_v50 = vadd.f32 %v5659_v31, %v2287_v8  ;;  %2665 = vmatpush.msra.mxu1 %v2611_v18 }
 0xab9   :  { %v2820_v61 = vmul.f32 -1.442695, %v2310_v38  ;;  %v5689_v38 = vld [vmem:[%s5841_s14] sm:$0x3] }
 0xaba   :  { %2666 = vmatpush.msra.mxu1 %v2609_v4 }
 0xabb   :  { %2978 = vpow2.f32 %v2820_v61  ;;  %v2607_v61 = vld [vmem:[%s5840_s13 + $0xb8] sm:$0xff] }
 0xabc   :  { %v2247_v48 = vpop.f32.mrf.mxu3  ;;  %2667 = vmatpush.msra.mxu1 %v2607_v61 }
 0xabd   :  { %v2290_v9 = vadd.f32 %v2247_v48, %v6044_v34  ;;  %v5698_v48 = vperm.slane %v5689_v38, 0  ;;  %v6048_v34 = vld [vmem:[#allocation28_spill] sm:$0xff] }
 0xabe   :  { %2668 = vmatpush.msra.mxu1 %v2605_v7 }
 0xabf   :  { %v2819_v47 = vmul.f32 -1.442695, %v2290_v9 }
 0xac1   :  { %v2979_v58 = vpop.eup %2978  ;;  %2980 = vpow2.f32 %v2819_v47 }
 0xac2   :  { %v2314_v26 = vadd.f32 1.0, %v2979_v58 }
 0xac4   :  { %2982 = vrcp.f32 %v2314_v26  ;;  %v2326_v46 = vand.u32 2147483648, %v2314_v26  ;;  %vm2320_vm2 = vweird.f32 %v2314_v26  ;;  %v2324_v45 = vand.u32 2147483647, %v2314_v26 }
 0xac6   :  { %v2327_v36 = vor.u32 1.1754944e-38, %v2326_v46  ;;  %vm2325_vm4 = vcmp.eq.f32.partialorder %v2324_v45, 8.507059e+37 }
 0xac7   :  { %v2981_v19 = vpop.eup %2980 }
 0xac8   :  { %v2294_v62 = vadd.f32 1.0, %v2981_v19  ;;  %v2599_v19 = vld [vmem:[%s5840_s13 + $0x78] sm:$0xff] }
 0xaca   :  { %2984 = vrcp.f32 %v2294_v62  ;;  %v2983_v43 = vpop.eup %2982  ;;  %v2306_v35 = vand.u32 2147483648, %v2294_v62  ;;  %v2304_v6 = vand.u32 2147483647, %v2294_v62  ;;  %vm2300_vm13 = vweird.f32 %v2294_v62 }
 0xacb   :  { %v2316_v49 = vmul.f32 %v2983_v43, %v2314_v26  ;;  %vm2321_vm1 = vweird.f32 %v2983_v43  ;;  %v2603_v26 = vld [vmem:[%s5840_s13 + $0x98] sm:$0xff] }
 0xacc   :  { %v2307_v37 = vor.u32 1.1754944e-38, %v2306_v35  ;;  %vm2305_vm15 = vcmp.eq.f32.partialorder %v2304_v6, 8.507059e+37  ;;  %vm2322_vm3 = vmor %vm2320_vm2, %vm2321_vm1  ;;  %2669 = vmatpush.msra.mxu1 %v2603_v26  ;;  %v6051_v26 = vld [vmem:[#allocation18_spill] sm:$0xff] }
 0xacd   :  { %v2317_v21 = vsub.f32 1.0, %v2316_v49 }
 0xace   :  { %2670 = vmatpush.msra.mxu1 %v2601_v22 }
 0xacf   :  { %v2318_v0 = vmul.f32 %v2983_v43, %v2317_v21  ;;  %v2589_v21 = vld [vmem:[%s5840_s13 + $0x28] sm:$0xff] }
 0xad0   :  { %v2985_v29 = vpop.eup %2984  ;;  %2671 = vmatpush.msra.mxu1 %v2599_v19 }
 0xad1   :  { %v2296_v3 = vmul.f32 %v2985_v29, %v2294_v62  ;;  %vm2301_vm12 = vweird.f32 %v2985_v29  ;;  %v2319_v12 = vadd.f32 %v2983_v43, %v2318_v0 }
 0xad2   :  { %vm2302_vm14 = vmor %vm2300_vm13, %vm2301_vm12  ;;  %2672 = vmatpush.msra.mxu1 %v2597_v40 }
 0xad3   :  { %v2297_v41 = vsub.f32 1.0, %v2296_v3  ;;  %v2323_v5 = vsel %vm2322_vm3, %v2983_v43, %v2319_v12  ;;  %v2591_v3 = vld [vmem:[%s5840_s13 + $0x38] sm:$0xff] }
 0xad4   :  { %v2328_v27 = vsel %vm2325_vm4, %v2327_v36, %v2323_v5  ;;  %2673 = vmatpush.msra.mxu1 %v2595_v57 }
 0xad5   :  { %v2298_v63 = vmul.f32 %v2985_v29, %v2297_v41  ;;  %v2334_v60 = vsub.f32 1.0, %v2328_v27  ;;  %v2336_v16 = vmul.f32 %v2328_v27, %v5585_v42  ;;  %v2587_v41 = vld [vmem:[%s5840_s13 + $0x18] sm:$0xff] }
 0xad7   :  { %v2299_v24 = vadd.f32 %v2985_v29, %v2298_v63  ;;  %v2585_v63 = vld [vmem:[%s5840_s13 + $0x8] sm:$0xff] }
 0xad9   :  { %v2303_v1 = vsel %vm2302_vm14, %v2985_v29, %v2299_v24  ;;  %v2593_v29 = vld [vmem:[%s5840_s13 + $0x48] sm:$0xff] }
 0xada   :  { %v2308_v52 = vsel %vm2305_vm15, %v2307_v37, %v2303_v1  ;;  %2674 = vmatpush.msra.mxu1 %v2593_v29 }
 0xadb   :  { %v2331_v33 = vmul.f32 %v2330_v50, %v2308_v52 }
 0xadc   :  { %2675 = vmatpush.msra.mxu1 %v2591_v3 }
 0xadd   :  { %v2332_v13 = vadd.f32 %v2331_v33, %v6045_v39 }
 0xade   :  { %2676 = vmatpush.msra.mxu1 %v2589_v21 }
 0xadf   :  { %2986 = vtanh.f32 %v2332_v13 }
 0xae0   :  { %2677 = vmatpush.msra.mxu1 %v2587_v41 }
 0xae2   :  { %2678 = vmatpush.msra.mxu1 %v2585_v63 }
 0xae5   :  { %v2987_v51 = vpop.eup %2986 }
 0xae6   :  { %v2335_v23 = vmul.f32 %v2987_v51, %v2334_v60 }
 0xae8   :  { %v5664_v53 = vadd.f32 %v2336_v16, %v2335_v23 }
 0xaea   :  { %2364 = vmatmul.f32.vlgmr.msrb.gmra.mxu2 %v5664_v53  ;;  %2384 = vmatmul.f32.vlgmr.msrb.gmra.mxu3 %v5664_v53 }
 0xaeb   :  { %2404 = vmatmul.f32.vlgmr.msrb.gmra.mxu0 %v5664_v53 }
 0xaf3   :  { %2638 = vmatmul.f32.vlgmr.msra.gmra.mxu0 %v6046_v17 }
 0xafb   :  { %2641 = vmatmul.f32.gmra.mxu0 %v6047_v32 }
 0xb03   :  { %2644 = vmatmul.f32.gmra.mxu0 %v5329_v44 }
 0xb0b   :  { %2647 = vmatmul.f32.gmra.mxu0 %v5527_v25 }
 0xb13   :  { %2650 = vmatmul.f32.gmra.mxu0 %v5585_v42 }
 0xb1b   :  { %2653 = vmatmul.f32.gmra.mxu0 %v5664_v53 }
 0xb68   :  { %v5681_v59 = vpop.f32.mrf.mxu0 }
 0xb69   :  { %v2448_v36 = vadd.f32 %v5659_v31, %v5681_v59 }
 0xb6d   :  { %v2365_v15 = vpop.f32.mrf.mxu2  ;;  %v2385_v2 = vpop.f32.mrf.mxu3 }
 0xb6e   :  { %v2408_v9 = vadd.f32 %v2365_v15, %v6048_v34  ;;  %v2428_v47 = vadd.f32 %v2385_v2, %v6049_v28 }
 0xb70   :  { %v2821_v10 = vmul.f32 -1.442695, %v2408_v9  ;;  %v2822_v58 = vmul.f32 -1.442695, %v2428_v47  ;;  %v2639_v20 = vpop.f32.mrf.mxu0 }
 0xb71   :  { %v2640_v11 = vadd.f32 %v2639_v20, %v5698_v48 }
 0xb72   :  { %2988 = vpow2.f32 %v2821_v10 }
 0xb73   :  { %2990 = vpow2.f32 %v2822_v58  ;;  %2704 = vst [vmem:[%s5842_s15] sm:$0xff] %v2640_v11 }
 0xb78   :  { %v2989_v62 = vpop.eup %2988  ;;  %v2642_v43 = vpop.f32.mrf.mxu0 }
 0xb79   :  { %v2991_v14 = vpop.eup %2990  ;;  %v2412_v56 = vadd.f32 1.0, %v2989_v62  ;;  %v2643_v49 = vadd.f32 %v2642_v43, %v5698_v48 }
 0xb7a   :  { %v2432_v55 = vadd.f32 1.0, %v2991_v14 }
 0xb7b   :  { %2992 = vrcp.f32 %v2412_v56  ;;  %2706 = vst [vmem:[%s5842_s15 + $0x10] sm:$0xff] %v2643_v49  ;;  %v2424_v1 = vand.u32 2147483648, %v2412_v56  ;;  %v2422_v46 = vand.u32 2147483647, %v2412_v56  ;;  %vm2418_vm5 = vweird.f32 %v2412_v56 }
 0xb7c   :  { %2994 = vrcp.f32 %v2432_v55  ;;  %v2444_v16 = vand.u32 2147483648, %v2432_v55  ;;  %vm2438_vm9 = vweird.f32 %v2432_v55  ;;  %v2442_v30 = vand.u32 2147483647, %v2432_v55 }
 0xb7d   :  { %v2425_v13 = vor.u32 1.1754944e-38, %v2424_v1  ;;  %vm2423_vm7 = vcmp.eq.f32.partialorder %v2422_v46, 8.507059e+37 }
 0xb7e   :  { %v2445_v61 = vor.u32 1.1754944e-38, %v2444_v16  ;;  %vm2443_vm11 = vcmp.eq.f32.partialorder %v2442_v30, 8.507059e+37 }
 0xb80   :  { %v2645_v35 = vpop.f32.mrf.mxu0 }
 0xb81   :  { %v2993_v6 = vpop.eup %2992  ;;  %v2646_v0 = vadd.f32 %v2645_v35, %v5698_v48 }
 0xb82   :  { %v2995_v8 = vpop.eup %2994  ;;  %v2414_v24 = vmul.f32 %v2993_v6, %v2412_v56  ;;  %vm2419_vm0 = vweird.f32 %v2993_v6 }
 0xb83   :  { %v2434_v37 = vmul.f32 %v2995_v8, %v2432_v55  ;;  %2708 = vst [vmem:[%s5842_s15 + $0x20] sm:$0xff] %v2646_v0  ;;  %vm2420_vm6 = vmor %vm2418_vm5, %vm2419_vm0  ;;  %vm2439_vm8 = vweird.f32 %v2995_v8 }
 0xb84   :  { %v2415_v50 = vsub.f32 1.0, %v2414_v24  ;;  %vm2440_vm10 = vmor %vm2438_vm9, %vm2439_vm8 }
 0xb85   :  { %v2435_v12 = vsub.f32 1.0, %v2434_v37 }
 0xb86   :  { %v2416_v52 = vmul.f32 %v2993_v6, %v2415_v50 }
 0xb87   :  { %v2436_v33 = vmul.f32 %v2995_v8, %v2435_v12 }
 0xb88   :  { %v2417_v45 = vadd.f32 %v2993_v6, %v2416_v52  ;;  %v2648_v39 = vpop.f32.mrf.mxu0 }
 0xb89   :  { %v2649_v5 = vadd.f32 %v2648_v39, %v5698_v48  ;;  %v2437_v51 = vadd.f32 %v2995_v8, %v2436_v33  ;;  %v6055_v39 = vld [vmem:[#allocation35_spill] sm:$0xff] }
 0xb8a   :  { %v2421_v27 = vsel %vm2420_vm6, %v2993_v6, %v2417_v45  ;;  %v6054_v45 = vld [vmem:[#allocation34_spill] sm:$0xff] }
 0xb8b   :  { %v2426_v60 = vsel %vm2423_vm7, %v2425_v13, %v2421_v27  ;;  %2710 = vst [vmem:[%s5842_s15 + $0x30] sm:$0xff] %v2649_v5  ;;  %v2441_v4 = vsel %vm2440_vm10, %v2995_v8, %v2437_v51  ;;  %v2465_v13 = vadd.f32 %v6055_v39, %v6054_v45 }
 0xb8c   :  { %v2449_v23 = vmul.f32 %v2448_v36, %v2426_v60  ;;  %v2446_v2 = vsel %vm2443_vm11, %v2445_v61, %v2441_v4 }
 0xb8d   :  { %v2452_v34 = vsub.f32 1.0, %v2446_v2  ;;  %v2454_v47 = vmul.f32 %v2446_v2, %v5664_v53 }
 0xb8e   :  { %v2450_v18 = vadd.f32 %v2449_v23, %v6050_v54 }
 0xb90   :  { %2996 = vtanh.f32 %v2450_v18  ;;  %v2651_v59 = vpop.f32.mrf.mxu0 }
 0xb91   :  { %v2652_v15 = vadd.f32 %v2651_v59, %v5698_v48 }
 0xb93   :  { %2712 = vst [vmem:[%s5842_s15 + $0x40] sm:$0xff] %v2652_v15 }
 0xb96   :  { %v2997_v9 = vpop.eup %2996 }
 0xb97   :  { %v2453_v28 = vmul.f32 %v2997_v9, %v2452_v34 }
 0xb98   :  { %v2654_v7 = vpop.f32.mrf.mxu0 }
 0xb99   :  { %v2655_v10 = vadd.f32 %v2654_v7, %v5698_v48  ;;  %v5760_v58 = vadd.f32 %v2454_v47, %v2453_v28 }
 0xb9b   :  { %2714 = vst [vmem:[%s5842_s15 + $0x50] sm:$0xff] %v2655_v10  ;;  %2482 = vmatmul.f32.vlgmr.msrb.gmra.mxu1 %v5760_v58  ;;  %2502 = vmatmul.f32.vlgmr.msra.gmra.mxu2 %v5760_v58 }
 0xb9c   :  { %2522 = vmatmul.f32.vlgmr.msra.gmra.mxu3 %v5760_v58  ;;  %2656 = vmatmul.f32.gmra.mxu0 %v5760_v58 }
 0xba3   :  { %2679 = vmatmul.f32.vlgmr.msra.gmra.mxu1 %v6046_v17  ;;  %v6053_v17 = vld [vmem:[#allocation21_spill] sm:$0xff] }
 0xbab   :  { %2682 = vmatmul.f32.gmra.mxu1 %v6047_v32 }
 0xbb3   :  { %2685 = vmatmul.f32.gmra.mxu1 %v5329_v44  ;;  %v6052_v44 = vld [vmem:[#allocation29_spill] sm:$0xff] }
 0xbbb   :  { %2688 = vmatmul.f32.gmra.mxu1 %v5527_v25  ;;  %v2464_v25 = vadd.f32 %v6053_v17, %v6052_v44 }
 0xbc3   :  { %2691 = vmatmul.f32.gmra.mxu1 %v5585_v42  ;;  %v5784_v42 = vperm.slane %v5689_v38, 1 }
 0xbcb   :  { %2694 = vmatmul.f32.gmra.mxu1 %v5664_v53 }
 0xbd3   :  { %2697 = vmatmul.f32.gmra.mxu1 %v5760_v58 }
 0xc18   :  { %v2483_v20 = vpop.f32.mrf.mxu1 }
 0xc19   :  { %v2526_v11 = vadd.f32 %v2483_v20, %v6051_v26  ;;  %v2657_v22 = vpop.f32.mrf.mxu0 }
 0xc1a   :  { %v2658_v19 = vadd.f32 %v2657_v22, %v5698_v48 }
 0xc1b   :  { %v2823_v40 = vmul.f32 -1.442695, %v2526_v11 }
 0xc1c   :  { %2716 = vst [vmem:[%s5842_s15 + $0x60] sm:$0xff] %v2658_v19 }
 0xc1d   :  { %2998 = vpow2.f32 %v2823_v40 }
 0xc1e   :  { %v2503_v53 = vpop.f32.mrf.mxu2 }
 0xc1f   :  { %v2546_v32 = vadd.f32 %v2503_v53, %v2464_v25  ;;  %v2523_v37 = vpop.f32.mrf.mxu3 }
 0xc20   :  { %v2680_v62 = vpop.f32.mrf.mxu1  ;;  %v2566_v33 = vadd.f32 %v5659_v31, %v2523_v37 }
 0xc21   :  { %v2824_v43 = vmul.f32 -1.442695, %v2546_v32  ;;  %v2681_v57 = vadd.f32 %v2680_v62, %v5784_v42 }
 0xc23   :  { %v2999_v14 = vpop.eup %2998  ;;  %3000 = vpow2.f32 %v2824_v43  ;;  %2705 = vst [vmem:[%s5842_s15 + $0x8] sm:$0xff] %v2681_v57 }
 0xc24   :  { %v2530_v56 = vadd.f32 1.0, %v2999_v14 }
 0xc26   :  { %3002 = vrcp.f32 %v2530_v56  ;;  %v2542_v35 = vand.u32 2147483648, %v2530_v56  ;;  %v2540_v0 = vand.u32 2147483647, %v2530_v56  ;;  %vm2536_vm13 = vweird.f32 %v2530_v56 }
 0xc28   :  { %v2683_v49 = vpop.f32.mrf.mxu1  ;;  %v2543_v12 = vor.u32 1.1754944e-38, %v2542_v35  ;;  %vm2541_vm15 = vcmp.eq.f32.partialorder %v2540_v0, 8.507059e+37 }
 0xc29   :  { %v3001_v55 = vpop.eup %3000  ;;  %v2684_v29 = vadd.f32 %v2683_v49, %v5784_v42 }
 0xc2a   :  { %v2550_v38 = vadd.f32 1.0, %v3001_v55 }
 0xc2b   :  { %2707 = vst [vmem:[%s5842_s15 + $0x18] sm:$0xff] %v2684_v29 }
 0xc2c   :  { %v3003_v3 = vpop.eup %3002  ;;  %3004 = vrcp.f32 %v2550_v38  ;;  %v2562_v60 = vand.u32 2147483648, %v2550_v38  ;;  %v2560_v23 = vand.u32 2147483647, %v2550_v38  ;;  %vm2556_vm2 = vweird.f32 %v2550_v38 }
 0xc2d   :  { %v2532_v21 = vmul.f32 %v3003_v3, %v2530_v56  ;;  %vm2537_vm12 = vweird.f32 %v3003_v3 }
 0xc2e   :  { %vm2538_vm14 = vmor %vm2536_vm13, %vm2537_vm12  ;;  %v2563_v18 = vor.u32 1.1754944e-38, %v2562_v60  ;;  %vm2561_vm4 = vcmp.eq.f32.partialorder %v2560_v23, 8.507059e+37 }
 0xc2f   :  { %v2533_v41 = vsub.f32 1.0, %v2532_v21 }
 0xc30   :  { %v2686_v63 = vpop.f32.mrf.mxu1 }
 0xc31   :  { %v2534_v6 = vmul.f32 %v3003_v3, %v2533_v41  ;;  %v2687_v8 = vadd.f32 %v2686_v63, %v5784_v42 }
 0xc32   :  { %v3005_v24 = vpop.eup %3004 }
 0xc33   :  { %v2552_v50 = vmul.f32 %v3005_v24, %v2550_v38  ;;  %v2535_v1 = vadd.f32 %v3003_v3, %v2534_v6  ;;  %2709 = vst [vmem:[%s5842_s15 + $0x28] sm:$0xff] %v2687_v8  ;;  %vm2557_vm1 = vweird.f32 %v3005_v24 }
 0xc34   :  { %vm2558_vm3 = vmor %vm2556_vm2, %vm2557_vm1 }
 0xc35   :  { %v2553_v52 = vsub.f32 1.0, %v2552_v50  ;;  %v2539_v46 = vsel %vm2538_vm14, %v3003_v3, %v2535_v1 }
 0xc36   :  { %v2544_v5 = vsel %vm2541_vm15, %v2543_v12, %v2539_v46 }
 0xc37   :  { %v2567_v36 = vmul.f32 %v2566_v33, %v2544_v5  ;;  %v2554_v27 = vmul.f32 %v3005_v24, %v2553_v52 }
 0xc38   :  { %v2689_v51 = vpop.f32.mrf.mxu1 }
 0xc39   :  { %v2568_v16 = vadd.f32 %v2567_v36, %v2465_v13  ;;  %v2690_v30 = vadd.f32 %v2689_v51, %v5784_v42  ;;  %v2555_v54 = vadd.f32 %v3005_v24, %v2554_v27 }
 0xc3b   :  { %3006 = vtanh.f32 %v2568_v16  ;;  %2711 = vst [vmem:[%s5842_s15 + $0x38] sm:$0xff] %v2690_v30  ;;  %v2559_v31 = vsel %vm2558_vm3, %v3005_v24, %v2555_v54 }
 0xc3c   :  { %v2564_v4 = vsel %vm2561_vm4, %v2563_v18, %v2559_v31 }
 0xc3d   :  { %v2570_v59 = vsub.f32 1.0, %v2564_v4  ;;  %v2572_v9 = vmul.f32 %v2564_v4, %v5760_v58 }
 0xc40   :  { %v2692_v61 = vpop.f32.mrf.mxu1 }
 0xc41   :  { %v3007_v15 = vpop.eup %3006  ;;  %v2693_v2 = vadd.f32 %v2692_v61, %v5784_v42 }
 0xc42   :  { %v2571_v34 = vmul.f32 %v3007_v15, %v2570_v59 }
 0xc43   :  { %2713 = vst [vmem:[%s5842_s15 + $0x48] sm:$0xff] %v2693_v2 }
 0xc44   :  { %v2573_v28 = vadd.f32 %v2572_v9, %v2571_v34 }
 0xc46   :  { %2659 = vmatmul.f32.gmra.mxu0 %v2573_v28  ;;  %2700 = vmatmul.f32.gmra.mxu1 %v2573_v28 }
 0xc48   :  { %v2695_v47 = vpop.f32.mrf.mxu1 }
 0xc49   :  { %v2696_v7 = vadd.f32 %v2695_v47, %v5784_v42 }
 0xc4b   :  { %2715 = vst [vmem:[%s5842_s15 + $0x58] sm:$0xff] %v2696_v7 }
 0xc50   :  { %v2698_v10 = vpop.f32.mrf.mxu1 }
 0xc51   :  { %v2699_v20 = vadd.f32 %v2698_v10, %v5784_v42 }
 0xc53   :  { %2717 = vst [vmem:[%s5842_s15 + $0x68] sm:$0xff] %v2699_v20 }
 0xcc3   :  { %v2660_v58 = vpop.f32.mrf.mxu0  ;;  %v2701_v26 = vpop.f32.mrf.mxu1 }
 0xcc4   :  { %v2661_v11 = vadd.f32 %v2660_v58, %v5698_v48  ;;  %v2702_v22 = vadd.f32 %v2701_v26, %v5784_v42 }
 0xcc6   :  { %2718 = vst [vmem:[%s5842_s15 + $0x70] sm:$0xff] %v2661_v11 }
 0xcc7   :  { %2719 = vst [vmem:[%s5842_s15 + $0x78] sm:$0xff] %v2702_v22 }

</bundles_post_ra>
